<compile_context>
chip_gen: v6e
topology: v6e:2x2x1
jax: 0.10.0
libtpu: 0.0.40
codegen_flags: <defaults>
</compile_context>

<pallas_src>
import jax
import jax.numpy as jnp
from jax.experimental import pallas as pl
from jax.experimental.pallas import tpu as pltpu

EPS = 1e-5
_VMEM_LIMIT = 48 * 1024 * 1024   # scoped-VMEM request: safe on v5e/v6e (128 MiB) and v7x (64 MiB)
_VMEM_BUDGET = 40 * 1024 * 1024  # tile-sizing budget (leave headroom under the limit)


# ----------------------------- tiling heuristics ---------------------------------
def _pick_group(n, incoming, target_rows=1536):
    """Kernel-1 processes g*n flattened pair-rows per grid step."""
    best = None
    cap = max(1, n // 2)
    for g in range(1, n + 1):
        if n % g:
            continue
        if incoming and not (g % 8 == 0 or g == n):   # (8,128) rule on the z block
            continue
        if best is None:
            best = g
        if g <= cap and g * n <= target_rows:
            best = g
    return best


def _pick_tile(n):
    for t in (256, 128):           # MXU/lane friendly at realistic N_res
        if n % t == 0:
            return t
    for t in (16, 8):              # small N: keep tiles small (fully-unrolled epilogue)
        if n % t == 0 and n > t:
            return t
    return n


def _fit_tiles(n, ti, tj, tk, c_h, c_z, budget=_VMEM_BUDGET):
    """Shrink (ti, tj) until the double-buffered working set fits the VMEM budget."""
    def est(ti_, tj_):
        a = ti_ * c_h * tk * 2
        b = tj_ * c_h * tk * 2
        g = ti_ * tj_ * c_z * 2
        o = ti_ * tj_ * c_z * 4
        acc = c_h * ti_ * tj_ * 4
        return 2 * (a + b + g + o) + acc + (1 << 21)

    turn = 0
    while est(ti, tj) > budget:
        if turn == 0 and tj >= 16 and n % (tj // 2) == 0:
            tj //= 2
        elif ti >= 16 and n % (ti // 2) == 0:
            ti //= 2
        elif tj >= 16 and n % (tj // 2) == 0:
            tj //= 2
        else:
            break
        turn ^= 1
    return ti, tj


# -------- kernel 1: layer_norm_in + fused projections + gating -> a, b, gate -----
def _make_proj_kernel(outgoing, c_h, c_z):
    def kernel(z_ref, m_ref, lnw_ref, lnb_ref, wcat_ref, bcat_ref,
               a_ref, b_ref, g_ref):
        d0, d1, _ = z_ref.shape
        r = d0 * d1
        z = z_ref[...].reshape(r, c_z)                     # flatten pair dims (leading merge)
        mu = jnp.mean(z, axis=-1, keepdims=True)
        var = jnp.mean(jnp.square(z - mu), axis=-1, keepdims=True)
        zn = (z - mu) * jax.lax.rsqrt(var + EPS) * lnw_ref[...] + lnb_ref[...]

        # one wide, lane-dense bf16 MXU matmul for [a_p | b_p | a_g | b_g | g]
        lin = jnp.dot(zn.astype(jnp.bfloat16), wcat_ref[...],
                      preferred_element_type=jnp.float32) + bcat_ref[...]
        m = m_ref[...].reshape(r, 1)
        ab = lin[:, :2 * c_h] * jax.nn.sigmoid(lin[:, 2 * c_h:4 * c_h]) * m
        g_ref[...] = jax.nn.sigmoid(lin[:, 4 * c_h:]).reshape(g_ref.shape).astype(g_ref.dtype)

        # write a/b as [row, C_h, k] so kernel 2 needs no HBM transposes.
        ab3 = ab.reshape(d0, d1, 2 * c_h)
        if not outgoing:
            # incoming: rows are column-blocks of z -> regroup so dim0 is the output row
            ab3 = pltpu.einshape("pgc->gpc", ab3)
        n_groups = a_ref.shape[0]
        for gi in range(n_groups):                          # small static unroll; 2-D XLU transposes
            blk = ab3[gi]                                   # (n, 2*C_h) f32
            a_ref[gi] = blk[:, :c_h].T.astype(jnp.bfloat16)
            b_ref[gi] = blk[:, c_h:].T.astype(jnp.bfloat16)
    return kernel


# -------- kernel 2: triangle product + layer_norm_out + linear_z + gate ----------
def _make_tri_kernel(ti, tj, c_h, c_z):
    def kernel(a_ref, b_ref, g_ref, lnw_ref, lnb_ref, wz_ref, bz_ref,
               o_ref, acc_ref):
        kt = pl.program_id(2)

        @pl.when(kt == 0)
        def _init():
            acc_ref[...] = jnp.zeros_like(acc_ref)

        # (tile_rows, C_h, tk) -> (C_h, tile_rows, tk); permute in f32 (robust relayout),
        # then feed bf16 to the MXU with f32 accumulation.
        a_p = pltpu.einshape("ick->cik", a_ref[...].astype(jnp.float32))
        b_p = pltpu.einshape("ick->cik", b_ref[...].astype(jnp.float32))
        acc_ref[...] += jnp.einsum(
            "cik,cjk->cij",
            a_p.astype(jnp.bfloat16), b_p.astype(jnp.bfloat16),
            preferred_element_type=jnp.float32)

        @pl.when(kt == pl.num_programs(2) - 1)
        def _epilogue():
            acc = acc_ref[...]                              # (C_h, ti, tj) f32
            xp = pltpu.einshape("cij->icj", acc)            # (ti, C_h, tj)
            if ti <= 32:
                # fully-trusted path for small tiles: unrolled 2-D transposes
                rows = [xp[i].T for i in range(ti)]         # each (tj, C_h)
                x2 = jnp.concatenate(rows, axis=0)          # (ti*tj, C_h)
            else:
                x2 = jnp.swapaxes(xp, -1, -2).reshape(ti * tj, c_h)
            mu = jnp.mean(x2, axis=-1, keepdims=True)
            var = jnp.mean(jnp.square(x2 - mu), axis=-1, keepdims=True)
            xn = (x2 - mu) * jax.lax.rsqrt(var + EPS) * lnw_ref[...] + lnb_ref[...]
            xo = jnp.dot(xn.astype(jnp.bfloat16), wz_ref[...],
                         preferred_element_type=jnp.float32) + bz_ref[...]
            o_ref[...] = xo.reshape(ti, tj, c_z) * g_ref[...].astype(jnp.float32)
    return kernel


# ----------------------------------- wrapper -------------------------------------
def triangle_multiplicative_update(z, mask, params, outgoing=True):
    """z: [N_res, N_res, C_z], mask: [N_res, N_res] -> [N_res, N_res, C_z]."""
    n1, n2, c_z = z.shape
    assert n1 == n2, "pair representation must be square (N_res x N_res)"
    n = n1
    c_h = params["w_ap"].shape[1]
    f32, bf16 = jnp.float32, jnp.bfloat16

    z = z.astype(f32)
    if mask is None:
        mask = jnp.ones((n, n), f32)
    mask3 = mask.astype(f32).reshape(n, n, 1)

    # fuse the five projection matmuls into one wide one
    w_cat = jnp.concatenate(
        [params["w_ap"], params["w_bp"], params["w_ag"], params["w_bg"], params["w_g"]],
        axis=1).astype(bf16)
    b_cat = jnp.concatenate(
        [params["b_ap"], params["b_bp"], params["b_ag"], params["b_bg"], params["b_g"]],
        axis=1).astype(f32)

    # ---------------- kernel 1 ----------------
    G = _pick_group(n, incoming=not outgoing)
    if outgoing:
        blk3 = lambda c: pl.BlockSpec((G, n, c), lambda i: (i, 0, 0))
    else:
        blk3 = lambda c: pl.BlockSpec((n, G, c), lambda i: (0, i, 0))
    const1 = lambda shape: pl.BlockSpec(shape, lambda i, _nd=len(shape): (0,) * _nd)

    a_store, b_store, g_store = pl.pallas_call(
        _make_proj_kernel(outgoing, c_h, c_z),
        grid=(n // G,),
        in_specs=[blk3(c_z), blk3(1),
                  const1((1, c_z)), const1((1, c_z)),
                  const1(w_cat.shape), const1(b_cat.shape)],
        out_specs=(pl.BlockSpec((G, c_h, n), lambda i: (i, 0, 0)),
                   pl.BlockSpec((G, c_h, n), lambda i: (i, 0, 0)),
                   blk3(c_z)),
        out_shape=(jax.ShapeDtypeStruct((n, c_h, n), bf16),
                   jax.ShapeDtypeStruct((n, c_h, n), bf16),
                   jax.ShapeDtypeStruct((n, n, c_z), bf16)),
        compiler_params=pltpu.CompilerParams(
            dimension_semantics=("parallel",),
            vmem_limit_bytes=_VMEM_LIMIT),
    )(z, mask3, params["ln_in_w"].astype(f32), params["ln_in_b"].astype(f32),
      w_cat, b_cat)

    # ---------------- kernel 2 ----------------
    ti = tj = _pick_tile(n)
    tk = 128 if n % 128 == 0 else n
    ti, tj = _fit_tiles(n, ti, tj, tk, c_h, c_z)

    out = pl.pallas_call(
        _make_tri_kernel(ti, tj, c_h, c_z),
        grid=(n // ti, n // tj, n // tk),
        in_specs=[
            pl.BlockSpec((ti, c_h, tk), lambda i, j, k: (i, 0, k)),
            pl.BlockSpec((tj, c_h, tk), lambda i, j, k: (j, 0, k)),
            pl.BlockSpec((ti, tj, c_z), lambda i, j, k: (i, j, 0)),
            pl.BlockSpec((1, c_h), lambda i, j, k: (0, 0)),
            pl.BlockSpec((1, c_h), lambda i, j, k: (0, 0)),
            pl.BlockSpec((c_h, c_z), lambda i, j, k: (0, 0)),
            pl.BlockSpec((1, c_z), lambda i, j, k: (0, 0)),
        ],
        out_specs=pl.BlockSpec((ti, tj, c_z), lambda i, j, k: (i, j, 0)),
        out_shape=jax.ShapeDtypeStruct((n, n, c_z), f32),
        scratch_shapes=[pltpu.VMEM((c_h, ti, tj), f32)],
        compiler_params=pltpu.CompilerParams(
            dimension_semantics=("parallel", "parallel", "arbitrary"),
            vmem_limit_bytes=_VMEM_LIMIT),
    )(a_store, b_store, g_store,
      params["ln_out_w"].astype(f32), params["ln_out_b"].astype(f32),
      params["w_z"].astype(bf16), params["b_z"].astype(f32))

    return out


# ---------------- deterministic synthetic parameters ------------------------------
def init_params(key, c_z, c_h):
    # Weights stored as [in, out] (y = x @ W + b); equivalent to PyTorch F.linear
    # with W = W_pt.T. Random (not openfold's zero-init) so the compute is non-trivial.
    ks = jax.random.split(key, 14)
    f32 = jnp.float32

    def lin(kw, kb, fan_in, fan_out):
        w = jax.random.normal(kw, (fan_in, fan_out), f32) / jnp.sqrt(float(fan_in))
        b = 0.1 * jax.random.normal(kb, (1, fan_out), f32)
        return w, b

    w_ap, b_ap = lin(ks[0], ks[1], c_z, c_h)
    w_ag, b_ag = lin(ks[2], ks[3], c_z, c_h)
    w_bp, b_bp = lin(ks[4], ks[5], c_z, c_h)
    w_bg, b_bg = lin(ks[6], ks[7], c_z, c_h)
    w_g, b_g = lin(ks[8], ks[9], c_z, c_z)
    w_z, b_z = lin(ks[10], ks[11], c_h, c_z)
    ln_in_w = 1.0 + 0.1 * jax.random.normal(ks[12], (1, c_z), f32)
    ln_in_b = jnp.zeros((1, c_z), f32)
    ln_out_w = 1.0 + 0.1 * jax.random.normal(ks[13], (1, c_h), f32)
    ln_out_b = jnp.zeros((1, c_h), f32)
    return dict(
        w_ap=w_ap, b_ap=b_ap, w_ag=w_ag, b_ag=b_ag,
        w_bp=w_bp, b_bp=b_bp, w_bg=w_bg, b_bg=b_bg,
        w_g=w_g, b_g=b_g, w_z=w_z, b_z=b_z,
        ln_in_w=ln_in_w, ln_in_b=ln_in_b,
        ln_out_w=ln_out_w, ln_out_b=ln_out_b,
    )


# ---------------- pure-JAX f32 reference (for correctness check) -------------------
def _reference(z, mask, p, outgoing=True):
    mu = z.mean(-1, keepdims=True)
    var = jnp.square(z - mu).mean(-1, keepdims=True)
    zn = (z - mu) / jnp.sqrt(var + EPS) * p["ln_in_w"] + p["ln_in_b"]
    m = mask[..., None]
    a = (zn @ p["w_ap"] + p["b_ap"]) * jax.nn.sigmoid(zn @ p["w_ag"] + p["b_ag"]) * m
    b = (zn @ p["w_bp"] + p["b_bp"]) * jax.nn.sigmoid(zn @ p["w_bg"] + p["b_bg"]) * m
    if outgoing:
        x = jnp.einsum("ikc,jkc->ijc", a, b)
    else:
        x = jnp.einsum("kic,kjc->ijc", a, b)
    mu2 = x.mean(-1, keepdims=True)
    var2 = jnp.square(x - mu2).mean(-1, keepdims=True)
    xn = (x - mu2) / jnp.sqrt(var2 + EPS) * p["ln_out_w"] + p["ln_out_b"]
    xo = xn @ p["w_z"] + p["b_z"]
    g = jax.nn.sigmoid(zn @ p["w_g"] + p["b_g"])
    return xo * g


if __name__ == "__main__":
    key = jax.random.PRNGKey(0)
    k_z, k_m, k_p = jax.random.split(key, 3)

    n_res, c_z, c_h = 32, 32, 16
    z = jax.random.normal(k_z, (n_res, n_res, c_z), jnp.float32)
    mask = (jax.random.uniform(k_m, (n_res, n_res)) > 0.1).astype(jnp.float32)
    params = init_params(k_p, c_z, c_h)

    out = triangle_multiplicative_update(z, mask, params, outgoing=True)
    out = jax.block_until_ready(out)
    assert out.shape == (n_res, n_res, c_z)

    ref = _reference(z, mask, params, outgoing=True)
    # bf16 MXU inputs (f32 accumulation) + bf16 a/b/gate storage => loosened tolerance
    # vs the pure-f32 reference, as flagged in the performance review.
    if not jnp.allclose(out, ref, atol=6e-2, rtol=6e-2):
        max_err = float(jnp.max(jnp.abs(out - ref)))
        raise AssertionError(
            f"Pallas kernel does not match reference (max abs err {max_err:.4f})")
    print("KERNEL_OK")
</pallas_src>

<mosaic_0001>
module attributes {stable_mosaic.version = 11 : i64} {
  func.func @kernel(%arg0: i32, %arg1: memref<16x32x32xf32, #tpu.memory_space<vmem>>, %arg2: memref<16x32x1xf32, #tpu.memory_space<vmem>>, %arg3: memref<1x32xf32, #tpu.memory_space<vmem>>, %arg4: memref<1x32xf32, #tpu.memory_space<vmem>>, %arg5: memref<32x96xbf16, #tpu.memory_space<vmem>>, %arg6: memref<1x96xf32, #tpu.memory_space<vmem>>, %arg7: memref<16x16x32xbf16, #tpu.memory_space<vmem>>, %arg8: memref<16x16x32xbf16, #tpu.memory_space<vmem>>, %arg9: memref<16x32x32xbf16, #tpu.memory_space<vmem>>) attributes {dimension_semantics = [#tpu.dimension_semantics<parallel>], iteration_bounds = array<i64: 2>, scalar_prefetch = 0 : i64, scratch_operands = 0 : i64, tpu.core_type = #tpu.core_type<tc>, window_params = [{transform_indices = @transform_0, window_bounds = array<i64: 16, 32, 32>}, {transform_indices = @transform_1, window_bounds = array<i64: 16, 32, 1>}, {pipeline_mode = #tpu.pipeline_mode<synchronous>, transform_indices = @transform_2, window_bounds = array<i64: 1, 32>}, {pipeline_mode = #tpu.pipeline_mode<synchronous>, transform_indices = @transform_3, window_bounds = array<i64: 1, 32>}, {pipeline_mode = #tpu.pipeline_mode<synchronous>, transform_indices = @transform_4, window_bounds = array<i64: 32, 96>}, {pipeline_mode = #tpu.pipeline_mode<synchronous>, transform_indices = @transform_5, window_bounds = array<i64: 1, 96>}, {transform_indices = @transform_6, window_bounds = array<i64: 16, 16, 32>}, {transform_indices = @transform_7, window_bounds = array<i64: 16, 16, 32>}, {transform_indices = @transform_8, window_bounds = array<i64: 16, 32, 32>}]} {
    %c0 = arith.constant 0 : index
    %c0_0 = arith.constant 0 : index
    %c0_1 = arith.constant 0 : index
    %0 = vector.load %arg1[%c0, %c0_0, %c0_1] : memref<16x32x32xf32, #tpu.memory_space<vmem>>, vector<16x32x32xf32>
    %1 = vector.shape_cast %0 : vector<16x32x32xf32> to vector<512x32xf32>
    %cst = arith.constant dense<0.000000e+00> : vector<512xf32>
    %2 = vector.multi_reduction <add>, %1, %cst [1] : vector<512x32xf32> to vector<512xf32>
    %3 = vector.shape_cast %2 : vector<512xf32> to vector<512x1xf32>
    %cst_2 = arith.constant 3.200000e+01 : f32
    %4 = vector.broadcast %cst_2 : f32 to vector<512x1xf32>
    %5 = arith.divf %3, %4 : vector<512x1xf32>
    %6 = vector.broadcast %5 : vector<512x1xf32> to vector<512x32xf32>
    %7 = arith.subf %1, %6 : vector<512x32xf32>
    %8 = arith.mulf %7, %7 : vector<512x32xf32>
    %cst_3 = arith.constant dense<0.000000e+00> : vector<512xf32>
    %9 = vector.multi_reduction <add>, %8, %cst_3 [1] : vector<512x32xf32> to vector<512xf32>
    %10 = vector.shape_cast %9 : vector<512xf32> to vector<512x1xf32>
    %cst_4 = arith.constant 3.200000e+01 : f32
    %11 = vector.broadcast %cst_4 : f32 to vector<512x1xf32>
    %12 = arith.divf %10, %11 : vector<512x1xf32>
    %13 = vector.broadcast %5 : vector<512x1xf32> to vector<512x32xf32>
    %14 = arith.subf %1, %13 : vector<512x32xf32>
    %cst_5 = arith.constant 9.99999974E-6 : f32
    %15 = vector.broadcast %cst_5 : f32 to vector<512x1xf32>
    %16 = arith.addf %12, %15 : vector<512x1xf32>
    %17 = math.rsqrt %16 : vector<512x1xf32>
    %18 = vector.broadcast %17 : vector<512x1xf32> to vector<512x32xf32>
    %19 = arith.mulf %14, %18 : vector<512x32xf32>
    %c0_6 = arith.constant 0 : index
    %c0_7 = arith.constant 0 : index
    %20 = vector.load %arg3[%c0_6, %c0_7] : memref<1x32xf32, #tpu.memory_space<vmem>>, vector<1x32xf32>
    %21 = vector.broadcast %20 : vector<1x32xf32> to vector<512x32xf32>
    %22 = arith.mulf %19, %21 : vector<512x32xf32>
    %c0_8 = arith.constant 0 : index
    %c0_9 = arith.constant 0 : index
    %23 = vector.load %arg4[%c0_8, %c0_9] : memref<1x32xf32, #tpu.memory_space<vmem>>, vector<1x32xf32>
    %24 = vector.broadcast %23 : vector<1x32xf32> to vector<512x32xf32>
    %25 = arith.addf %22, %24 : vector<512x32xf32>
    %26 = arith.truncf %25 : vector<512x32xf32> to vector<512x32xbf16>
    %c0_10 = arith.constant 0 : index
    %c0_11 = arith.constant 0 : index
    %27 = vector.load %arg5[%c0_10, %c0_11] : memref<32x96xbf16, #tpu.memory_space<vmem>>, vector<32x96xbf16>
    %cst_12 = arith.constant dense<0.000000e+00> : vector<512x96xf32>
    %28 = tpu.matmul %26, %27, %cst_12 {dimension_numbers = #tpu.dot_dimension_numbers<[1], [0], [0], [1], [0, 0, 1, 1], [], []>} : vector<512x32xbf16>, vector<32x96xbf16>, vector<512x96xf32> -> vector<512x96xf32>
    %c0_13 = arith.constant 0 : index
    %c0_14 = arith.constant 0 : index
    %29 = vector.load %arg6[%c0_13, %c0_14] : memref<1x96xf32, #tpu.memory_space<vmem>>, vector<1x96xf32>
    %30 = vector.broadcast %29 : vector<1x96xf32> to vector<512x96xf32>
    %31 = arith.addf %28, %30 : vector<512x96xf32>
    %c0_15 = arith.constant 0 : index
    %c0_16 = arith.constant 0 : index
    %c0_17 = arith.constant 0 : index
    %32 = vector.load %arg2[%c0_15, %c0_16, %c0_17] : memref<16x32x1xf32, #tpu.memory_space<vmem>>, vector<16x32x1xf32>
    %33 = vector.shape_cast %32 : vector<16x32x1xf32> to vector<512x1xf32>
    %34 = vector.extract_strided_slice %31 {offsets = [0, 0], sizes = [512, 32], strides = [1, 1]} : vector<512x96xf32> to vector<512x32xf32>
    %35 = vector.extract_strided_slice %31 {offsets = [0, 32], sizes = [512, 32], strides = [1, 1]} : vector<512x96xf32> to vector<512x32xf32>
    %36 = arith.negf %35 : vector<512x32xf32>
    %37 = math.exp %36 : vector<512x32xf32>
    %cst_18 = arith.constant 1.000000e+00 : f32
    %38 = vector.broadcast %cst_18 : f32 to vector<512x32xf32>
    %39 = arith.addf %38, %37 : vector<512x32xf32>
    %40 = arith.divf %38, %39 : vector<512x32xf32>
    %41 = arith.mulf %34, %40 : vector<512x32xf32>
    %42 = vector.broadcast %33 : vector<512x1xf32> to vector<512x32xf32>
    %43 = arith.mulf %41, %42 : vector<512x32xf32>
    %44 = vector.extract_strided_slice %31 {offsets = [0, 64], sizes = [512, 32], strides = [1, 1]} : vector<512x96xf32> to vector<512x32xf32>
    %45 = arith.negf %44 : vector<512x32xf32>
    %46 = math.exp %45 : vector<512x32xf32>
    %cst_19 = arith.constant 1.000000e+00 : f32
    %47 = vector.broadcast %cst_19 : f32 to vector<512x32xf32>
    %48 = arith.addf %47, %46 : vector<512x32xf32>
    %49 = arith.divf %47, %48 : vector<512x32xf32>
    %50 = vector.shape_cast %49 : vector<512x32xf32> to vector<16x32x32xf32>
    %51 = arith.truncf %50 : vector<16x32x32xf32> to vector<16x32x32xbf16>
    %c0_20 = arith.constant 0 : index
    %c0_21 = arith.constant 0 : index
    %c0_22 = arith.constant 0 : index
    %52 = vector.load %arg9[%c0_20, %c0_21, %c0_22] : memref<16x32x32xbf16, #tpu.memory_space<vmem>>, vector<16x32x32xbf16>
    tpu.vector_store %arg9[%c0_20, %c0_21, %c0_22], %51 {strides = array<i32>} : memref<16x32x32xbf16, #tpu.memory_space<vmem>>, vector<16x32x32xbf16>,
    %53 = vector.shape_cast %43 : vector<512x32xf32> to vector<16x32x32xf32>
    %54 = vector.extract_strided_slice %53 {offsets = [0, 0, 0], sizes = [1, 32, 32], strides = [1, 1, 1]} : vector<16x32x32xf32> to vector<1x32x32xf32>
    %55 = vector.shape_cast %54 : vector<1x32x32xf32> to vector<32x32xf32>
    %56 = vector.extract_strided_slice %55 {offsets = [0, 0], sizes = [32, 16], strides = [1, 1]} : vector<32x32xf32> to vector<32x16xf32>
    %57 = tpu.transpose %56, [1, 0] : vector<32x16xf32> -> vector<16x32xf32>
    %58 = arith.truncf %57 : vector<16x32xf32> to vector<16x32xbf16>
    %c0_23 = arith.constant 0 : index
    %c0_24 = arith.constant 0 : index
    %c0_25 = arith.constant 0 : index
    %59 = vector.load %arg7[%c0_23, %c0_24, %c0_25] : memref<16x16x32xbf16, #tpu.memory_space<vmem>>, vector<1x16x32xbf16>
    %60 = vector.shape_cast %59 : vector<1x16x32xbf16> to vector<16x32xbf16>
    %61 = vector.shape_cast %58 : vector<16x32xbf16> to vector<1x16x32xbf16>
    tpu.vector_store %arg7[%c0_23, %c0_24, %c0_25], %61 {strides = array<i32>} : memref<16x16x32xbf16, #tpu.memory_space<vmem>>, vector<1x16x32xbf16>,
    %62 = vector.extract_strided_slice %55 {offsets = [0, 16], sizes = [32, 16], strides = [1, 1]} : vector<32x32xf32> to vector<32x16xf32>
    %63 = tpu.transpose %62, [1, 0] : vector<32x16xf32> -> vector<16x32xf32>
    %64 = arith.truncf %63 : vector<16x32xf32> to vector<16x32xbf16>
    %c0_26 = arith.constant 0 : index
    %c0_27 = arith.constant 0 : index
    %c0_28 = arith.constant 0 : index
    %65 = vector.load %arg8[%c0_26, %c0_27, %c0_28] : memref<16x16x32xbf16, #tpu.memory_space<vmem>>, vector<1x16x32xbf16>
    %66 = vector.shape_cast %65 : vector<1x16x32xbf16> to vector<16x32xbf16>
    %67 = vector.shape_cast %64 : vector<16x32xbf16> to vector<1x16x32xbf16>
    tpu.vector_store %arg8[%c0_26, %c0_27, %c0_28], %67 {strides = array<i32>} : memref<16x16x32xbf16, #tpu.memory_space<vmem>>, vector<1x16x32xbf16>,
    %68 = vector.extract_strided_slice %53 {offsets = [1, 0, 0], sizes = [1, 32, 32], strides = [1, 1, 1]} : vector<16x32x32xf32> to vector<1x32x32xf32>
    %69 = vector.shape_cast %68 : vector<1x32x32xf32> to vector<32x32xf32>
    %70 = vector.extract_strided_slice %69 {offsets = [0, 0], sizes = [32, 16], strides = [1, 1]} : vector<32x32xf32> to vector<32x16xf32>
    %71 = tpu.transpose %70, [1, 0] : vector<32x16xf32> -> vector<16x32xf32>
    %72 = arith.truncf %71 : vector<16x32xf32> to vector<16x32xbf16>
    %c1 = arith.constant 1 : index
    %c0_29 = arith.constant 0 : index
    %c0_30 = arith.constant 0 : index
    %73 = vector.load %arg7[%c1, %c0_29, %c0_30] : memref<16x16x32xbf16, #tpu.memory_space<vmem>>, vector<1x16x32xbf16>
    %74 = vector.shape_cast %73 : vector<1x16x32xbf16> to vector<16x32xbf16>
    %75 = vector.shape_cast %72 : vector<16x32xbf16> to vector<1x16x32xbf16>
    tpu.vector_store %arg7[%c1, %c0_29, %c0_30], %75 {strides = array<i32>} : memref<16x16x32xbf16, #tpu.memory_space<vmem>>, vector<1x16x32xbf16>,
    %76 = vector.extract_strided_slice %69 {offsets = [0, 16], sizes = [32, 16], strides = [1, 1]} : vector<32x32xf32> to vector<32x16xf32>
    %77 = tpu.transpose %76, [1, 0] : vector<32x16xf32> -> vector<16x32xf32>
    %78 = arith.truncf %77 : vector<16x32xf32> to vector<16x32xbf16>
    %c1_31 = arith.constant 1 : index
    %c0_32 = arith.constant 0 : index
    %c0_33 = arith.constant 0 : index
    %79 = vector.load %arg8[%c1_31, %c0_32, %c0_33] : memref<16x16x32xbf16, #tpu.memory_space<vmem>>, vector<1x16x32xbf16>
    %80 = vector.shape_cast %79 : vector<1x16x32xbf16> to vector<16x32xbf16>
    %81 = vector.shape_cast %78 : vector<16x32xbf16> to vector<1x16x32xbf16>
    tpu.vector_store %arg8[%c1_31, %c0_32, %c0_33], %81 {strides = array<i32>} : memref<16x16x32xbf16, #tpu.memory_space<vmem>>, vector<1x16x32xbf16>,
    %82 = vector.extract_strided_slice %53 {offsets = [2, 0, 0], sizes = [1, 32, 32], strides = [1, 1, 1]} : vector<16x32x32xf32> to vector<1x32x32xf32>
    %83 = vector.shape_cast %82 : vector<1x32x32xf32> to vector<32x32xf32>
    %84 = vector.extract_strided_slice %83 {offsets = [0, 0], sizes = [32, 16], strides = [1, 1]} : vector<32x32xf32> to vector<32x16xf32>
    %85 = tpu.transpose %84, [1, 0] : vector<32x16xf32> -> vector<16x32xf32>
    %86 = arith.truncf %85 : vector<16x32xf32> to vector<16x32xbf16>
    %c2 = arith.constant 2 : index
    %c0_34 = arith.constant 0 : index
    %c0_35 = arith.constant 0 : index
    %87 = vector.load %arg7[%c2, %c0_34, %c0_35] : memref<16x16x32xbf16, #tpu.memory_space<vmem>>, vector<1x16x32xbf16>
    %88 = vector.shape_cast %87 : vector<1x16x32xbf16> to vector<16x32xbf16>
    %89 = vector.shape_cast %86 : vector<16x32xbf16> to vector<1x16x32xbf16>
    tpu.vector_store %arg7[%c2, %c0_34, %c0_35], %89 {strides = array<i32>} : memref<16x16x32xbf16, #tpu.memory_space<vmem>>, vector<1x16x32xbf16>,
    %90 = vector.extract_strided_slice %83 {offsets = [0, 16], sizes = [32, 16], strides = [1, 1]} : vector<32x32xf32> to vector<32x16xf32>
    %91 = tpu.transpose %90, [1, 0] : vector<32x16xf32> -> vector<16x32xf32>
    %92 = arith.truncf %91 : vector<16x32xf32> to vector<16x32xbf16>
    %c2_36 = arith.constant 2 : index
    %c0_37 = arith.constant 0 : index
    %c0_38 = arith.constant 0 : index
    %93 = vector.load %arg8[%c2_36, %c0_37, %c0_38] : memref<16x16x32xbf16, #tpu.memory_space<vmem>>, vector<1x16x32xbf16>
    %94 = vector.shape_cast %93 : vector<1x16x32xbf16> to vector<16x32xbf16>
    %95 = vector.shape_cast %92 : vector<16x32xbf16> to vector<1x16x32xbf16>
    tpu.vector_store %arg8[%c2_36, %c0_37, %c0_38], %95 {strides = array<i32>} : memref<16x16x32xbf16, #tpu.memory_space<vmem>>, vector<1x16x32xbf16>,
    %96 = vector.extract_strided_slice %53 {offsets = [3, 0, 0], sizes = [1, 32, 32], strides = [1, 1, 1]} : vector<16x32x32xf32> to vector<1x32x32xf32>
    %97 = vector.shape_cast %96 : vector<1x32x32xf32> to vector<32x32xf32>
    %98 = vector.extract_strided_slice %97 {offsets = [0, 0], sizes = [32, 16], strides = [1, 1]} : vector<32x32xf32> to vector<32x16xf32>
    %99 = tpu.transpose %98, [1, 0] : vector<32x16xf32> -> vector<16x32xf32>
    %100 = arith.truncf %99 : vector<16x32xf32> to vector<16x32xbf16>
    %c3 = arith.constant 3 : index
    %c0_39 = arith.constant 0 : index
    %c0_40 = arith.constant 0 : index
    %101 = vector.load %arg7[%c3, %c0_39, %c0_40] : memref<16x16x32xbf16, #tpu.memory_space<vmem>>, vector<1x16x32xbf16>
    %102 = vector.shape_cast %101 : vector<1x16x32xbf16> to vector<16x32xbf16>
    %103 = vector.shape_cast %100 : vector<16x32xbf16> to vector<1x16x32xbf16>
    tpu.vector_store %arg7[%c3, %c0_39, %c0_40], %103 {strides = array<i32>} : memref<16x16x32xbf16, #tpu.memory_space<vmem>>, vector<1x16x32xbf16>,
    %104 = vector.extract_strided_slice %97 {offsets = [0, 16], sizes = [32, 16], strides = [1, 1]} : vector<32x32xf32> to vector<32x16xf32>
    %105 = tpu.transpose %104, [1, 0] : vector<32x16xf32> -> vector<16x32xf32>
    %106 = arith.truncf %105 : vector<16x32xf32> to vector<16x32xbf16>
    %c3_41 = arith.constant 3 : index
    %c0_42 = arith.constant 0 : index
    %c0_43 = arith.constant 0 : index
    %107 = vector.load %arg8[%c3_41, %c0_42, %c0_43] : memref<16x16x32xbf16, #tpu.memory_space<vmem>>, vector<1x16x32xbf16>
    %108 = vector.shape_cast %107 : vector<1x16x32xbf16> to vector<16x32xbf16>
    %109 = vector.shape_cast %106 : vector<16x32xbf16> to vector<1x16x32xbf16>
    tpu.vector_store %arg8[%c3_41, %c0_42, %c0_43], %109 {strides = array<i32>} : memref<16x16x32xbf16, #tpu.memory_space<vmem>>, vector<1x16x32xbf16>,
    %110 = vector.extract_strided_slice %53 {offsets = [4, 0, 0], sizes = [1, 32, 32], strides = [1, 1, 1]} : vector<16x32x32xf32> to vector<1x32x32xf32>
    %111 = vector.shape_cast %110 : vector<1x32x32xf32> to vector<32x32xf32>
    %112 = vector.extract_strided_slice %111 {offsets = [0, 0], sizes = [32, 16], strides = [1, 1]} : vector<32x32xf32> to vector<32x16xf32>
    %113 = tpu.transpose %112, [1, 0] : vector<32x16xf32> -> vector<16x32xf32>
    %114 = arith.truncf %113 : vector<16x32xf32> to vector<16x32xbf16>
    %c4 = arith.constant 4 : index
    %c0_44 = arith.constant 0 : index
    %c0_45 = arith.constant 0 : index
    %115 = vector.load %arg7[%c4, %c0_44, %c0_45] : memref<16x16x32xbf16, #tpu.memory_space<vmem>>, vector<1x16x32xbf16>
    %116 = vector.shape_cast %115 : vector<1x16x32xbf16> to vector<16x32xbf16>
    %117 = vector.shape_cast %114 : vector<16x32xbf16> to vector<1x16x32xbf16>
    tpu.vector_store %arg7[%c4, %c0_44, %c0_45], %117 {strides = array<i32>} : memref<16x16x32xbf16, #tpu.memory_space<vmem>>, vector<1x16x32xbf16>,
    %118 = vector.extract_strided_slice %111 {offsets = [0, 16], sizes = [32, 16], strides = [1, 1]} : vector<32x32xf32> to vector<32x16xf32>
    %119 = tpu.transpose %118, [1, 0] : vector<32x16xf32> -> vector<16x32xf32>
    %120 = arith.truncf %119 : vector<16x32xf32> to vector<16x32xbf16>
    %c4_46 = arith.constant 4 : index
    %c0_47 = arith.constant 0 : index
    %c0_48 = arith.constant 0 : index
    %121 = vector.load %arg8[%c4_46, %c0_47, %c0_48] : memref<16x16x32xbf16, #tpu.memory_space<vmem>>, vector<1x16x32xbf16>
    %122 = vector.shape_cast %121 : vector<1x16x32xbf16> to vector<16x32xbf16>
    %123 = vector.shape_cast %120 : vector<16x32xbf16> to vector<1x16x32xbf16>
    tpu.vector_store %arg8[%c4_46, %c0_47, %c0_48], %123 {strides = array<i32>} : memref<16x16x32xbf16, #tpu.memory_space<vmem>>, vector<1x16x32xbf16>,
    %124 = vector.extract_strided_slice %53 {offsets = [5, 0, 0], sizes = [1, 32, 32], strides = [1, 1, 1]} : vector<16x32x32xf32> to vector<1x32x32xf32>
    %125 = vector.shape_cast %124 : vector<1x32x32xf32> to vector<32x32xf32>
    %126 = vector.extract_strided_slice %125 {offsets = [0, 0], sizes = [32, 16], strides = [1, 1]} : vector<32x32xf32> to vector<32x16xf32>
    %127 = tpu.transpose %126, [1, 0] : vector<32x16xf32> -> vector<16x32xf32>
    %128 = arith.truncf %127 : vector<16x32xf32> to vector<16x32xbf16>
    %c5 = arith.constant 5 : index
    %c0_49 = arith.constant 0 : index
    %c0_50 = arith.constant 0 : index
    %129 = vector.load %arg7[%c5, %c0_49, %c0_50] : memref<16x16x32xbf16, #tpu.memory_space<vmem>>, vector<1x16x32xbf16>
    %130 = vector.shape_cast %129 : vector<1x16x32xbf16> to vector<16x32xbf16>
    %131 = vector.shape_cast %128 : vector<16x32xbf16> to vector<1x16x32xbf16>
    tpu.vector_store %arg7[%c5, %c0_49, %c0_50], %131 {strides = array<i32>} : memref<16x16x32xbf16, #tpu.memory_space<vmem>>, vector<1x16x32xbf16>,
    %132 = vector.extract_strided_slice %125 {offsets = [0, 16], sizes = [32, 16], strides = [1, 1]} : vector<32x32xf32> to vector<32x16xf32>
    %133 = tpu.transpose %132, [1, 0] : vector<32x16xf32> -> vector<16x32xf32>
    %134 = arith.truncf %133 : vector<16x32xf32> to vector<16x32xbf16>
    %c5_51 = arith.constant 5 : index
    %c0_52 = arith.constant 0 : index
    %c0_53 = arith.constant 0 : index
    %135 = vector.load %arg8[%c5_51, %c0_52, %c0_53] : memref<16x16x32xbf16, #tpu.memory_space<vmem>>, vector<1x16x32xbf16>
    %136 = vector.shape_cast %135 : vector<1x16x32xbf16> to vector<16x32xbf16>
    %137 = vector.shape_cast %134 : vector<16x32xbf16> to vector<1x16x32xbf16>
    tpu.vector_store %arg8[%c5_51, %c0_52, %c0_53], %137 {strides = array<i32>} : memref<16x16x32xbf16, #tpu.memory_space<vmem>>, vector<1x16x32xbf16>,
    %138 = vector.extract_strided_slice %53 {offsets = [6, 0, 0], sizes = [1, 32, 32], strides = [1, 1, 1]} : vector<16x32x32xf32> to vector<1x32x32xf32>
    %139 = vector.shape_cast %138 : vector<1x32x32xf32> to vector<32x32xf32>
    %140 = vector.extract_strided_slice %139 {offsets = [0, 0], sizes = [32, 16], strides = [1, 1]} : vector<32x32xf32> to vector<32x16xf32>
    %141 = tpu.transpose %140, [1, 0] : vector<32x16xf32> -> vector<16x32xf32>
    %142 = arith.truncf %141 : vector<16x32xf32> to vector<16x32xbf16>
    %c6 = arith.constant 6 : index
    %c0_54 = arith.constant 0 : index
    %c0_55 = arith.constant 0 : index
    %143 = vector.load %arg7[%c6, %c0_54, %c0_55] : memref<16x16x32xbf16, #tpu.memory_space<vmem>>, vector<1x16x32xbf16>
    %144 = vector.shape_cast %143 : vector<1x16x32xbf16> to vector<16x32xbf16>
    %145 = vector.shape_cast %142 : vector<16x32xbf16> to vector<1x16x32xbf16>
    tpu.vector_store %arg7[%c6, %c0_54, %c0_55], %145 {strides = array<i32>} : memref<16x16x32xbf16, #tpu.memory_space<vmem>>, vector<1x16x32xbf16>,
    %146 = vector.extract_strided_slice %139 {offsets = [0, 16], sizes = [32, 16], strides = [1, 1]} : vector<32x32xf32> to vector<32x16xf32>
    %147 = tpu.transpose %146, [1, 0] : vector<32x16xf32> -> vector<16x32xf32>
    %148 = arith.truncf %147 : vector<16x32xf32> to vector<16x32xbf16>
    %c6_56 = arith.constant 6 : index
    %c0_57 = arith.constant 0 : index
    %c0_58 = arith.constant 0 : index
    %149 = vector.load %arg8[%c6_56, %c0_57, %c0_58] : memref<16x16x32xbf16, #tpu.memory_space<vmem>>, vector<1x16x32xbf16>
    %150 = vector.shape_cast %149 : vector<1x16x32xbf16> to vector<16x32xbf16>
    %151 = vector.shape_cast %148 : vector<16x32xbf16> to vector<1x16x32xbf16>
    tpu.vector_store %arg8[%c6_56, %c0_57, %c0_58], %151 {strides = array<i32>} : memref<16x16x32xbf16, #tpu.memory_space<vmem>>, vector<1x16x32xbf16>,
    %152 = vector.extract_strided_slice %53 {offsets = [7, 0, 0], sizes = [1, 32, 32], strides = [1, 1, 1]} : vector<16x32x32xf32> to vector<1x32x32xf32>
    %153 = vector.shape_cast %152 : vector<1x32x32xf32> to vector<32x32xf32>
    %154 = vector.extract_strided_slice %153 {offsets = [0, 0], sizes = [32, 16], strides = [1, 1]} : vector<32x32xf32> to vector<32x16xf32>
    %155 = tpu.transpose %154, [1, 0] : vector<32x16xf32> -> vector<16x32xf32>
    %156 = arith.truncf %155 : vector<16x32xf32> to vector<16x32xbf16>
    %c7 = arith.constant 7 : index
    %c0_59 = arith.constant 0 : index
    %c0_60 = arith.constant 0 : index
    %157 = vector.load %arg7[%c7, %c0_59, %c0_60] : memref<16x16x32xbf16, #tpu.memory_space<vmem>>, vector<1x16x32xbf16>
    %158 = vector.shape_cast %157 : vector<1x16x32xbf16> to vector<16x32xbf16>
    %159 = vector.shape_cast %156 : vector<16x32xbf16> to vector<1x16x32xbf16>
    tpu.vector_store %arg7[%c7, %c0_59, %c0_60], %159 {strides = array<i32>} : memref<16x16x32xbf16, #tpu.memory_space<vmem>>, vector<1x16x32xbf16>,
    %160 = vector.extract_strided_slice %153 {offsets = [0, 16], sizes = [32, 16], strides = [1, 1]} : vector<32x32xf32> to vector<32x16xf32>
    %161 = tpu.transpose %160, [1, 0] : vector<32x16xf32> -> vector<16x32xf32>
    %162 = arith.truncf %161 : vector<16x32xf32> to vector<16x32xbf16>
    %c7_61 = arith.constant 7 : index
    %c0_62 = arith.constant 0 : index
    %c0_63 = arith.constant 0 : index
    %163 = vector.load %arg8[%c7_61, %c0_62, %c0_63] : memref<16x16x32xbf16, #tpu.memory_space<vmem>>, vector<1x16x32xbf16>
    %164 = vector.shape_cast %163 : vector<1x16x32xbf16> to vector<16x32xbf16>
    %165 = vector.shape_cast %162 : vector<16x32xbf16> to vector<1x16x32xbf16>
    tpu.vector_store %arg8[%c7_61, %c0_62, %c0_63], %165 {strides = array<i32>} : memref<16x16x32xbf16, #tpu.memory_space<vmem>>, vector<1x16x32xbf16>,
    %166 = vector.extract_strided_slice %53 {offsets = [8, 0, 0], sizes = [1, 32, 32], strides = [1, 1, 1]} : vector<16x32x32xf32> to vector<1x32x32xf32>
    %167 = vector.shape_cast %166 : vector<1x32x32xf32> to vector<32x32xf32>
    %168 = vector.extract_strided_slice %167 {offsets = [0, 0], sizes = [32, 16], strides = [1, 1]} : vector<32x32xf32> to vector<32x16xf32>
    %169 = tpu.transpose %168, [1, 0] : vector<32x16xf32> -> vector<16x32xf32>
    %170 = arith.truncf %169 : vector<16x32xf32> to vector<16x32xbf16>
    %c8 = arith.constant 8 : index
    %c0_64 = arith.constant 0 : index
    %c0_65 = arith.constant 0 : index
    %171 = vector.load %arg7[%c8, %c0_64, %c0_65] : memref<16x16x32xbf16, #tpu.memory_space<vmem>>, vector<1x16x32xbf16>
    %172 = vector.shape_cast %171 : vector<1x16x32xbf16> to vector<16x32xbf16>
    %173 = vector.shape_cast %170 : vector<16x32xbf16> to vector<1x16x32xbf16>
    tpu.vector_store %arg7[%c8, %c0_64, %c0_65], %173 {strides = array<i32>} : memref<16x16x32xbf16, #tpu.memory_space<vmem>>, vector<1x16x32xbf16>,
    %174 = vector.extract_strided_slice %167 {offsets = [0, 16], sizes = [32, 16], strides = [1, 1]} : vector<32x32xf32> to vector<32x16xf32>
    %175 = tpu.transpose %174, [1, 0] : vector<32x16xf32> -> vector<16x32xf32>
    %176 = arith.truncf %175 : vector<16x32xf32> to vector<16x32xbf16>
    %c8_66 = arith.constant 8 : index
    %c0_67 = arith.constant 0 : index
    %c0_68 = arith.constant 0 : index
    %177 = vector.load %arg8[%c8_66, %c0_67, %c0_68] : memref<16x16x32xbf16, #tpu.memory_space<vmem>>, vector<1x16x32xbf16>
    %178 = vector.shape_cast %177 : vector<1x16x32xbf16> to vector<16x32xbf16>
    %179 = vector.shape_cast %176 : vector<16x32xbf16> to vector<1x16x32xbf16>
    tpu.vector_store %arg8[%c8_66, %c0_67, %c0_68], %179 {strides = array<i32>} : memref<16x16x32xbf16, #tpu.memory_space<vmem>>, vector<1x16x32xbf16>,
    %180 = vector.extract_strided_slice %53 {offsets = [9, 0, 0], sizes = [1, 32, 32], strides = [1, 1, 1]} : vector<16x32x32xf32> to vector<1x32x32xf32>
    %181 = vector.shape_cast %180 : vector<1x32x32xf32> to vector<32x32xf32>
    %182 = vector.extract_strided_slice %181 {offsets = [0, 0], sizes = [32, 16], strides = [1, 1]} : vector<32x32xf32> to vector<32x16xf32>
    %183 = tpu.transpose %182, [1, 0] : vector<32x16xf32> -> vector<16x32xf32>
    %184 = arith.truncf %183 : vector<16x32xf32> to vector<16x32xbf16>
    %c9 = arith.constant 9 : index
    %c0_69 = arith.constant 0 : index
    %c0_70 = arith.constant 0 : index
    %185 = vector.load %arg7[%c9, %c0_69, %c0_70] : memref<16x16x32xbf16, #tpu.memory_space<vmem>>, vector<1x16x32xbf16>
    %186 = vector.shape_cast %185 : vector<1x16x32xbf16> to vector<16x32xbf16>
    %187 = vector.shape_cast %184 : vector<16x32xbf16> to vector<1x16x32xbf16>
    tpu.vector_store %arg7[%c9, %c0_69, %c0_70], %187 {strides = array<i32>} : memref<16x16x32xbf16, #tpu.memory_space<vmem>>, vector<1x16x32xbf16>,
    %188 = vector.extract_strided_slice %181 {offsets = [0, 16], sizes = [32, 16], strides = [1, 1]} : vector<32x32xf32> to vector<32x16xf32>
    %189 = tpu.transpose %188, [1, 0] : vector<32x16xf32> -> vector<16x32xf32>
    %190 = arith.truncf %189 : vector<16x32xf32> to vector<16x32xbf16>
    %c9_71 = arith.constant 9 : index
    %c0_72 = arith.constant 0 : index
    %c0_73 = arith.constant 0 : index
    %191 = vector.load %arg8[%c9_71, %c0_72, %c0_73] : memref<16x16x32xbf16, #tpu.memory_space<vmem>>, vector<1x16x32xbf16>
    %192 = vector.shape_cast %191 : vector<1x16x32xbf16> to vector<16x32xbf16>
    %193 = vector.shape_cast %190 : vector<16x32xbf16> to vector<1x16x32xbf16>
    tpu.vector_store %arg8[%c9_71, %c0_72, %c0_73], %193 {strides = array<i32>} : memref<16x16x32xbf16, #tpu.memory_space<vmem>>, vector<1x16x32xbf16>,
    %194 = vector.extract_strided_slice %53 {offsets = [10, 0, 0], sizes = [1, 32, 32], strides = [1, 1, 1]} : vector<16x32x32xf32> to vector<1x32x32xf32>
    %195 = vector.shape_cast %194 : vector<1x32x32xf32> to vector<32x32xf32>
    %196 = vector.extract_strided_slice %195 {offsets = [0, 0], sizes = [32, 16], strides = [1, 1]} : vector<32x32xf32> to vector<32x16xf32>
    %197 = tpu.transpose %196, [1, 0] : vector<32x16xf32> -> vector<16x32xf32>
    %198 = arith.truncf %197 : vector<16x32xf32> to vector<16x32xbf16>
    %c10 = arith.constant 10 : index
    %c0_74 = arith.constant 0 : index
    %c0_75 = arith.constant 0 : index
    %199 = vector.load %arg7[%c10, %c0_74, %c0_75] : memref<16x16x32xbf16, #tpu.memory_space<vmem>>, vector<1x16x32xbf16>
    %200 = vector.shape_cast %199 : vector<1x16x32xbf16> to vector<16x32xbf16>
    %201 = vector.shape_cast %198 : vector<16x32xbf16> to vector<1x16x32xbf16>
    tpu.vector_store %arg7[%c10, %c0_74, %c0_75], %201 {strides = array<i32>} : memref<16x16x32xbf16, #tpu.memory_space<vmem>>, vector<1x16x32xbf16>,
    %202 = vector.extract_strided_slice %195 {offsets = [0, 16], sizes = [32, 16], strides = [1, 1]} : vector<32x32xf32> to vector<32x16xf32>
    %203 = tpu.transpose %202, [1, 0] : vector<32x16xf32> -> vector<16x32xf32>
    %204 = arith.truncf %203 : vector<16x32xf32> to vector<16x32xbf16>
    %c10_76 = arith.constant 10 : index
    %c0_77 = arith.constant 0 : index
    %c0_78 = arith.constant 0 : index
    %205 = vector.load %arg8[%c10_76, %c0_77, %c0_78] : memref<16x16x32xbf16, #tpu.memory_space<vmem>>, vector<1x16x32xbf16>
    %206 = vector.shape_cast %205 : vector<1x16x32xbf16> to vector<16x32xbf16>
    %207 = vector.shape_cast %204 : vector<16x32xbf16> to vector<1x16x32xbf16>
    tpu.vector_store %arg8[%c10_76, %c0_77, %c0_78], %207 {strides = array<i32>} : memref<16x16x32xbf16, #tpu.memory_space<vmem>>, vector<1x16x32xbf16>,
    %208 = vector.extract_strided_slice %53 {offsets = [11, 0, 0], sizes = [1, 32, 32], strides = [1, 1, 1]} : vector<16x32x32xf32> to vector<1x32x32xf32>
    %209 = vector.shape_cast %208 : vector<1x32x32xf32> to vector<32x32xf32>
    %210 = vector.extract_strided_slice %209 {offsets = [0, 0], sizes = [32, 16], strides = [1, 1]} : vector<32x32xf32> to vector<32x16xf32>
    %211 = tpu.transpose %210, [1, 0] : vector<32x16xf32> -> vector<16x32xf32>
    %212 = arith.truncf %211 : vector<16x32xf32> to vector<16x32xbf16>
    %c11 = arith.constant 11 : index
    %c0_79 = arith.constant 0 : index
    %c0_80 = arith.constant 0 : index
    %213 = vector.load %arg7[%c11, %c0_79, %c0_80] : memref<16x16x32xbf16, #tpu.memory_space<vmem>>, vector<1x16x32xbf16>
    %214 = vector.shape_cast %213 : vector<1x16x32xbf16> to vector<16x32xbf16>
    %215 = vector.shape_cast %212 : vector<16x32xbf16> to vector<1x16x32xbf16>
    tpu.vector_store %arg7[%c11, %c0_79, %c0_80], %215 {strides = array<i32>} : memref<16x16x32xbf16, #tpu.memory_space<vmem>>, vector<1x16x32xbf16>,
    %216 = vector.extract_strided_slice %209 {offsets = [0, 16], sizes = [32, 16], strides = [1, 1]} : vector<32x32xf32> to vector<32x16xf32>
    %217 = tpu.transpose %216, [1, 0] : vector<32x16xf32> -> vector<16x32xf32>
    %218 = arith.truncf %217 : vector<16x32xf32> to vector<16x32xbf16>
    %c11_81 = arith.constant 11 : index
    %c0_82 = arith.constant 0 : index
    %c0_83 = arith.constant 0 : index
    %219 = vector.load %arg8[%c11_81, %c0_82, %c0_83] : memref<16x16x32xbf16, #tpu.memory_space<vmem>>, vector<1x16x32xbf16>
    %220 = vector.shape_cast %219 : vector<1x16x32xbf16> to vector<16x32xbf16>
    %221 = vector.shape_cast %218 : vector<16x32xbf16> to vector<1x16x32xbf16>
    tpu.vector_store %arg8[%c11_81, %c0_82, %c0_83], %221 {strides = array<i32>} : memref<16x16x32xbf16, #tpu.memory_space<vmem>>, vector<1x16x32xbf16>,
    %222 = vector.extract_strided_slice %53 {offsets = [12, 0, 0], sizes = [1, 32, 32], strides = [1, 1, 1]} : vector<16x32x32xf32> to vector<1x32x32xf32>
    %223 = vector.shape_cast %222 : vector<1x32x32xf32> to vector<32x32xf32>
    %224 = vector.extract_strided_slice %223 {offsets = [0, 0], sizes = [32, 16], strides = [1, 1]} : vector<32x32xf32> to vector<32x16xf32>
    %225 = tpu.transpose %224, [1, 0] : vector<32x16xf32> -> vector<16x32xf32>
    %226 = arith.truncf %225 : vector<16x32xf32> to vector<16x32xbf16>
    %c12 = arith.constant 12 : index
    %c0_84 = arith.constant 0 : index
    %c0_85 = arith.constant 0 : index
    %227 = vector.load %arg7[%c12, %c0_84, %c0_85] : memref<16x16x32xbf16, #tpu.memory_space<vmem>>, vector<1x16x32xbf16>
    %228 = vector.shape_cast %227 : vector<1x16x32xbf16> to vector<16x32xbf16>
    %229 = vector.shape_cast %226 : vector<16x32xbf16> to vector<1x16x32xbf16>
    tpu.vector_store %arg7[%c12, %c0_84, %c0_85], %229 {strides = array<i32>} : memref<16x16x32xbf16, #tpu.memory_space<vmem>>, vector<1x16x32xbf16>,
    %230 = vector.extract_strided_slice %223 {offsets = [0, 16], sizes = [32, 16], strides = [1, 1]} : vector<32x32xf32> to vector<32x16xf32>
    %231 = tpu.transpose %230, [1, 0] : vector<32x16xf32> -> vector<16x32xf32>
    %232 = arith.truncf %231 : vector<16x32xf32> to vector<16x32xbf16>
    %c12_86 = arith.constant 12 : index
    %c0_87 = arith.constant 0 : index
    %c0_88 = arith.constant 0 : index
    %233 = vector.load %arg8[%c12_86, %c0_87, %c0_88] : memref<16x16x32xbf16, #tpu.memory_space<vmem>>, vector<1x16x32xbf16>
    %234 = vector.shape_cast %233 : vector<1x16x32xbf16> to vector<16x32xbf16>
    %235 = vector.shape_cast %232 : vector<16x32xbf16> to vector<1x16x32xbf16>
    tpu.vector_store %arg8[%c12_86, %c0_87, %c0_88], %235 {strides = array<i32>} : memref<16x16x32xbf16, #tpu.memory_space<vmem>>, vector<1x16x32xbf16>,
    %236 = vector.extract_strided_slice %53 {offsets = [13, 0, 0], sizes = [1, 32, 32], strides = [1, 1, 1]} : vector<16x32x32xf32> to vector<1x32x32xf32>
    %237 = vector.shape_cast %236 : vector<1x32x32xf32> to vector<32x32xf32>
    %238 = vector.extract_strided_slice %237 {offsets = [0, 0], sizes = [32, 16], strides = [1, 1]} : vector<32x32xf32> to vector<32x16xf32>
    %239 = tpu.transpose %238, [1, 0] : vector<32x16xf32> -> vector<16x32xf32>
    %240 = arith.truncf %239 : vector<16x32xf32> to vector<16x32xbf16>
    %c13 = arith.constant 13 : index
    %c0_89 = arith.constant 0 : index
    %c0_90 = arith.constant 0 : index
    %241 = vector.load %arg7[%c13, %c0_89, %c0_90] : memref<16x16x32xbf16, #tpu.memory_space<vmem>>, vector<1x16x32xbf16>
    %242 = vector.shape_cast %241 : vector<1x16x32xbf16> to vector<16x32xbf16>
    %243 = vector.shape_cast %240 : vector<16x32xbf16> to vector<1x16x32xbf16>
    tpu.vector_store %arg7[%c13, %c0_89, %c0_90], %243 {strides = array<i32>} : memref<16x16x32xbf16, #tpu.memory_space<vmem>>, vector<1x16x32xbf16>,
    %244 = vector.extract_strided_slice %237 {offsets = [0, 16], sizes = [32, 16], strides = [1, 1]} : vector<32x32xf32> to vector<32x16xf32>
    %245 = tpu.transpose %244, [1, 0] : vector<32x16xf32> -> vector<16x32xf32>
    %246 = arith.truncf %245 : vector<16x32xf32> to vector<16x32xbf16>
    %c13_91 = arith.constant 13 : index
    %c0_92 = arith.constant 0 : index
    %c0_93 = arith.constant 0 : index
    %247 = vector.load %arg8[%c13_91, %c0_92, %c0_93] : memref<16x16x32xbf16, #tpu.memory_space<vmem>>, vector<1x16x32xbf16>
    %248 = vector.shape_cast %247 : vector<1x16x32xbf16> to vector<16x32xbf16>
    %249 = vector.shape_cast %246 : vector<16x32xbf16> to vector<1x16x32xbf16>
    tpu.vector_store %arg8[%c13_91, %c0_92, %c0_93], %249 {strides = array<i32>} : memref<16x16x32xbf16, #tpu.memory_space<vmem>>, vector<1x16x32xbf16>,
    %250 = vector.extract_strided_slice %53 {offsets = [14, 0, 0], sizes = [1, 32, 32], strides = [1, 1, 1]} : vector<16x32x32xf32> to vector<1x32x32xf32>
    %251 = vector.shape_cast %250 : vector<1x32x32xf32> to vector<32x32xf32>
    %252 = vector.extract_strided_slice %251 {offsets = [0, 0], sizes = [32, 16], strides = [1, 1]} : vector<32x32xf32> to vector<32x16xf32>
    %253 = tpu.transpose %252, [1, 0] : vector<32x16xf32> -> vector<16x32xf32>
    %254 = arith.truncf %253 : vector<16x32xf32> to vector<16x32xbf16>
    %c14 = arith.constant 14 : index
    %c0_94 = arith.constant 0 : index
    %c0_95 = arith.constant 0 : index
    %255 = vector.load %arg7[%c14, %c0_94, %c0_95] : memref<16x16x32xbf16, #tpu.memory_space<vmem>>, vector<1x16x32xbf16>
    %256 = vector.shape_cast %255 : vector<1x16x32xbf16> to vector<16x32xbf16>
    %257 = vector.shape_cast %254 : vector<16x32xbf16> to vector<1x16x32xbf16>
    tpu.vector_store %arg7[%c14, %c0_94, %c0_95], %257 {strides = array<i32>} : memref<16x16x32xbf16, #tpu.memory_space<vmem>>, vector<1x16x32xbf16>,
    %258 = vector.extract_strided_slice %251 {offsets = [0, 16], sizes = [32, 16], strides = [1, 1]} : vector<32x32xf32> to vector<32x16xf32>
    %259 = tpu.transpose %258, [1, 0] : vector<32x16xf32> -> vector<16x32xf32>
    %260 = arith.truncf %259 : vector<16x32xf32> to vector<16x32xbf16>
    %c14_96 = arith.constant 14 : index
    %c0_97 = arith.constant 0 : index
    %c0_98 = arith.constant 0 : index
    %261 = vector.load %arg8[%c14_96, %c0_97, %c0_98] : memref<16x16x32xbf16, #tpu.memory_space<vmem>>, vector<1x16x32xbf16>
    %262 = vector.shape_cast %261 : vector<1x16x32xbf16> to vector<16x32xbf16>
    %263 = vector.shape_cast %260 : vector<16x32xbf16> to vector<1x16x32xbf16>
    tpu.vector_store %arg8[%c14_96, %c0_97, %c0_98], %263 {strides = array<i32>} : memref<16x16x32xbf16, #tpu.memory_space<vmem>>, vector<1x16x32xbf16>,
    %264 = vector.extract_strided_slice %53 {offsets = [15, 0, 0], sizes = [1, 32, 32], strides = [1, 1, 1]} : vector<16x32x32xf32> to vector<1x32x32xf32>
    %265 = vector.shape_cast %264 : vector<1x32x32xf32> to vector<32x32xf32>
    %266 = vector.extract_strided_slice %265 {offsets = [0, 0], sizes = [32, 16], strides = [1, 1]} : vector<32x32xf32> to vector<32x16xf32>
    %267 = tpu.transpose %266, [1, 0] : vector<32x16xf32> -> vector<16x32xf32>
    %268 = arith.truncf %267 : vector<16x32xf32> to vector<16x32xbf16>
    %c15 = arith.constant 15 : index
    %c0_99 = arith.constant 0 : index
    %c0_100 = arith.constant 0 : index
    %269 = vector.load %arg7[%c15, %c0_99, %c0_100] : memref<16x16x32xbf16, #tpu.memory_space<vmem>>, vector<1x16x32xbf16>
    %270 = vector.shape_cast %269 : vector<1x16x32xbf16> to vector<16x32xbf16>
    %271 = vector.shape_cast %268 : vector<16x32xbf16> to vector<1x16x32xbf16>
    tpu.vector_store %arg7[%c15, %c0_99, %c0_100], %271 {strides = array<i32>} : memref<16x16x32xbf16, #tpu.memory_space<vmem>>, vector<1x16x32xbf16>,
    %272 = vector.extract_strided_slice %265 {offsets = [0, 16], sizes = [32, 16], strides = [1, 1]} : vector<32x32xf32> to vector<32x16xf32>
    %273 = tpu.transpose %272, [1, 0] : vector<32x16xf32> -> vector<16x32xf32>
    %274 = arith.truncf %273 : vector<16x32xf32> to vector<16x32xbf16>
    %c15_101 = arith.constant 15 : index
    %c0_102 = arith.constant 0 : index
    %c0_103 = arith.constant 0 : index
    %275 = vector.load %arg8[%c15_101, %c0_102, %c0_103] : memref<16x16x32xbf16, #tpu.memory_space<vmem>>, vector<1x16x32xbf16>
    %276 = vector.shape_cast %275 : vector<1x16x32xbf16> to vector<16x32xbf16>
    %277 = vector.shape_cast %274 : vector<16x32xbf16> to vector<1x16x32xbf16>
    tpu.vector_store %arg8[%c15_101, %c0_102, %c0_103], %277 {strides = array<i32>} : memref<16x16x32xbf16, #tpu.memory_space<vmem>>, vector<1x16x32xbf16>,
    return
  }
  func.func @transform_0(%arg0: i32) -> (i32, i32, i32) {
    %c0_i32 = arith.constant 0 : i32
    %c0_i32_0 = arith.constant 0 : i32
    %c0_i32_1 = arith.constant 0 : i32
    return %arg0, %c0_i32, %c0_i32_0 : i32, i32, i32
  }
  func.func @transform_1(%arg0: i32) -> (i32, i32, i32) {
    %c0_i32 = arith.constant 0 : i32
    %c0_i32_0 = arith.constant 0 : i32
    %c0_i32_1 = arith.constant 0 : i32
    return %arg0, %c0_i32, %c0_i32_0 : i32, i32, i32
  }
  func.func @transform_2(%arg0: i32) -> (i32, i32) {
    %c0_i32 = arith.constant 0 : i32
    %c0_i32_0 = arith.constant 0 : i32
    %c0_i32_1 = arith.constant 0 : i32
    return %c0_i32, %c0_i32_0 : i32, i32
  }
  func.func @transform_3(%arg0: i32) -> (i32, i32) {
    %c0_i32 = arith.constant 0 : i32
    %c0_i32_0 = arith.constant 0 : i32
    %c0_i32_1 = arith.constant 0 : i32
    return %c0_i32, %c0_i32_0 : i32, i32
  }
  func.func @transform_4(%arg0: i32) -> (i32, i32) {
    %c0_i32 = arith.constant 0 : i32
    %c0_i32_0 = arith.constant 0 : i32
    %c0_i32_1 = arith.constant 0 : i32
    return %c0_i32, %c0_i32_0 : i32, i32
  }
  func.func @transform_5(%arg0: i32) -> (i32, i32) {
    %c0_i32 = arith.constant 0 : i32
    %c0_i32_0 = arith.constant 0 : i32
    %c0_i32_1 = arith.constant 0 : i32
    return %c0_i32, %c0_i32_0 : i32, i32
  }
  func.func @transform_6(%arg0: i32) -> (i32, i32, i32) {
    %c0_i32 = arith.constant 0 : i32
    %c0_i32_0 = arith.constant 0 : i32
    %c0_i32_1 = arith.constant 0 : i32
    return %arg0, %c0_i32, %c0_i32_0 : i32, i32, i32
  }
  func.func @transform_7(%arg0: i32) -> (i32, i32, i32) {
    %c0_i32 = arith.constant 0 : i32
    %c0_i32_0 = arith.constant 0 : i32
    %c0_i32_1 = arith.constant 0 : i32
    return %arg0, %c0_i32, %c0_i32_0 : i32, i32, i32
  }
  func.func @transform_8(%arg0: i32) -> (i32, i32, i32) {
    %c0_i32 = arith.constant 0 : i32
    %c0_i32_0 = arith.constant 0 : i32
    %c0_i32_1 = arith.constant 0 : i32
    return %arg0, %c0_i32, %c0_i32_0 : i32, i32, i32
  }
}

</mosaic_0001>

<bundles_post_ra>
// kernel: tpu_custom_call.1
= control target key start
LH: loop header
LB: loop body
LE: loop exit
PB: predicated region body
PF: predicated region fallthrough
CT: control target
= control target key end

     0   :  { %s9553_s0 = inlined_call_operand.vmem [shape: f32[32,32,32], index: 0, kind: input, shape index: {}]   ;;  %s9554_s1 = inlined_call_operand.vmem [shape: f32[32,32,1], index: 1, kind: input, shape index: {}]   ;;  %s9555_s2 = inlined_call_operand.vmem [shape: f32[1,32], index: 2, kind: input, shape index: {}]   ;;  %s9556_s3 = inlined_call_operand.vmem [shape: f32[1,32], index: 3, kind: input, shape index: {}]   ;;  %s9557_s4 = inlined_call_operand.vmem [shape: bf16[32,96], index: 4, kind: input, shape index: {}]   ;;  %s9558_s5 = inlined_call_operand.vmem [shape: f32[1,96], index: 5, kind: input, shape index: {}]   ;;  %s9559_s6 = inlined_call_operand.hbm [shape: bf16[32,16,32], index: 6, kind: output, shape index: {0}]   ;;  %s9560_s7 = inlined_call_operand.hbm [shape: bf16[32,16,32], index: 7, kind: output, shape index: {1}]   ;;  %s9561_s8 = inlined_call_operand.hbm [shape: bf16[32,32,32], index: 8, kind: output, shape index: {2}]  }
   0x1   :  { %9668 = sst [smem:[#allocation130_spill]] %s9553_s0 }
   0x2   :  { %9669 = sst [smem:[#allocation131_spill]] %s9554_s1 }
   0x3   :  { %9670 = sst [smem:[#allocation132_spill]] %s9555_s2 }
   0x4   :  { %14 = vsyncpa [#allocation3], 0 }
   0x5   :  { %16 = vsyncpa [#allocation3 + $0x1], 0 }
   0x6   :  { %17 = vsyncpa [#allocation5], 0 }
   0x7   :  { %19 = vsyncpa [#allocation5 + $0x1], 0  ;;  %s6866_s27 = smov 0   ;;  %s6868_s28 = smov 0  }
   0x8   :  { %s6870_s29 = smov 0   ;;  %s6872_s30 = smov 0  }
   0x9 LB: > { %s6887_s9 = sadd.s32 4294967295, %s6811_s30   ;;  %s9665_s10 = sadd.s32 4294967294, %s6811_s30   ;;  %s6811_s30 = sphi %s6872_s30, %s10025_s30   ;;  %s6807_s29 = sphi %s6870_s29, %s10024_s29   ;;  %s6803_s28 = sphi %s6868_s28, %s10023_s28   ;;  %s6799_s27 = sphi %s6866_s27, %s10022_s27  }
   0xa   : > { %s6891_s11 = sadd.s32 1, %s6811_s30   ;;  %s168_s12 = sadd.s32 1, %s6807_s29 }
   0xb   : > { %s165_s13 = ssub.s32 %s6811_s30, %s6891_s11  ;;  %p178_p0 = scmp.ne.s32.totalorder %s6807_s29, %s6803_s28 }
   0xc   : > { %p166_p1 = scmp.eq.s32.totalorder %s165_s13, 0  ;;  %p179_p2 = scmp.eq.s32.totalorder %s6887_s9, 1 }
   0xd   : > { %p184_p3 = scmp.ne.s32.totalorder %s6803_s28, %s6799_s27  ;;  %p185_p4 = scmp.eq.s32.totalorder %s9665_s10, 1 }
   0xe   : > { %s6904_s14 = scalar_select %p166_p1, %s6807_s29, %s168_s12  }
   0xf   : > { %p6906_p5 = por %p179_p2, %p178_p0  ;;  %p6910_p6 = por %p185_p4, %p184_p3 }
  0x10   : > { %p5264_p7 = scmp.ge.s32.totalorder %s6811_s30, 1  ;;  %p287_p8 = scmp.lt.s32.totalorder %s6811_s30, 3 }
  0x12   : > { %p288_p9 = pnand %p5264_p7, %p287_p8 }
  0x14   : > { %291 = sbr.rel (%p288_p9) target bundleno = 1347 (0x543), region = 44 }
  0x19   : > { %s5268_s17 = sshll.u32 %s6887_s9, 4  ;;  %vm420_vm0 = vcmask 261120   ;;  %s9673_s0 = sld [smem:[#allocation130_spill]]  ;;  %vm3372_vm1 = vcmask 257024  }
  0x1a   : > { %p339_p10 = scmp.lt.s32.totalorder %s5268_s17, 31  ;;  %s9722_s1 = sld [smem:[#allocation131_spill]] }
  0x1b   : > { %s9723_s2 = sld [smem:[#allocation132_spill]]  ;;  %s6814_s12 = smov 96  }
  0x1c   : > { %s10027_s17 = smov (!%p339_p10, %s5268_s17), 31  ;;  %s6816_s22 = smov 112  }
  0x1d   : > { %s5577_s18 = sshll.u32 %s10027_s17, 5  ;;  %s8194_s17 = sand.u32 1, %s6803_s28  }
  0x1e   : > { %s5265_s23 = sshll.u32 %s8194_s17, 7  ;;  %s5072_s26 = sand.u32 1, %s6887_s9  }
  0x1f   : > { %s6925_s21 = scalar_lea.vmem %s9673_s0, %s5577_s18  ;;  %s9298_s24 = scalar_lea.vmem [#allocation2], %s5265_s23 }
  0x20   : > { %v6928_v0 = vld [vmem:[%s6925_s21] sm:$0xff]  ;;  %v6931_v1 = vld [vmem:[%s6925_s21 + $0x10] sm:$0xff]  ;;  %v6934_v2 = vld [vmem:[%s6925_s21 + $0x8] sm:$0xff]  ;;  %s7642_s13 = scalar_lea.vmem %s9722_s1, %s5577_s18  ;;  %s5267_s18 = sshll.u32 %s8194_s17, 8 }
  0x21   : > { %v421_v3 = vsel %vm420_vm0, %v6928_v0, 0.0  ;;  %v427_v4 = vsel %vm420_vm0, %v6931_v1, 0.0  ;;  %v6941_v5 = vld [vmem:[%s6925_s21 + $0x18] sm:$0xff]  ;;  %v424_v6 = vsel %vm420_vm0, %v6934_v2, 0.0  ;;  %v6948_v8 = vld [vmem:[%s6925_s21 + $0x20] sm:$0xff]  ;;  %v6951_v9 = vld [vmem:[%s6925_s21 + $0x28] sm:$0xff] }
  0x22   : > { %422 = vadd.xlane.f32.xlu0 %v421_v3  ;;  %428 = vadd.xlane.f32.xlu1 %v427_v4  ;;  %v430_v7 = vsel %vm420_vm0, %v6941_v5, 0.0  ;;  %v433_v10 = vsel %vm420_vm0, %v6948_v8, 0.0  ;;  %v436_v11 = vsel %vm420_vm0, %v6951_v9, 0.0  ;;  %v6958_v12 = vld [vmem:[%s6925_s21 + $0x30] sm:$0xff]  ;;  %v6961_v13 = vld [vmem:[%s6925_s21 + $0x38] sm:$0xff]  ;;  %v6968_v16 = vld [vmem:[%s6925_s21 + $0x40] sm:$0xff] }
  0x23   : > { %v439_v14 = vsel %vm420_vm0, %v6958_v12, 0.0  ;;  %v442_v15 = vsel %vm420_vm0, %v6961_v13, 0.0  ;;  %v6971_v17 = vld [vmem:[%s6925_s21 + $0x48] sm:$0xff]  ;;  %v445_v18 = vsel %vm420_vm0, %v6968_v16, 0.0  ;;  %v6978_v20 = vld [vmem:[%s6925_s21 + $0x50] sm:$0xff]  ;;  %v6981_v21 = vld [vmem:[%s6925_s21 + $0x58] sm:$0xff] }
  0x24   : > { %v448_v19 = vsel %vm420_vm0, %v6971_v17, 0.0  ;;  %v451_v22 = vsel %vm420_vm0, %v6978_v20, 0.0  ;;  %v454_v23 = vsel %vm420_vm0, %v6981_v21, 0.0  ;;  %v6988_v24 = vld [vmem:[%s6925_s21 + $0x60] sm:$0xff]  ;;  %v6991_v25 = vld [vmem:[%s6925_s21 + $0x68] sm:$0xff]  ;;  %v6998_v28 = vld [vmem:[%s6925_s21 + $0x70] sm:$0xff] }
  0x25   : > { %v457_v26 = vsel %vm420_vm0, %v6988_v24, 0.0  ;;  %v460_v27 = vsel %vm420_vm0, %v6991_v25, 0.0  ;;  %v7001_v29 = vld [vmem:[%s6925_s21 + $0x78] sm:$0xff]  ;;  %v463_v30 = vsel %vm420_vm0, %v6998_v28, 0.0  ;;  %v7008_v32 = vld [vmem:[%s6925_s21 + $0x80] sm:$0xff]  ;;  %v7011_v33 = vld [vmem:[%s6925_s21 + $0x88] sm:$0xff] }
  0x26   : > { %425 = vadd.xlane.f32.xlu0 %v424_v6  ;;  %431 = vadd.xlane.f32.xlu1 %v430_v7  ;;  %v466_v31 = vsel %vm420_vm0, %v7001_v29, 0.0  ;;  %v469_v34 = vsel %vm420_vm0, %v7008_v32, 0.0  ;;  %v472_v35 = vsel %vm420_vm0, %v7011_v33, 0.0  ;;  %v7018_v36 = vld [vmem:[%s6925_s21 + $0x90] sm:$0xff]  ;;  %v7021_v37 = vld [vmem:[%s6925_s21 + $0x98] sm:$0xff]  ;;  %v7028_v40 = vld [vmem:[%s6925_s21 + $0xa0] sm:$0xff] }
  0x27   : > { %v475_v38 = vsel %vm420_vm0, %v7018_v36, 0.0  ;;  %v478_v39 = vsel %vm420_vm0, %v7021_v37, 0.0  ;;  %v7031_v41 = vld [vmem:[%s6925_s21 + $0xa8] sm:$0xff]  ;;  %v481_v42 = vsel %vm420_vm0, %v7028_v40, 0.0  ;;  %v7038_v44 = vld [vmem:[%s6925_s21 + $0xb0] sm:$0xff]  ;;  %v7041_v45 = vld [vmem:[%s6925_s21 + $0xb8] sm:$0xff] }
  0x28   : > { %v484_v43 = vsel %vm420_vm0, %v7031_v41, 0.0  ;;  %v487_v46 = vsel %vm420_vm0, %v7038_v44, 0.0  ;;  %v490_v47 = vsel %vm420_vm0, %v7041_v45, 0.0  ;;  %v7048_v48 = vld [vmem:[%s6925_s21 + $0xc0] sm:$0xff]  ;;  %v7051_v49 = vld [vmem:[%s6925_s21 + $0xc8] sm:$0xff]  ;;  %v7058_v52 = vld [vmem:[%s6925_s21 + $0xd0] sm:$0xff] }
  0x29   : > { %v493_v50 = vsel %vm420_vm0, %v7048_v48, 0.0  ;;  %v496_v51 = vsel %vm420_vm0, %v7051_v49, 0.0  ;;  %v7061_v53 = vld [vmem:[%s6925_s21 + $0xd8] sm:$0xff]  ;;  %v499_v54 = vsel %vm420_vm0, %v7058_v52, 0.0  ;;  %v7068_v56 = vld [vmem:[%s6925_s21 + $0xe0] sm:$0xff]  ;;  %v7071_v57 = vld [vmem:[%s6925_s21 + $0xe8] sm:$0xff] }
  0x2a   : > { %434 = vadd.xlane.f32.xlu0 %v433_v10  ;;  %437 = vadd.xlane.f32.xlu1 %v436_v11  ;;  %v502_v55 = vsel %vm420_vm0, %v7061_v53, 0.0  ;;  %v505_v58 = vsel %vm420_vm0, %v7068_v56, 0.0  ;;  %v508_v59 = vsel %vm420_vm0, %v7071_v57, 0.0  ;;  %v7078_v60 = vld [vmem:[%s6925_s21 + $0xf0] sm:$0xff]  ;;  %v7081_v61 = vld [vmem:[%s6925_s21 + $0xf8] sm:$0xff]  ;;  %v7088_v3 = vld [vmem:[%s6925_s21 + $0x100] sm:$0xff] }
  0x2b   : > { %v511_v62 = vsel %vm420_vm0, %v7078_v60, 0.0  ;;  %v514_v63 = vsel %vm420_vm0, %v7081_v61, 0.0  ;;  %v7091_v4 = vld [vmem:[%s6925_s21 + $0x108] sm:$0xff]  ;;  %v517_v6 = vsel %vm420_vm0, %v7088_v3, 0.0  ;;  %v7098_v10 = vld [vmem:[%s6925_s21 + $0x110] sm:$0xff]  ;;  %v7101_v11 = vld [vmem:[%s6925_s21 + $0x118] sm:$0xff] }
  0x2c   : > { %v520_v7 = vsel %vm420_vm0, %v7091_v4, 0.0  ;;  %s8221_s19 = scalar_lea.vmem [#allocation6], %s5267_s18  ;;  %s9303_s25 = scalar_lea.vmem [#allocation4], %s5265_s23 }
  0x2d   : > { %s5109_s18 = sshll.u32 %s9303_s25, 4  ;;  %s5092_s23 = sshll.u32 %s9298_s24, 4  ;;  %s9440_s18 = int_to_ptr.vmem [resolvable:$true] %s5109_s18  ;;  %s9447_s23 = int_to_ptr.vmem [resolvable:$true] %s5092_s23 }
  0x2e   : > { %440 = vadd.xlane.f32.xlu0 %v439_v14  ;;  %443 = vadd.xlane.f32.xlu1 %v442_v15  ;;  %v523_v14 = vsel %vm420_vm0, %v7098_v10, 0.0  ;;  %v526_v15 = vsel %vm420_vm0, %v7101_v11, 0.0  ;;  %s5712_s10 = sshll.u32 %s6887_s9, 12  ;;  %s6695_s0 = scalar_lea.vmem %s9440_s18, 2048 }
  0x2f   : > { %s9456_s20 = scalar_lea.hbm %s9561_s8, %s5712_s10  ;;  %p6696_p11 = scmp.ne.s32.totalorder %s9440_s18, %s6695_s0 }
  0x30   : > { %s6817_s1 = smov [#allocation4]  }
  0x31   : > { %p6697_p12 = pnand %p6696_p11, %p6906_p5 }
  0x32   : > { %446 = vadd.xlane.f32.xlu0 %v445_v18  ;;  %449 = vadd.xlane.f32.xlu1 %v448_v19  ;;  %v7108_v18 = vld [vmem:[%s6925_s21 + $0x120] sm:$0xff]  ;;  %v7111_v19 = vld [vmem:[%s6925_s21 + $0x128] sm:$0xff] }
  0x33   : > { %p6698_p13 = pneg %p6697_p12 }
  0x36   : > { %452 = vadd.xlane.f32.xlu0 %v451_v22  ;;  %455 = vadd.xlane.f32.xlu1 %v454_v23  ;;  %v529_v22 = vsel %vm420_vm0, %v7108_v18, 0.0  ;;  %v532_v23 = vsel %vm420_vm0, %v7111_v19, 0.0 }
  0x3a   : > { %458 = vadd.xlane.f32.xlu0 %v457_v26  ;;  %461 = vadd.xlane.f32.xlu1 %v460_v27  ;;  %v7118_v26 = vld [vmem:[%s6925_s21 + $0x130] sm:$0xff]  ;;  %v7121_v27 = vld [vmem:[%s6925_s21 + $0x138] sm:$0xff] }
  0x3e   : > { %464 = vadd.xlane.f32.xlu0 %v463_v30  ;;  %467 = vadd.xlane.f32.xlu1 %v466_v31  ;;  %v535_v30 = vsel %vm420_vm0, %v7118_v26, 0.0  ;;  %v538_v31 = vsel %vm420_vm0, %v7121_v27, 0.0 }
  0x42   : > { %470 = vadd.xlane.f32.xlu0 %v469_v34  ;;  %473 = vadd.xlane.f32.xlu1 %v472_v35  ;;  %v7128_v34 = vld [vmem:[%s6925_s21 + $0x140] sm:$0xff]  ;;  %v7131_v35 = vld [vmem:[%s6925_s21 + $0x148] sm:$0xff] }
  0x46   : > { %476 = vadd.xlane.f32.xlu0 %v475_v38  ;;  %479 = vadd.xlane.f32.xlu1 %v478_v39  ;;  %v541_v38 = vsel %vm420_vm0, %v7128_v34, 0.0  ;;  %v544_v39 = vsel %vm420_vm0, %v7131_v35, 0.0 }
  0x4a   : > { %482 = vadd.xlane.f32.xlu0 %v481_v42  ;;  %485 = vadd.xlane.f32.xlu1 %v484_v43  ;;  %v7138_v42 = vld [vmem:[%s6925_s21 + $0x150] sm:$0xff]  ;;  %v7141_v43 = vld [vmem:[%s6925_s21 + $0x158] sm:$0xff] }
  0x4e   : > { %488 = vadd.xlane.f32.xlu0 %v487_v46  ;;  %491 = vadd.xlane.f32.xlu1 %v490_v47  ;;  %v547_v46 = vsel %vm420_vm0, %v7138_v42, 0.0  ;;  %v550_v47 = vsel %vm420_vm0, %v7141_v43, 0.0 }
  0x52   : > { %494 = vadd.xlane.f32.xlu0 %v493_v50  ;;  %497 = vadd.xlane.f32.xlu1 %v496_v51  ;;  %v7148_v50 = vld [vmem:[%s6925_s21 + $0x160] sm:$0xff]  ;;  %v7151_v51 = vld [vmem:[%s6925_s21 + $0x168] sm:$0xff] }
  0x56   : > { %500 = vadd.xlane.f32.xlu0 %v499_v54  ;;  %503 = vadd.xlane.f32.xlu1 %v502_v55  ;;  %v553_v54 = vsel %vm420_vm0, %v7148_v50, 0.0  ;;  %v556_v55 = vsel %vm420_vm0, %v7151_v51, 0.0 }
  0x5a   : > { %506 = vadd.xlane.f32.xlu0 %v505_v58  ;;  %509 = vadd.xlane.f32.xlu1 %v508_v59  ;;  %v7158_v58 = vld [vmem:[%s6925_s21 + $0x170] sm:$0xff]  ;;  %v7161_v59 = vld [vmem:[%s6925_s21 + $0x178] sm:$0xff] }
  0x5e   : > { %512 = vadd.xlane.f32.xlu0 %v511_v62  ;;  %515 = vadd.xlane.f32.xlu1 %v514_v63  ;;  %v559_v62 = vsel %vm420_vm0, %v7158_v58, 0.0  ;;  %v562_v63 = vsel %vm420_vm0, %v7161_v59, 0.0 }
  0x62   : > { %518 = vadd.xlane.f32.xlu0 %v517_v6  ;;  %521 = vadd.xlane.f32.xlu1 %v520_v7  ;;  %v7168_v6 = vld [vmem:[%s6925_s21 + $0x180] sm:$0xff]  ;;  %v7171_v7 = vld [vmem:[%s6925_s21 + $0x188] sm:$0xff] }
  0x66   : > { %524 = vadd.xlane.f32.xlu0 %v523_v14  ;;  %527 = vadd.xlane.f32.xlu1 %v526_v15  ;;  %v565_v14 = vsel %vm420_vm0, %v7168_v6, 0.0  ;;  %v568_v15 = vsel %vm420_vm0, %v7171_v7, 0.0 }
  0x6a   : > { %530 = vadd.xlane.f32.xlu0 %v529_v22  ;;  %533 = vadd.xlane.f32.xlu1 %v532_v23  ;;  %v7178_v22 = vld [vmem:[%s6925_s21 + $0x190] sm:$0xff]  ;;  %v7181_v23 = vld [vmem:[%s6925_s21 + $0x198] sm:$0xff] }
  0x6b   : > { %9674 = vst [vmem:[#allocation9_spill] sm:$0xff] %v7178_v22  ;;  %9675 = vst [vmem:[#allocation10_spill] sm:$0xff] %v7181_v23 }
  0x6e   : > { %536 = vadd.xlane.f32.xlu0 %v535_v30  ;;  %539 = vadd.xlane.f32.xlu1 %v538_v31  ;;  %v571_v30 = vsel %vm420_vm0, %v7178_v22, 0.0  ;;  %v574_v31 = vsel %vm420_vm0, %v7181_v23, 0.0 }
  0x72   : > { %542 = vadd.xlane.f32.xlu0 %v541_v38  ;;  %545 = vadd.xlane.f32.xlu1 %v544_v39  ;;  %v7188_v38 = vld [vmem:[%s6925_s21 + $0x1a0] sm:$0xff]  ;;  %v7191_v39 = vld [vmem:[%s6925_s21 + $0x1a8] sm:$0xff] }
  0x73   : > { %9676 = vst [vmem:[#allocation11_spill] sm:$0xff] %v7188_v38  ;;  %9677 = vst [vmem:[#allocation12_spill] sm:$0xff] %v7191_v39 }
  0x76   : > { %548 = vadd.xlane.f32.xlu0 %v547_v46  ;;  %551 = vadd.xlane.f32.xlu1 %v550_v47  ;;  %v577_v46 = vsel %vm420_vm0, %v7188_v38, 0.0  ;;  %v580_v47 = vsel %vm420_vm0, %v7191_v39, 0.0 }
  0x7a   : > { %554 = vadd.xlane.f32.xlu0 %v553_v54  ;;  %557 = vadd.xlane.f32.xlu1 %v556_v55  ;;  %v7198_v54 = vld [vmem:[%s6925_s21 + $0x1b0] sm:$0xff]  ;;  %v7201_v55 = vld [vmem:[%s6925_s21 + $0x1b8] sm:$0xff] }
  0x7b   : > { %9678 = vst [vmem:[#allocation13_spill] sm:$0xff] %v7198_v54  ;;  %9679 = vst [vmem:[#allocation14_spill] sm:$0xff] %v7201_v55 }
  0x7e   : > { %560 = vadd.xlane.f32.xlu0 %v559_v62  ;;  %563 = vadd.xlane.f32.xlu1 %v562_v63  ;;  %v583_v62 = vsel %vm420_vm0, %v7198_v54, 0.0  ;;  %v586_v63 = vsel %vm420_vm0, %v7201_v55, 0.0  ;;  %v7231_v54 = vld [vmem:[%s6925_s21 + $0x1e8] sm:$0xff] }
  0x7f   : > { %9685 = vst [vmem:[#allocation20_spill] sm:$0xff] %v7231_v54 }
  0x82   : > { %566 = vadd.xlane.f32.xlu0 %v565_v14  ;;  %569 = vadd.xlane.f32.xlu1 %v568_v15  ;;  %v7208_v14 = vld [vmem:[%s6925_s21 + $0x1c0] sm:$0xff]  ;;  %v7211_v15 = vld [vmem:[%s6925_s21 + $0x1c8] sm:$0xff] }
  0x83   : > { %9680 = vst [vmem:[#allocation15_spill] sm:$0xff] %v7208_v14  ;;  %9681 = vst [vmem:[#allocation16_spill] sm:$0xff] %v7211_v15 }
  0x86   : > { %572 = vadd.xlane.f32.xlu0 %v571_v30  ;;  %575 = vadd.xlane.f32.xlu1 %v574_v31  ;;  %v589_v30 = vsel %vm420_vm0, %v7208_v14, 0.0  ;;  %v592_v31 = vsel %vm420_vm0, %v7211_v15, 0.0  ;;  %v604_v14 = vsel %vm420_vm0, %v7231_v54, 0.0 }
  0x8a   : > { %578 = vadd.xlane.f32.xlu0 %v577_v46  ;;  %581 = vadd.xlane.f32.xlu1 %v580_v47  ;;  %v7218_v46 = vld [vmem:[%s6925_s21 + $0x1d0] sm:$0xff]  ;;  %v7221_v47 = vld [vmem:[%s6925_s21 + $0x1d8] sm:$0xff] }
  0x8b   : > { %9682 = vst [vmem:[#allocation17_spill] sm:$0xff] %v7218_v46  ;;  %9683 = vst [vmem:[#allocation18_spill] sm:$0xff] %v7221_v47  ;;  %v595_v55 = vsel %vm420_vm0, %v7218_v46, 0.0 }
  0x8e   : > { %584 = vadd.xlane.f32.xlu0 %v583_v62  ;;  %587 = vadd.xlane.f32.xlu1 %v586_v63  ;;  %v598_v62 = vsel %vm420_vm0, %v7221_v47, 0.0  ;;  %v7228_v63 = vld [vmem:[%s6925_s21 + $0x1e0] sm:$0xff] }
  0x8f   : > { %9684 = vst [vmem:[#allocation19_spill] sm:$0xff] %v7228_v63  ;;  %v601_v15 = vsel %vm420_vm0, %v7228_v63, 0.0 }
  0x92   : > { %590 = vadd.xlane.f32.xlu0 %v589_v30  ;;  %593 = vadd.xlane.f32.xlu1 %v592_v31  ;;  %v7238_v30 = vld [vmem:[%s6925_s21 + $0x1f0] sm:$0xff]  ;;  %v7241_v31 = vld [vmem:[%s6925_s21 + $0x1f8] sm:$0xff]  ;;  %s9460_s21 = scalar_lea.sflag [#allocation5], %s5072_s26 }
  0x93   : > { %9686 = vst [vmem:[#allocation21_spill] sm:$0xff] %v7238_v30  ;;  %v607_v47 = vsel %vm420_vm0, %v7238_v30, 0.0  ;;  %v610_v46 = vsel %vm420_vm0, %v7241_v31, 0.0 }
  0x96   : > { %596 = vadd.xlane.f32.xlu0 %v595_v55  ;;  %599 = vadd.xlane.f32.xlu1 %v598_v62 }
  0x9a   : > { %602 = vadd.xlane.f32.xlu0 %v601_v15  ;;  %605 = vadd.xlane.f32.xlu1 %v604_v14 }
  0x9e   : > { %608 = vadd.xlane.f32.xlu0 %v607_v47  ;;  %611 = vadd.xlane.f32.xlu1 %v610_v46 }
  0xab   : > { %v423_v55 = vpop.xlane.xlu0 %422  ;;  %v429_v62 = vpop.xlane.xlu1 %428 }
  0xac   : > { %v614_v63 = vmul.f32 0.03125, %v423_v55  ;;  %v616_v39 = vmul.f32 0.03125, %v429_v62 }
  0xae   : > { %v7248_v54 = vsub.f32 %v6928_v0, %v614_v63  ;;  %v7251_v38 = vsub.f32 %v6931_v1, %v616_v39 }
  0xaf   : > { %v426_v15 = vpop.xlane.xlu0 %425  ;;  %v432_v14 = vpop.xlane.xlu1 %431 }
  0xb0   : > { %9687 = vst [vmem:[#allocation22_spill] sm:$0xff] %v7251_v38  ;;  %v615_v23 = vmul.f32 0.03125, %v426_v15  ;;  %v617_v22 = vmul.f32 0.03125, %v432_v14  ;;  %v742_v30 = vmul.f32 %v7248_v54, %v7248_v54  ;;  %v744_v46 = vmul.f32 %v7251_v38, %v7251_v38 }
  0xb2   : > { %v7258_v47 = vsub.f32 %v6934_v2, %v615_v23  ;;  %v7261_v55 = vsub.f32 %v6941_v5, %v617_v22  ;;  %v806_v0 = vsel %vm420_vm0, %v742_v30, 0.0  ;;  %v812_v63 = vsel %vm420_vm0, %v744_v46, 0.0 }
  0xb3   : > { %807 = vadd.xlane.f32.xlu0 %v806_v0  ;;  %v435_v1 = vpop.xlane.xlu0 %434  ;;  %v438_v39 = vpop.xlane.xlu1 %437 }
  0xb4   : > { %v618_v62 = vmul.f32 0.03125, %v435_v1  ;;  %v619_v15 = vmul.f32 0.03125, %v438_v39  ;;  %v743_v14 = vmul.f32 %v7258_v47, %v7258_v47  ;;  %v745_v38 = vmul.f32 %v7261_v55, %v7261_v55 }
  0xb6   : > { %v7270_v2 = vsub.f32 %v6948_v8, %v618_v62  ;;  %v7273_v5 = vsub.f32 %v6951_v9, %v619_v15  ;;  %v809_v22 = vsel %vm420_vm0, %v743_v14, 0.0  ;;  %v815_v46 = vsel %vm420_vm0, %v745_v38, 0.0 }
  0xb7   : > { %813 = vadd.xlane.f32.xlu0 %v812_v63  ;;  %810 = vadd.xlane.f32.xlu1 %v809_v22  ;;  %v441_v23 = vpop.xlane.xlu0 %440  ;;  %v444_v30 = vpop.xlane.xlu1 %443 }
  0xb8   : > { %v620_v0 = vmul.f32 0.03125, %v441_v23  ;;  %v621_v1 = vmul.f32 0.03125, %v444_v30  ;;  %v746_v39 = vmul.f32 %v7270_v2, %v7270_v2  ;;  %v747_v8 = vmul.f32 %v7273_v5, %v7273_v5 }
  0xba   : > { %v7282_v62 = vsub.f32 %v6958_v12, %v620_v0  ;;  %v7285_v9 = vsub.f32 %v6961_v13, %v621_v1  ;;  %v818_v63 = vsel %vm420_vm0, %v746_v39, 0.0  ;;  %v821_v14 = vsel %vm420_vm0, %v747_v8, 0.0 }
  0xbb   : > { %816 = vadd.xlane.f32.xlu1 %v815_v46  ;;  %819 = vadd.xlane.f32.xlu0 %v818_v63  ;;  %v447_v15 = vpop.xlane.xlu0 %446  ;;  %v450_v38 = vpop.xlane.xlu1 %449 }
  0xbc   : > { %v622_v22 = vmul.f32 0.03125, %v447_v15  ;;  %v623_v23 = vmul.f32 0.03125, %v450_v38  ;;  %v748_v30 = vmul.f32 %v7282_v62, %v7282_v62  ;;  %v749_v12 = vmul.f32 %v7285_v9, %v7285_v9 }
  0xbe   : > { %v7294_v0 = vsub.f32 %v6968_v16, %v622_v22  ;;  %v7297_v13 = vsub.f32 %v6971_v17, %v623_v23  ;;  %v824_v46 = vsel %vm420_vm0, %v748_v30, 0.0  ;;  %v827_v8 = vsel %vm420_vm0, %v749_v12, 0.0 }
  0xbf   : > { %822 = vadd.xlane.f32.xlu1 %v821_v14  ;;  %825 = vadd.xlane.f32.xlu0 %v824_v46  ;;  %v453_v1 = vpop.xlane.xlu0 %452  ;;  %v456_v39 = vpop.xlane.xlu1 %455 }
  0xc0   : > { %v624_v63 = vmul.f32 0.03125, %v453_v1  ;;  %v625_v15 = vmul.f32 0.03125, %v456_v39  ;;  %v750_v38 = vmul.f32 %v7294_v0, %v7294_v0  ;;  %v751_v16 = vmul.f32 %v7297_v13, %v7297_v13 }
  0xc2   : > { %v7306_v22 = vsub.f32 %v6978_v20, %v624_v63  ;;  %v7309_v17 = vsub.f32 %v6981_v21, %v625_v15  ;;  %v830_v14 = vsel %vm420_vm0, %v750_v38, 0.0  ;;  %v833_v12 = vsel %vm420_vm0, %v751_v16, 0.0 }
  0xc3   : > { %828 = vadd.xlane.f32.xlu1 %v827_v8  ;;  %831 = vadd.xlane.f32.xlu0 %v830_v14  ;;  %v459_v23 = vpop.xlane.xlu0 %458  ;;  %v462_v30 = vpop.xlane.xlu1 %461 }
  0xc4   : > { %v626_v46 = vmul.f32 0.03125, %v459_v23  ;;  %v627_v1 = vmul.f32 0.03125, %v462_v30  ;;  %v752_v39 = vmul.f32 %v7306_v22, %v7306_v22  ;;  %v753_v20 = vmul.f32 %v7309_v17, %v7309_v17 }
  0xc6   : > { %v7318_v63 = vsub.f32 %v6988_v24, %v626_v46  ;;  %v7321_v21 = vsub.f32 %v6991_v25, %v627_v1  ;;  %v836_v8 = vsel %vm420_vm0, %v752_v39, 0.0  ;;  %v839_v16 = vsel %vm420_vm0, %v753_v20, 0.0 }
  0xc7   : > { %834 = vadd.xlane.f32.xlu1 %v833_v12  ;;  %837 = vadd.xlane.f32.xlu0 %v836_v8  ;;  %v465_v15 = vpop.xlane.xlu0 %464  ;;  %v468_v38 = vpop.xlane.xlu1 %467 }
  0xc8   : > { %v628_v14 = vmul.f32 0.03125, %v465_v15  ;;  %v629_v23 = vmul.f32 0.03125, %v468_v38  ;;  %v754_v30 = vmul.f32 %v7318_v63, %v7318_v63  ;;  %v755_v24 = vmul.f32 %v7321_v21, %v7321_v21 }
  0xca   : > { %v7330_v46 = vsub.f32 %v6998_v28, %v628_v14  ;;  %v7333_v25 = vsub.f32 %v7001_v29, %v629_v23  ;;  %v842_v12 = vsel %vm420_vm0, %v754_v30, 0.0  ;;  %v845_v20 = vsel %vm420_vm0, %v755_v24, 0.0 }
  0xcb   : > { %840 = vadd.xlane.f32.xlu1 %v839_v16  ;;  %843 = vadd.xlane.f32.xlu0 %v842_v12  ;;  %v471_v1 = vpop.xlane.xlu0 %470  ;;  %v474_v39 = vpop.xlane.xlu1 %473 }
  0xcc   : > { %v630_v8 = vmul.f32 0.03125, %v471_v1  ;;  %v631_v15 = vmul.f32 0.03125, %v474_v39  ;;  %v756_v38 = vmul.f32 %v7330_v46, %v7330_v46  ;;  %v757_v28 = vmul.f32 %v7333_v25, %v7333_v25 }
  0xce   : > { %v7342_v14 = vsub.f32 %v7008_v32, %v630_v8  ;;  %v7345_v29 = vsub.f32 %v7011_v33, %v631_v15  ;;  %v848_v16 = vsel %vm420_vm0, %v756_v38, 0.0  ;;  %v851_v24 = vsel %vm420_vm0, %v757_v28, 0.0 }
  0xcf   : > { %846 = vadd.xlane.f32.xlu1 %v845_v20  ;;  %849 = vadd.xlane.f32.xlu0 %v848_v16  ;;  %v477_v23 = vpop.xlane.xlu0 %476  ;;  %v480_v30 = vpop.xlane.xlu1 %479 }
  0xd0   : > { %v632_v12 = vmul.f32 0.03125, %v477_v23  ;;  %v633_v1 = vmul.f32 0.03125, %v480_v30  ;;  %v758_v39 = vmul.f32 %v7342_v14, %v7342_v14  ;;  %v759_v32 = vmul.f32 %v7345_v29, %v7345_v29 }
  0xd2   : > { %v7354_v8 = vsub.f32 %v7018_v36, %v632_v12  ;;  %v7357_v33 = vsub.f32 %v7021_v37, %v633_v1  ;;  %v854_v20 = vsel %vm420_vm0, %v758_v39, 0.0  ;;  %v857_v28 = vsel %vm420_vm0, %v759_v32, 0.0  ;;  %v6306_v1 = vld [vmem:[%s9557_s4 + $0x8] sm:$0xff]  }
  0xd3   : > { %852 = vadd.xlane.f32.xlu1 %v851_v24  ;;  %855 = vadd.xlane.f32.xlu0 %v854_v20  ;;  %v483_v15 = vpop.xlane.xlu0 %482  ;;  %v486_v38 = vpop.xlane.xlu1 %485 }
  0xd4   : > { %v634_v16 = vmul.f32 0.03125, %v483_v15  ;;  %v635_v23 = vmul.f32 0.03125, %v486_v38  ;;  %v760_v30 = vmul.f32 %v7354_v8, %v7354_v8  ;;  %v761_v36 = vmul.f32 %v7357_v33, %v7357_v33  ;;  %5747 = vmatprep.subr.bf16.mxu0 %v6306_v1  ;;  %5815 = vmatprep.subr.bf16.mxu1 %v6306_v1 }
  0xd5   : > { %5748 = vmatpush3.bf16.msra.mxu0 %v6306_v1  ;;  %5817 = vmatpush3.bf16.msra.mxu1 %v6306_v1 }
  0xd6   : > { %v7366_v12 = vsub.f32 %v7028_v40, %v634_v16  ;;  %v7369_v37 = vsub.f32 %v7031_v41, %v635_v23  ;;  %v860_v24 = vsel %vm420_vm0, %v760_v30, 0.0  ;;  %v863_v20 = vsel %vm420_vm0, %v761_v36, 0.0  ;;  %v6307_v30 = vld [vmem:[%s9557_s4] sm:$0xff]  }
  0xd7   : > { %858 = vadd.xlane.f32.xlu1 %v857_v28  ;;  %861 = vadd.xlane.f32.xlu0 %v860_v24  ;;  %v489_v39 = vpop.xlane.xlu0 %488  ;;  %v492_v32 = vpop.xlane.xlu1 %491 }
  0xd8   : > { %v636_v15 = vmul.f32 0.03125, %v489_v39  ;;  %v637_v38 = vmul.f32 0.03125, %v492_v32  ;;  %v762_v40 = vmul.f32 %v7366_v12, %v7366_v12  ;;  %v763_v41 = vmul.f32 %v7369_v37, %v7369_v37  ;;  %5749 = vmatprep.subr.bf16.mxu0 %v6307_v30  ;;  %5816 = vmatprep.subr.bf16.mxu1 %v6307_v30 }
  0xd9   : > { %5750 = vmatpush3.bf16.msra.mxu0 %v6307_v30  ;;  %5818 = vmatpush3.bf16.msra.mxu1 %v6307_v30 }
  0xda   : > { %v7381_v16 = vsub.f32 %v7038_v44, %v636_v15  ;;  %v7384_v28 = vsub.f32 %v7041_v45, %v637_v38  ;;  %v866_v23 = vsel %vm420_vm0, %v762_v40, 0.0  ;;  %v869_v39 = vsel %vm420_vm0, %v763_v41, 0.0 }
  0xdb   : > { %864 = vadd.xlane.f32.xlu1 %v863_v20  ;;  %867 = vadd.xlane.f32.xlu0 %v866_v23  ;;  %v495_v36 = vpop.xlane.xlu0 %494  ;;  %v498_v24 = vpop.xlane.xlu1 %497 }
  0xdc   : > { %9688 = vst [vmem:[#allocation23_spill] sm:$0xff] %v7384_v28  ;;  %v638_v32 = vmul.f32 0.03125, %v495_v36  ;;  %v639_v1 = vmul.f32 0.03125, %v498_v24  ;;  %v764_v44 = vmul.f32 %v7381_v16, %v7381_v16  ;;  %v765_v45 = vmul.f32 %v7384_v28, %v7384_v28 }
  0xde   : > { %v7396_v15 = vsub.f32 %v7048_v48, %v638_v32  ;;  %v7399_v20 = vsub.f32 %v7051_v49, %v639_v1  ;;  %v872_v38 = vsel %vm420_vm0, %v764_v44, 0.0  ;;  %v875_v23 = vsel %vm420_vm0, %v765_v45, 0.0 }
  0xdf   : > { %870 = vadd.xlane.f32.xlu1 %v869_v39  ;;  %873 = vadd.xlane.f32.xlu0 %v872_v38  ;;  %v501_v40 = vpop.xlane.xlu0 %500  ;;  %v504_v41 = vpop.xlane.xlu1 %503 }
  0xe0   : > { %v640_v36 = vmul.f32 0.03125, %v501_v40  ;;  %v641_v24 = vmul.f32 0.03125, %v504_v41  ;;  %v766_v28 = vmul.f32 %v7396_v15, %v7396_v15  ;;  %v767_v48 = vmul.f32 %v7399_v20, %v7399_v20 }
  0xe2   : > { %v7408_v30 = vsub.f32 %v7058_v52, %v640_v36  ;;  %v7411_v49 = vsub.f32 %v7061_v53, %v641_v24  ;;  %v878_v39 = vsel %vm420_vm0, %v766_v28, 0.0  ;;  %v881_v44 = vsel %vm420_vm0, %v767_v48, 0.0 }
  0xe3   : > { %876 = vadd.xlane.f32.xlu1 %v875_v23  ;;  %879 = vadd.xlane.f32.xlu0 %v878_v39  ;;  %v507_v32 = vpop.xlane.xlu0 %506  ;;  %v510_v1 = vpop.xlane.xlu1 %509 }
  0xe4   : > { %v642_v45 = vmul.f32 0.03125, %v507_v32  ;;  %v643_v38 = vmul.f32 0.03125, %v510_v1  ;;  %v768_v40 = vmul.f32 %v7408_v30, %v7408_v30  ;;  %v769_v52 = vmul.f32 %v7411_v49, %v7411_v49 }
  0xe6   : > { %v7420_v41 = vsub.f32 %v7068_v56, %v642_v45  ;;  %v7423_v53 = vsub.f32 %v7071_v57, %v643_v38  ;;  %v884_v28 = vsel %vm420_vm0, %v768_v40, 0.0  ;;  %v887_v24 = vsel %vm420_vm0, %v769_v52, 0.0 }
  0xe7   : > { %882 = vadd.xlane.f32.xlu1 %v881_v44  ;;  %885 = vadd.xlane.f32.xlu0 %v884_v28  ;;  %v513_v23 = vpop.xlane.xlu0 %512  ;;  %v516_v36 = vpop.xlane.xlu1 %515 }
  0xe8   : > { %v644_v48 = vmul.f32 0.03125, %v513_v23  ;;  %v645_v39 = vmul.f32 0.03125, %v516_v36  ;;  %v770_v32 = vmul.f32 %v7420_v41, %v7420_v41  ;;  %v771_v56 = vmul.f32 %v7423_v53, %v7423_v53 }
  0xea   : > { %v7432_v1 = vsub.f32 %v7078_v60, %v644_v48  ;;  %v7435_v57 = vsub.f32 %v7081_v61, %v645_v39  ;;  %v890_v44 = vsel %vm420_vm0, %v770_v32, 0.0  ;;  %v893_v40 = vsel %vm420_vm0, %v771_v56, 0.0 }
  0xeb   : > { %888 = vadd.xlane.f32.xlu1 %v887_v24  ;;  %891 = vadd.xlane.f32.xlu0 %v890_v44  ;;  %v519_v45 = vpop.xlane.xlu0 %518  ;;  %v522_v38 = vpop.xlane.xlu1 %521 }
  0xec   : > { %v646_v52 = vmul.f32 0.03125, %v519_v45  ;;  %v647_v28 = vmul.f32 0.03125, %v522_v38  ;;  %v772_v23 = vmul.f32 %v7432_v1, %v7432_v1  ;;  %v773_v60 = vmul.f32 %v7435_v57, %v7435_v57 }
  0xee   : > { %v7444_v36 = vsub.f32 %v7088_v3, %v646_v52  ;;  %v7447_v61 = vsub.f32 %v7091_v4, %v647_v28  ;;  %v896_v24 = vsel %vm420_vm0, %v772_v23, 0.0  ;;  %v899_v32 = vsel %vm420_vm0, %v773_v60, 0.0 }
  0xef   : > { %894 = vadd.xlane.f32.xlu1 %v893_v40  ;;  %897 = vadd.xlane.f32.xlu0 %v896_v24  ;;  %v525_v48 = vpop.xlane.xlu0 %524  ;;  %v528_v39 = vpop.xlane.xlu1 %527 }
  0xf0   : > { %v648_v56 = vmul.f32 0.03125, %v525_v48  ;;  %v649_v44 = vmul.f32 0.03125, %v528_v39  ;;  %v774_v45 = vmul.f32 %v7444_v36, %v7444_v36  ;;  %v775_v3 = vmul.f32 %v7447_v61, %v7447_v61 }
  0xf2   : > { %v7456_v38 = vsub.f32 %v7098_v10, %v648_v56  ;;  %v7459_v4 = vsub.f32 %v7101_v11, %v649_v44  ;;  %v902_v40 = vsel %vm420_vm0, %v774_v45, 0.0  ;;  %v905_v23 = vsel %vm420_vm0, %v775_v3, 0.0 }
  0xf3   : > { %900 = vadd.xlane.f32.xlu1 %v899_v32  ;;  %903 = vadd.xlane.f32.xlu0 %v902_v40  ;;  %v531_v52 = vpop.xlane.xlu0 %530  ;;  %v534_v28 = vpop.xlane.xlu1 %533 }
  0xf4   : > { %v650_v60 = vmul.f32 0.03125, %v531_v52  ;;  %v651_v24 = vmul.f32 0.03125, %v534_v28  ;;  %v776_v48 = vmul.f32 %v7456_v38, %v7456_v38  ;;  %v777_v10 = vmul.f32 %v7459_v4, %v7459_v4 }
  0xf5   : > { %v6813_v28 = vmov 0  }
  0xf6   : > { %v7468_v39 = vsub.f32 %v7108_v18, %v650_v60  ;;  %v7471_v11 = vsub.f32 %v7111_v19, %v651_v24  ;;  %v908_v32 = vsel %vm420_vm0, %v776_v48, 0.0  ;;  %v911_v45 = vsel %vm420_vm0, %v777_v10, 0.0  ;;  %5875 = vset.pattern.permute.xlu1 %v6813_v28  ;;  %5874 = vset.pattern.permute.xlu0 %v6813_v28 }
  0xf7   : > { %906 = vadd.xlane.f32.xlu1 %v905_v23  ;;  %909 = vadd.xlane.f32.xlu0 %v908_v32  ;;  %v537_v56 = vpop.xlane.xlu0 %536  ;;  %v540_v44 = vpop.xlane.xlu1 %539 }
  0xf8   : > { %v652_v3 = vmul.f32 0.03125, %v537_v56  ;;  %v653_v40 = vmul.f32 0.03125, %v540_v44  ;;  %v778_v52 = vmul.f32 %v7468_v39, %v7468_v39  ;;  %v779_v18 = vmul.f32 %v7471_v11, %v7471_v11 }
  0xfa   : > { %v7480_v19 = vsub.f32 %v7118_v26, %v652_v3  ;;  %v7483_v23 = vsub.f32 %v7121_v27, %v653_v40  ;;  %v914_v60 = vsel %vm420_vm0, %v778_v52, 0.0  ;;  %v917_v10 = vsel %vm420_vm0, %v779_v18, 0.0 }
  0xfb   : > { %912 = vadd.xlane.f32.xlu1 %v911_v45  ;;  %915 = vadd.xlane.f32.xlu0 %v914_v60  ;;  %v543_v24 = vpop.xlane.xlu0 %542  ;;  %v546_v48 = vpop.xlane.xlu1 %545 }
  0xfc   : > { %v654_v32 = vmul.f32 0.03125, %v543_v24  ;;  %v655_v56 = vmul.f32 0.03125, %v546_v48  ;;  %v780_v44 = vmul.f32 %v7480_v19, %v7480_v19  ;;  %v781_v26 = vmul.f32 %v7483_v23, %v7483_v23 }
  0xfe   : > { %v7492_v3 = vsub.f32 %v7128_v34, %v654_v32  ;;  %v7495_v27 = vsub.f32 %v7131_v35, %v655_v56  ;;  %v920_v45 = vsel %vm420_vm0, %v780_v44, 0.0  ;;  %v923_v18 = vsel %vm420_vm0, %v781_v26, 0.0 }
  0xff   : > { %918 = vadd.xlane.f32.xlu1 %v917_v10  ;;  %921 = vadd.xlane.f32.xlu0 %v920_v45  ;;  %v549_v40 = vpop.xlane.xlu0 %548  ;;  %v552_v52 = vpop.xlane.xlu1 %551 }
 0x100   : > { %v656_v28 = vmul.f32 0.03125, %v549_v40  ;;  %v657_v60 = vmul.f32 0.03125, %v552_v52  ;;  %v782_v24 = vmul.f32 %v7492_v3, %v7492_v3  ;;  %v783_v34 = vmul.f32 %v7495_v27, %v7495_v27 }
 0x102   : > { %v7504_v48 = vsub.f32 %v7138_v42, %v656_v28  ;;  %v7507_v35 = vsub.f32 %v7141_v43, %v657_v60  ;;  %v926_v10 = vsel %vm420_vm0, %v782_v24, 0.0  ;;  %v929_v44 = vsel %vm420_vm0, %v783_v34, 0.0 }
 0x103   : > { %924 = vadd.xlane.f32.xlu1 %v923_v18  ;;  %927 = vadd.xlane.f32.xlu0 %v926_v10  ;;  %v555_v32 = vpop.xlane.xlu0 %554  ;;  %v558_v56 = vpop.xlane.xlu1 %557 }
 0x104   : > { %v658_v26 = vmul.f32 0.03125, %v555_v32  ;;  %v659_v45 = vmul.f32 0.03125, %v558_v56  ;;  %v784_v40 = vmul.f32 %v7504_v48, %v7504_v48  ;;  %v785_v42 = vmul.f32 %v7507_v35, %v7507_v35 }
 0x106   : > { %v7516_v52 = vsub.f32 %v7148_v50, %v658_v26  ;;  %v7519_v43 = vsub.f32 %v7151_v51, %v659_v45  ;;  %v932_v18 = vsel %vm420_vm0, %v784_v40, 0.0  ;;  %v935_v24 = vsel %vm420_vm0, %v785_v42, 0.0 }
 0x107   : > { %930 = vadd.xlane.f32.xlu1 %v929_v44  ;;  %933 = vadd.xlane.f32.xlu0 %v932_v18  ;;  %v561_v28 = vpop.xlane.xlu0 %560  ;;  %v564_v60 = vpop.xlane.xlu1 %563 }
 0x108   : > { %9689 = vst [vmem:[#allocation24_spill] sm:$0xff] %v7516_v52  ;;  %9690 = vst [vmem:[#allocation25_spill] sm:$0xff] %v7519_v43  ;;  %v660_v34 = vmul.f32 0.03125, %v561_v28  ;;  %v661_v10 = vmul.f32 0.03125, %v564_v60  ;;  %v786_v32 = vmul.f32 %v7516_v52, %v7516_v52  ;;  %v787_v50 = vmul.f32 %v7519_v43, %v7519_v43 }
 0x10a   : > { %v7528_v56 = vsub.f32 %v7158_v58, %v660_v34  ;;  %v7531_v51 = vsub.f32 %v7161_v59, %v661_v10  ;;  %v938_v44 = vsel %vm420_vm0, %v786_v32, 0.0  ;;  %v941_v40 = vsel %vm420_vm0, %v787_v50, 0.0 }
 0x10b   : > { %936 = vadd.xlane.f32.xlu1 %v935_v24  ;;  %939 = vadd.xlane.f32.xlu0 %v938_v44  ;;  %v567_v26 = vpop.xlane.xlu0 %566  ;;  %v570_v45 = vpop.xlane.xlu1 %569 }
 0x10c   : > { %9691 = vst [vmem:[#allocation26_spill] sm:$0xff] %v7528_v56  ;;  %9692 = vst [vmem:[#allocation27_spill] sm:$0xff] %v7531_v51  ;;  %v662_v42 = vmul.f32 0.03125, %v567_v26  ;;  %v663_v18 = vmul.f32 0.03125, %v570_v45  ;;  %v788_v28 = vmul.f32 %v7528_v56, %v7528_v56  ;;  %v789_v58 = vmul.f32 %v7531_v51, %v7531_v51  ;;  %v9695_v45 = vld [vmem:[#allocation9_spill] sm:$0xff] }
 0x10e   : > { %v7540_v60 = vsub.f32 %v7168_v6, %v662_v42  ;;  %v7543_v59 = vsub.f32 %v7171_v7, %v663_v18  ;;  %v944_v24 = vsel %vm420_vm0, %v788_v28, 0.0  ;;  %v947_v32 = vsel %vm420_vm0, %v789_v58, 0.0  ;;  %v9697_v7 = vld [vmem:[#allocation10_spill] sm:$0xff] }
 0x10f   : > { %942 = vadd.xlane.f32.xlu1 %v941_v40  ;;  %945 = vadd.xlane.f32.xlu0 %v944_v24  ;;  %v573_v34 = vpop.xlane.xlu0 %572  ;;  %v576_v10 = vpop.xlane.xlu1 %575 }
 0x110   : > { %9693 = vst [vmem:[#allocation28_spill] sm:$0xff] %v7540_v60  ;;  %9694 = vst [vmem:[#allocation29_spill] sm:$0xff] %v7543_v59  ;;  %v664_v50 = vmul.f32 0.03125, %v573_v34  ;;  %v665_v44 = vmul.f32 0.03125, %v576_v10  ;;  %v790_v26 = vmul.f32 %v7540_v60, %v7540_v60  ;;  %v791_v6 = vmul.f32 %v7543_v59, %v7543_v59 }
 0x112   : > { %v7552_v42 = vsub.f32 %v9695_v45, %v664_v50  ;;  %v7555_v18 = vsub.f32 %v9697_v7, %v665_v44  ;;  %v950_v40 = vsel %vm420_vm0, %v790_v26, 0.0  ;;  %v953_v24 = vsel %vm420_vm0, %v791_v6, 0.0  ;;  %v9699_v45 = vld [vmem:[#allocation11_spill] sm:$0xff]  ;;  %v9701_v44 = vld [vmem:[#allocation12_spill] sm:$0xff] }
 0x113   : > { %948 = vadd.xlane.f32.xlu1 %v947_v32  ;;  %951 = vadd.xlane.f32.xlu0 %v950_v40  ;;  %v579_v28 = vpop.xlane.xlu0 %578  ;;  %v582_v58 = vpop.xlane.xlu1 %581 }
 0x114   : > { %9696 = vst [vmem:[#allocation9_spill] sm:$0xff] %v7552_v42  ;;  %9698 = vst [vmem:[#allocation10_spill] sm:$0xff] %v7555_v18  ;;  %v666_v34 = vmul.f32 0.03125, %v579_v28  ;;  %v667_v10 = vmul.f32 0.03125, %v582_v58  ;;  %v792_v60 = vmul.f32 %v7552_v42, %v7552_v42  ;;  %v793_v50 = vmul.f32 %v7555_v18, %v7555_v18 }
 0x116   : > { %v7564_v59 = vsub.f32 %v9699_v45, %v666_v34  ;;  %v7567_v7 = vsub.f32 %v9701_v44, %v667_v10  ;;  %v956_v32 = vsel %vm420_vm0, %v792_v60, 0.0  ;;  %v959_v40 = vsel %vm420_vm0, %v793_v50, 0.0  ;;  %v9703_v45 = vld [vmem:[#allocation13_spill] sm:$0xff]  ;;  %v9705_v10 = vld [vmem:[#allocation14_spill] sm:$0xff] }
 0x117   : > { %954 = vadd.xlane.f32.xlu1 %v953_v24  ;;  %957 = vadd.xlane.f32.xlu0 %v956_v32  ;;  %v585_v26 = vpop.xlane.xlu0 %584  ;;  %v588_v6 = vpop.xlane.xlu1 %587 }
 0x118   : > { %9700 = vst [vmem:[#allocation11_spill] sm:$0xff] %v7564_v59  ;;  %9702 = vst [vmem:[#allocation12_spill] sm:$0xff] %v7567_v7  ;;  %v668_v28 = vmul.f32 0.03125, %v585_v26  ;;  %v669_v58 = vmul.f32 0.03125, %v588_v6  ;;  %v794_v42 = vmul.f32 %v7564_v59, %v7564_v59  ;;  %v795_v34 = vmul.f32 %v7567_v7, %v7567_v7 }
 0x11a   : > { %v7576_v18 = vsub.f32 %v9703_v45, %v668_v28  ;;  %v7579_v44 = vsub.f32 %v9705_v10, %v669_v58  ;;  %v962_v60 = vsel %vm420_vm0, %v794_v42, 0.0  ;;  %v965_v32 = vsel %vm420_vm0, %v795_v34, 0.0  ;;  %v9707_v45 = vld [vmem:[#allocation15_spill] sm:$0xff]  ;;  %v9709_v58 = vld [vmem:[#allocation16_spill] sm:$0xff] }
 0x11b   : > { %960 = vadd.xlane.f32.xlu1 %v959_v40  ;;  %963 = vadd.xlane.f32.xlu0 %v962_v60  ;;  %v591_v24 = vpop.xlane.xlu0 %590  ;;  %v594_v50 = vpop.xlane.xlu1 %593 }
 0x11c   : > { %9704 = vst [vmem:[#allocation13_spill] sm:$0xff] %v7576_v18  ;;  %9706 = vst [vmem:[#allocation14_spill] sm:$0xff] %v7579_v44  ;;  %v670_v26 = vmul.f32 0.03125, %v591_v24  ;;  %v671_v6 = vmul.f32 0.03125, %v594_v50  ;;  %v796_v59 = vmul.f32 %v7576_v18, %v7576_v18  ;;  %v797_v28 = vmul.f32 %v7579_v44, %v7579_v44 }
 0x11e   : > { %v7588_v7 = vsub.f32 %v9707_v45, %v670_v26  ;;  %v7591_v10 = vsub.f32 %v9709_v58, %v671_v6  ;;  %v968_v42 = vsel %vm420_vm0, %v796_v59, 0.0  ;;  %v971_v60 = vsel %vm420_vm0, %v797_v28, 0.0  ;;  %v9711_v45 = vld [vmem:[#allocation17_spill] sm:$0xff]  ;;  %v9713_v6 = vld [vmem:[#allocation18_spill] sm:$0xff] }
 0x11f   : > { %966 = vadd.xlane.f32.xlu1 %v965_v32  ;;  %969 = vadd.xlane.f32.xlu0 %v968_v42  ;;  %v597_v40 = vpop.xlane.xlu0 %596  ;;  %v600_v34 = vpop.xlane.xlu1 %599 }
 0x120   : > { %9708 = vst [vmem:[#allocation15_spill] sm:$0xff] %v7588_v7  ;;  %9710 = vst [vmem:[#allocation16_spill] sm:$0xff] %v7591_v10  ;;  %v672_v24 = vmul.f32 0.03125, %v597_v40  ;;  %v673_v50 = vmul.f32 0.03125, %v600_v34  ;;  %v798_v18 = vmul.f32 %v7588_v7, %v7588_v7  ;;  %v799_v26 = vmul.f32 %v7591_v10, %v7591_v10 }
 0x122   : > { %v7600_v44 = vsub.f32 %v9711_v45, %v672_v24  ;;  %v7603_v58 = vsub.f32 %v9713_v6, %v673_v50  ;;  %v974_v59 = vsel %vm420_vm0, %v798_v18, 0.0  ;;  %v977_v42 = vsel %vm420_vm0, %v799_v26, 0.0  ;;  %v9715_v45 = vld [vmem:[#allocation19_spill] sm:$0xff]  ;;  %v9717_v50 = vld [vmem:[#allocation20_spill] sm:$0xff] }
 0x123   : > { %972 = vadd.xlane.f32.xlu1 %v971_v60  ;;  %975 = vadd.xlane.f32.xlu0 %v974_v59  ;;  %v603_v32 = vpop.xlane.xlu0 %602  ;;  %v606_v28 = vpop.xlane.xlu1 %605 }
 0x124   : > { %9712 = vst [vmem:[#allocation17_spill] sm:$0xff] %v7600_v44  ;;  %9714 = vst [vmem:[#allocation18_spill] sm:$0xff] %v7603_v58  ;;  %v674_v40 = vmul.f32 0.03125, %v603_v32  ;;  %v675_v34 = vmul.f32 0.03125, %v606_v28  ;;  %v800_v7 = vmul.f32 %v7600_v44, %v7600_v44  ;;  %v801_v24 = vmul.f32 %v7603_v58, %v7603_v58 }
 0x126   : > { %v7612_v10 = vsub.f32 %v9715_v45, %v674_v40  ;;  %v7615_v6 = vsub.f32 %v9717_v50, %v675_v34  ;;  %v980_v18 = vsel %vm420_vm0, %v800_v7, 0.0  ;;  %v983_v59 = vsel %vm420_vm0, %v801_v24, 0.0  ;;  %v9719_v45 = vld [vmem:[#allocation21_spill] sm:$0xff] }
 0x127   : > { %978 = vadd.xlane.f32.xlu1 %v977_v42  ;;  %981 = vadd.xlane.f32.xlu0 %v980_v18  ;;  %v609_v60 = vpop.xlane.xlu0 %608  ;;  %v612_v26 = vpop.xlane.xlu1 %611 }
 0x128   : > { %9716 = vst [vmem:[#allocation19_spill] sm:$0xff] %v7612_v10  ;;  %9718 = vst [vmem:[#allocation20_spill] sm:$0xff] %v7615_v6  ;;  %v676_v32 = vmul.f32 0.03125, %v609_v60  ;;  %v677_v28 = vmul.f32 0.03125, %v612_v26  ;;  %v802_v44 = vmul.f32 %v7612_v10, %v7612_v10  ;;  %v803_v40 = vmul.f32 %v7615_v6, %v7615_v6  ;;  %v1840_v10 = vld [vmem:[%s7642_s13 + $0x20] sm:$0xff] }
 0x12a   : > { %v7624_v34 = vsub.f32 %v9719_v45, %v676_v32  ;;  %v7627_v7 = vsub.f32 %v7241_v31, %v677_v28  ;;  %v986_v42 = vsel %vm420_vm0, %v802_v44, 0.0  ;;  %v989_v24 = vsel %vm420_vm0, %v803_v40, 0.0 }
 0x12b   : > { %984 = vadd.xlane.f32.xlu1 %v983_v59  ;;  %987 = vadd.xlane.f32.xlu0 %v986_v42  ;;  %v1837_v42 = vld [vmem:[%s7642_s13 + $0x8] sm:$0xff] }
 0x12c   : > { %9720 = vst [vmem:[#allocation21_spill] sm:$0xff] %v7624_v34  ;;  %9721 = vst [vmem:[#allocation30_spill] sm:$0xff] %v7627_v7  ;;  %v804_v50 = vmul.f32 %v7624_v34, %v7624_v34  ;;  %v805_v18 = vmul.f32 %v7627_v7, %v7627_v7  ;;  %v1839_v34 = vld [vmem:[%s7642_s13 + $0x18] sm:$0xff] }
 0x12e   : > { %v992_v60 = vsel %vm420_vm0, %v804_v50, 0.0  ;;  %v995_v26 = vsel %vm420_vm0, %v805_v18, 0.0 }
 0x12f   : > { %990 = vadd.xlane.f32.xlu1 %v989_v24  ;;  %993 = vadd.xlane.f32.xlu0 %v992_v60  ;;  %v1836_v24 = vld [vmem:[%s7642_s13] sm:$0xff] }
 0x133   : > { %996 = vadd.xlane.f32.xlu1 %v995_v26 }
 0x13c   : > { %v808_v31 = vpop.xlane.xlu0 %807 }
 0x13d   : > { %v998_v32 = vmul.f32 0.03125, %v808_v31 }
 0x13f   : > { %v1062_v44 = vadd.f32 1e-05, %v998_v32  ;;  %v1838_v32 = vld [vmem:[%s7642_s13 + $0x10] sm:$0xff] }
 0x140   : > { %v811_v59 = vpop.xlane.xlu1 %810  ;;  %v814_v28 = vpop.xlane.xlu0 %813 }
 0x141   : > { %6308 = vrsqrt.f32 %v1062_v44  ;;  %v999_v40 = vmul.f32 0.03125, %v811_v59  ;;  %v1000_v45 = vmul.f32 0.03125, %v814_v28 }
 0x143   : > { %v1063_v50 = vadd.f32 1e-05, %v999_v40  ;;  %v1064_v18 = vadd.f32 1e-05, %v1000_v45 }
 0x144   : > { %v817_v60 = vpop.xlane.xlu1 %816  ;;  %v820_v26 = vpop.xlane.xlu0 %819  ;;  %2611 = vperm.xlu1 %5875, %v1837_v42   ;;  %v1841_v42 = vld [vmem:[%s7642_s13 + $0x28] sm:$0xff] }
 0x145   : > { %6310 = vrsqrt.f32 %v1063_v50  ;;  %v1001_v31 = vmul.f32 0.03125, %v817_v60  ;;  %v1002_v7 = vmul.f32 0.03125, %v820_v26  ;;  %2606 = vperm.xlu0 %5874, %v1836_v24  }
 0x146   : > { %6312 = vrsqrt.f32 %v1064_v18 }
 0x147   : > { %v1065_v44 = vadd.f32 1e-05, %v1001_v31  ;;  %v1066_v6 = vadd.f32 1e-05, %v1002_v7  ;;  %v1842_v31 = vld [vmem:[%s7642_s13 + $0x30] sm:$0xff] }
 0x148   : > { %v823_v59 = vpop.xlane.xlu1 %822  ;;  %v826_v28 = vpop.xlane.xlu0 %825  ;;  %2616 = vperm.xlu1 %5875, %v1838_v32  }
 0x149   : > { %6314 = vrsqrt.f32 %v1065_v44  ;;  %v1003_v40 = vmul.f32 0.03125, %v823_v59  ;;  %v1004_v45 = vmul.f32 0.03125, %v826_v28  ;;  %2621 = vperm.xlu0 %5874, %v1839_v34   ;;  %v1843_v44 = vld [vmem:[%s7642_s13 + $0x38] sm:$0xff]  ;;  %v7656_v34 = vld [vmem:[%s9723_s2] ss:$0 sm:$0xff] }
 0x14a   : > { %6316 = vrsqrt.f32 %v1066_v6 }
 0x14b   : > { %v1067_v50 = vadd.f32 1e-05, %v1003_v40  ;;  %v1068_v60 = vadd.f32 1e-05, %v1004_v45 }
 0x14c   : > { %v829_v26 = vpop.xlane.xlu1 %828  ;;  %v832_v24 = vpop.xlane.xlu0 %831  ;;  %2626 = vperm.xlu1 %5875, %v1840_v10  }
 0x14d   : > { %6318 = vrsqrt.f32 %v1067_v50  ;;  %v1005_v18 = vmul.f32 0.03125, %v829_v26  ;;  %v1006_v7 = vmul.f32 0.03125, %v832_v24  ;;  %2631 = vperm.xlu0 %5874, %v1841_v42   ;;  %v1844_v42 = vld [vmem:[%s7642_s13 + $0x40] sm:$0xff]  ;;  %v1845_v24 = vld [vmem:[%s7642_s13 + $0x48] sm:$0xff] }
 0x14e   : > { %v6309_v32 = vpop.eup %6308  ;;  %6320 = vrsqrt.f32 %v1068_v60 }
 0x14f   : > { %v1069_v59 = vadd.f32 1e-05, %v1005_v18  ;;  %v1070_v28 = vadd.f32 1e-05, %v1006_v7  ;;  %v1190_v6 = vmul.f32 %v6309_v32, %v7248_v54 }
 0x150   : > { %v835_v10 = vpop.xlane.xlu1 %834  ;;  %v838_v40 = vpop.xlane.xlu0 %837  ;;  %2636 = vperm.xlu1 %5875, %v1842_v31   ;;  %v7665_v31 = vld [vmem:[%s9556_s3] ss:$0 sm:$0xff] }
 0x151   : > { %6322 = vrsqrt.f32 %v1069_v59  ;;  %v1007_v45 = vmul.f32 0.03125, %v835_v10  ;;  %v1008_v50 = vmul.f32 0.03125, %v838_v40  ;;  %2641 = vperm.xlu0 %5874, %v1843_v44   ;;  %v1261_v26 = vmul.f32 %v7656_v34, %v1190_v6  ;;  %v9724_v44 = vld [vmem:[#allocation22_spill] sm:$0xff] }
 0x152   : > { %v6311_v60 = vpop.eup %6310  ;;  %6324 = vrsqrt.f32 %v1070_v28 }
 0x153   : > { %v6313_v54 = vpop.eup %6312  ;;  %v1071_v18 = vadd.f32 1e-05, %v1007_v45  ;;  %v1072_v7 = vadd.f32 1e-05, %v1008_v50  ;;  %v1191_v32 = vmul.f32 %v6311_v60, %v7258_v47  ;;  %v1846_v45 = vld [vmem:[%s7642_s13 + $0x50] sm:$0xff]  ;;  %v1332_v47 = vadd.f32 %v7665_v31, %v1261_v26  ;;  %v1847_v60 = vld [vmem:[%s7642_s13 + $0x58] sm:$0xff] }
 0x154   : > { %v841_v59 = vpop.xlane.xlu1 %840  ;;  %v844_v10 = vpop.xlane.xlu0 %843  ;;  %v1192_v40 = vmul.f32 %v6313_v54, %v9724_v44  ;;  %2646 = vperm.xlu1 %5875, %v1844_v42  }
 0x155   : > { %6326 = vrsqrt.f32 %v1071_v18  ;;  %v1009_v28 = vmul.f32 0.03125, %v841_v59  ;;  %v1010_v6 = vmul.f32 0.03125, %v844_v10  ;;  %v1262_v58 = vmul.f32 %v7656_v34, %v1191_v32  ;;  %2651 = vperm.xlu0 %5874, %v1845_v24   ;;  %v1848_v10 = vld [vmem:[%s7642_s13 + $0x60] sm:$0xff] }
 0x156   : > { %v6315_v50 = vpop.eup %6314  ;;  %6328 = vrsqrt.f32 %v1072_v7  ;;  %v1263_v32 = vmul.f32 %v7656_v34, %v1192_v40 }
 0x157   : > { %v6317_v51 = vpop.eup %6316  ;;  %v1073_v56 = vadd.f32 1e-05, %v1009_v28  ;;  %v1074_v43 = vadd.f32 1e-05, %v1010_v6  ;;  %v1333_v52 = vadd.f32 %v7665_v31, %v1262_v58  ;;  %v1193_v42 = vmul.f32 %v6315_v50, %v7261_v55  ;;  %v1849_v28 = vld [vmem:[%s7642_s13 + $0x68] sm:$0xff] }
 0x158   : > { %v847_v54 = vpop.xlane.xlu1 %846  ;;  %v850_v18 = vpop.xlane.xlu0 %849  ;;  %v1194_v24 = vmul.f32 %v6317_v51, %v7270_v2  ;;  %2656 = vperm.xlu1 %5875, %v1846_v45   ;;  %v1334_v51 = vadd.f32 %v7665_v31, %v1263_v32 }
 0x159   : > { %6330 = vrsqrt.f32 %v1073_v56  ;;  %v1011_v7 = vmul.f32 0.03125, %v847_v54  ;;  %v1012_v26 = vmul.f32 0.03125, %v850_v18  ;;  %v1396_v59 = vpack.c.bf16 %v1333_v52, %v1332_v47  ;;  %2661 = vperm.xlu0 %5874, %v1847_v60   ;;  %v1850_v54 = vld [vmem:[%s7642_s13 + $0x70] sm:$0xff] }
 0x15a   : > { %v6319_v44 = vpop.eup %6318  ;;  %6332 = vrsqrt.f32 %v1074_v43  ;;  %v1264_v58 = vmul.f32 %v7656_v34, %v1193_v42  ;;  %v1265_v55 = vmul.f32 %v7656_v34, %v1194_v24 }
 0x15b   : > { %v6321_v6 = vpop.eup %6320  ;;  %v1075_v50 = vadd.f32 1e-05, %v1011_v7  ;;  %v1076_v40 = vadd.f32 1e-05, %v1012_v26  ;;  %5751 = vmatprep.mubr.msk.bf16.mxu0 %vm420_vm0, %v1396_v59  ;;  %v1195_v2 = vmul.f32 %v6319_v44, %v7273_v5  ;;  %v1851_v7 = vld [vmem:[%s7642_s13 + $0x78] sm:$0xff] }
 0x15c   : > { %v853_v56 = vpop.xlane.xlu1 %852  ;;  %v856_v52 = vpop.xlane.xlu0 %855  ;;  %v1335_v43 = vadd.f32 %v7665_v31, %v1264_v58  ;;  %v1196_v45 = vmul.f32 %v6321_v6, %v7282_v62  ;;  %2666 = vperm.xlu1 %5875, %v1848_v10   ;;  %v1336_v24 = vadd.f32 %v7665_v31, %v1265_v55 }
 0x15d   : > { %6334 = vrsqrt.f32 %v1075_v50  ;;  %v1013_v47 = vmul.f32 0.03125, %v853_v56  ;;  %v1014_v60 = vmul.f32 0.03125, %v856_v52  ;;  %v1266_v42 = vmul.f32 %v7656_v34, %v1195_v2  ;;  %2671 = vperm.xlu0 %5874, %v1849_v28   ;;  %v1852_v2 = vld [vmem:[%s7642_s13 + $0x80] sm:$0xff] }
 0x15e   : > { %v6323_v18 = vpop.eup %6322  ;;  %6336 = vrsqrt.f32 %v1076_v40  ;;  %v1397_v5 = vpack.c.bf16 %v1335_v43, %v1334_v51  ;;  %v1267_v28 = vmul.f32 %v7656_v34, %v1196_v45  ;;  %v1853_v51 = vld [vmem:[%s7642_s13 + $0x88] sm:$0xff] }
 0x15f   : > { %v6325_v32 = vpop.eup %6324  ;;  %v1077_v26 = vadd.f32 1e-05, %v1013_v47  ;;  %v1078_v59 = vadd.f32 1e-05, %v1014_v60  ;;  %v1337_v62 = vadd.f32 %v7665_v31, %v1266_v42  ;;  %v1197_v10 = vmul.f32 %v6323_v18, %v7285_v9 }
 0x160   : > { %5752 = vmatmul.mubr.msk.bf16.vlgmr.msra.gmra.mxu0 %vm420_vm0, %v1397_v5  ;;  %v859_v44 = vpop.xlane.xlu1 %858  ;;  %v862_v58 = vpop.xlane.xlu0 %861  ;;  %v1198_v6 = vmul.f32 %v6325_v32, %v7294_v0  ;;  %2676 = vperm.xlu1 %5875, %v1850_v54   ;;  %v1338_v54 = vadd.f32 %v7665_v31, %v1267_v28 }
 0x161   : > { %6338 = vrsqrt.f32 %v1077_v26  ;;  %v1015_v55 = vmul.f32 0.03125, %v859_v44  ;;  %v1016_v50 = vmul.f32 0.03125, %v862_v58  ;;  %v1398_v40 = vpack.c.bf16 %v1337_v62, %v1336_v24  ;;  %2681 = vperm.xlu0 %5874, %v1851_v7   ;;  %v1854_v26 = vld [vmem:[%s7642_s13 + $0x90] sm:$0xff] }
 0x162   : > { %v6327_v56 = vpop.eup %6326  ;;  %6340 = vrsqrt.f32 %v1078_v59  ;;  %v1268_v9 = vmul.f32 %v7656_v34, %v1197_v10  ;;  %v1269_v52 = vmul.f32 %v7656_v34, %v1198_v6  ;;  %v1855_v10 = vld [vmem:[%s7642_s13 + $0x98] sm:$0xff] }
 0x163   : > { %v6329_v43 = vpop.eup %6328  ;;  %v1079_v47 = vadd.f32 1e-05, %v1015_v55  ;;  %v1080_v45 = vadd.f32 1e-05, %v1016_v50  ;;  %5755 = vmatprep.mubr.msk.bf16.mxu0 %vm420_vm0, %v1398_v40  ;;  %v1199_v0 = vmul.f32 %v6327_v56, %v7297_v13 }
 0x164   : > { %v865_v60 = vpop.xlane.xlu1 %864  ;;  %v868_v42 = vpop.xlane.xlu0 %867  ;;  %v1339_v18 = vadd.f32 %v7665_v31, %v1268_v9  ;;  %v1200_v5 = vmul.f32 %v6329_v43, %v7306_v22  ;;  %2686 = vperm.xlu1 %5875, %v1852_v2   ;;  %v1340_v62 = vadd.f32 %v7665_v31, %v1269_v52 }
 0x165   : > { %6342 = vrsqrt.f32 %v1079_v47  ;;  %v1017_v24 = vmul.f32 0.03125, %v865_v60  ;;  %v1018_v7 = vmul.f32 0.03125, %v868_v42  ;;  %v1270_v32 = vmul.f32 %v7656_v34, %v1199_v0  ;;  %2691 = vperm.xlu0 %5874, %v1853_v51   ;;  %v1856_v51 = vld [vmem:[%s7642_s13 + $0xa0] sm:$0xff] }
 0x166   : > { %v6331_v59 = vpop.eup %6330  ;;  %6344 = vrsqrt.f32 %v1080_v45  ;;  %v1399_v13 = vpack.c.bf16 %v1339_v18, %v1338_v54  ;;  %v1271_v40 = vmul.f32 %v7656_v34, %v1200_v5  ;;  %v1857_v45 = vld [vmem:[%s7642_s13 + $0xa8] sm:$0xff] }
 0x167   : > { %v6333_v44 = vpop.eup %6332  ;;  %v1081_v58 = vadd.f32 1e-05, %v1017_v24  ;;  %v1082_v28 = vadd.f32 1e-05, %v1018_v7  ;;  %v1341_v22 = vadd.f32 %v7665_v31, %v1270_v32  ;;  %v1201_v6 = vmul.f32 %v6331_v59, %v7309_v17 }
 0x168   : > { %5756 = vmatmul.mubr.msk.bf16.gmra.mxu0 %vm420_vm0, %v1399_v13  ;;  %v871_v55 = vpop.xlane.xlu1 %870  ;;  %v874_v50 = vpop.xlane.xlu0 %873  ;;  %v1202_v2 = vmul.f32 %v6333_v44, %v7318_v63  ;;  %2696 = vperm.xlu1 %5875, %v1854_v26   ;;  %v1342_v5 = vadd.f32 %v7665_v31, %v1271_v40  ;;  %v1858_v13 = vld [vmem:[%s7642_s13 + $0xb0] sm:$0xff]  ;;  %v1859_v44 = vld [vmem:[%s7642_s13 + $0xb8] sm:$0xff] }
 0x169   : > { %6346 = vrsqrt.f32 %v1081_v58  ;;  %v1019_v56 = vmul.f32 0.03125, %v871_v55  ;;  %v1020_v9 = vmul.f32 0.03125, %v874_v50  ;;  %v1400_v52 = vpack.c.bf16 %v1341_v22, %v1340_v62  ;;  %2701 = vperm.xlu0 %5874, %v1855_v10  }
 0x16a   : > { %v6335_v43 = vpop.eup %6334  ;;  %6348 = vrsqrt.f32 %v1082_v28  ;;  %v1272_v17 = vmul.f32 %v7656_v34, %v1201_v6  ;;  %v1273_v47 = vmul.f32 %v7656_v34, %v1202_v2 }
 0x16b   : > { %v6337_v0 = vpop.eup %6336  ;;  %v1083_v60 = vadd.f32 1e-05, %v1019_v56  ;;  %v1084_v42 = vadd.f32 1e-05, %v1020_v9  ;;  %5759 = vmatprep.mubr.msk.bf16.mxu0 %vm420_vm0, %v1400_v52  ;;  %v1203_v63 = vmul.f32 %v6335_v43, %v7321_v21 }
 0x16c   : > { %v877_v54 = vpop.xlane.xlu1 %876  ;;  %v880_v18 = vpop.xlane.xlu0 %879  ;;  %v1343_v24 = vadd.f32 %v7665_v31, %v1272_v17  ;;  %v1204_v7 = vmul.f32 %v6337_v0, %v7330_v46  ;;  %2706 = vperm.xlu1 %5875, %v1856_v51   ;;  %v1344_v10 = vadd.f32 %v7665_v31, %v1273_v47  ;;  %v1860_v51 = vld [vmem:[%s7642_s13 + $0xc0] sm:$0xff]  ;;  %v1861_v47 = vld [vmem:[%s7642_s13 + $0xc8] sm:$0xff] }
 0x16d   : > { %6350 = vrsqrt.f32 %v1083_v60  ;;  %v1021_v32 = vmul.f32 0.03125, %v877_v54  ;;  %v1022_v26 = vmul.f32 0.03125, %v880_v18  ;;  %v1274_v59 = vmul.f32 %v7656_v34, %v1203_v63  ;;  %2711 = vperm.xlu0 %5874, %v1857_v45  }
 0x16e   : > { %v6339_v62 = vpop.eup %6338  ;;  %6352 = vrsqrt.f32 %v1084_v42  ;;  %v1401_v21 = vpack.c.bf16 %v1343_v24, %v1342_v5  ;;  %v1275_v40 = vmul.f32 %v7656_v34, %v1204_v7 }
 0x16f   : > { %v6341_v58 = vpop.eup %6340  ;;  %v1085_v28 = vadd.f32 1e-05, %v1021_v32  ;;  %v1086_v22 = vadd.f32 1e-05, %v1022_v26  ;;  %v1345_v46 = vadd.f32 %v7665_v31, %v1274_v59  ;;  %v1205_v6 = vmul.f32 %v6339_v62, %v7333_v25  ;;  %v1862_v26 = vld [vmem:[%s7642_s13 + $0xd0] sm:$0xff]  ;;  %v1863_v62 = vld [vmem:[%s7642_s13 + $0xd8] sm:$0xff] }
 0x170   : > { %5760 = vmatmul.mubr.msk.bf16.gmra.mxu0 %vm420_vm0, %v1401_v21  ;;  %v883_v55 = vpop.xlane.xlu1 %882  ;;  %v886_v50 = vpop.xlane.xlu0 %885  ;;  %v1206_v2 = vmul.f32 %v6341_v58, %v7342_v14  ;;  %2716 = vperm.xlu1 %5875, %v1858_v13   ;;  %v1346_v54 = vadd.f32 %v7665_v31, %v1275_v40 }
 0x171   : > { %6354 = vrsqrt.f32 %v1085_v28  ;;  %v1023_v56 = vmul.f32 0.03125, %v883_v55  ;;  %v1024_v9 = vmul.f32 0.03125, %v886_v50  ;;  %v1402_v52 = vpack.c.bf16 %v1345_v46, %v1344_v10  ;;  %2721 = vperm.xlu0 %5874, %v1859_v44  }
 0x172   : > { %v6343_v43 = vpop.eup %6342  ;;  %6356 = vrsqrt.f32 %v1086_v22  ;;  %v1276_v25 = vmul.f32 %v7656_v34, %v1205_v6  ;;  %v1277_v17 = vmul.f32 %v7656_v34, %v1206_v2  ;;  %v1864_v2 = vld [vmem:[%s7642_s13 + $0xe0] sm:$0xff] }
 0x173   : > { %v6345_v45 = vpop.eup %6344  ;;  %v1087_v0 = vadd.f32 1e-05, %v1023_v56  ;;  %v1088_v60 = vadd.f32 1e-05, %v1024_v9  ;;  %5763 = vmatprep.mubr.msk.bf16.mxu0 %vm420_vm0, %v1402_v52  ;;  %v1207_v14 = vmul.f32 %v6343_v43, %v7345_v29  ;;  %v1865_v52 = vld [vmem:[%s7642_s13 + $0xe8] sm:$0xff] }
 0x174   : > { %v889_v42 = vpop.xlane.xlu1 %888  ;;  %v892_v63 = vpop.xlane.xlu0 %891  ;;  %v1347_v18 = vadd.f32 %v7665_v31, %v1276_v25  ;;  %v1208_v5 = vmul.f32 %v6345_v45, %v7354_v8  ;;  %2726 = vperm.xlu1 %5875, %v1860_v51   ;;  %v1348_v13 = vadd.f32 %v7665_v31, %v1277_v17 }
 0x175   : > { %6358 = vrsqrt.f32 %v1087_v0  ;;  %v1025_v24 = vmul.f32 0.03125, %v889_v42  ;;  %v1026_v7 = vmul.f32 0.03125, %v892_v63  ;;  %v1278_v32 = vmul.f32 %v7656_v34, %v1207_v14  ;;  %2731 = vperm.xlu0 %5874, %v1861_v47  }
 0x176   : > { %v6347_v59 = vpop.eup %6346  ;;  %6360 = vrsqrt.f32 %v1088_v60  ;;  %v1403_v29 = vpack.c.bf16 %v1347_v18, %v1346_v54  ;;  %v1279_v46 = vmul.f32 %v7656_v34, %v1208_v5  ;;  %v1866_v54 = vld [vmem:[%s7642_s13 + $0xf0] sm:$0xff] }
 0x177   : > { %v6349_v21 = vpop.eup %6348  ;;  %v1089_v10 = vadd.f32 1e-05, %v1025_v24  ;;  %v1090_v44 = vadd.f32 1e-05, %v1026_v7  ;;  %v1349_v8 = vadd.f32 %v7665_v31, %v1278_v32  ;;  %v1209_v58 = vmul.f32 %v6347_v59, %v7357_v33  ;;  %v1867_v24 = vld [vmem:[%s7642_s13 + $0xf8] sm:$0xff]  ;;  %v9725_v59 = vld [vmem:[#allocation23_spill] sm:$0xff] }
 0x178   : > { %5764 = vmatmul.mubr.msk.bf16.gmra.mxu0 %vm420_vm0, %v1403_v29  ;;  %v895_v28 = vpop.xlane.xlu1 %894  ;;  %v898_v22 = vpop.xlane.xlu0 %897  ;;  %v1210_v6 = vmul.f32 %v6349_v21, %v7366_v12  ;;  %2736 = vperm.xlu1 %5875, %v1862_v26   ;;  %v1350_v45 = vadd.f32 %v7665_v31, %v1279_v46 }
 0x179   : > { %6362 = vrsqrt.f32 %v1089_v10  ;;  %v1027_v55 = vmul.f32 0.03125, %v895_v28  ;;  %v1028_v50 = vmul.f32 0.03125, %v898_v22  ;;  %v1404_v40 = vpack.c.bf16 %v1349_v8, %v1348_v13  ;;  %2741 = vperm.xlu0 %5874, %v1863_v62   ;;  %v1868_v28 = vld [vmem:[%s7642_s13 + $0x100] sm:$0xff] }
 0x17a   : > { %v6351_v56 = vpop.eup %6350  ;;  %6364 = vrsqrt.f32 %v1090_v44  ;;  %v1280_v33 = vmul.f32 %v7656_v34, %v1209_v58  ;;  %v1281_v9 = vmul.f32 %v7656_v34, %v1210_v6 }
 0x17b   : > { %v6353_v51 = vpop.eup %6352  ;;  %v1091_v43 = vadd.f32 1e-05, %v1027_v55  ;;  %v1092_v25 = vadd.f32 1e-05, %v1028_v50  ;;  %5767 = vmatprep.mubr.msk.bf16.mxu0 %vm420_vm0, %v1404_v40  ;;  %v1211_v12 = vmul.f32 %v6351_v56, %v7369_v37  ;;  %v1869_v55 = vld [vmem:[%s7642_s13 + $0x108] sm:$0xff] }
 0x17c   : > { %v901_v17 = vpop.xlane.xlu1 %900  ;;  %v904_v47 = vpop.xlane.xlu0 %903  ;;  %v1351_v0 = vadd.f32 %v7665_v31, %v1280_v33  ;;  %v1212_v60 = vmul.f32 %v6353_v51, %v7381_v16  ;;  %2746 = vperm.xlu1 %5875, %v1864_v2   ;;  %v1352_v5 = vadd.f32 %v7665_v31, %v1281_v9 }
 0x17d   : > { %6366 = vrsqrt.f32 %v1091_v43  ;;  %v1029_v14 = vmul.f32 0.03125, %v901_v17  ;;  %v1030_v42 = vmul.f32 0.03125, %v904_v47  ;;  %v1282_v63 = vmul.f32 %v7656_v34, %v1211_v12  ;;  %2751 = vperm.xlu0 %5874, %v1865_v52   ;;  %v1870_v17 = vld [vmem:[%s7642_s13 + $0x110] sm:$0xff] }
 0x17e   : > { %v6355_v18 = vpop.eup %6354  ;;  %6368 = vrsqrt.f32 %v1092_v25  ;;  %v1405_v37 = vpack.c.bf16 %v1351_v0, %v1350_v45  ;;  %v1283_v21 = vmul.f32 %v7656_v34, %v1212_v60  ;;  %v1871_v0 = vld [vmem:[%s7642_s13 + $0x118] sm:$0xff] }
 0x17f   : > { %v6357_v7 = vpop.eup %6356  ;;  %v1093_v32 = vadd.f32 1e-05, %v1029_v14  ;;  %v1094_v26 = vadd.f32 1e-05, %v1030_v42  ;;  %v1353_v16 = vadd.f32 %v7665_v31, %v1282_v63  ;;  %v1213_v29 = vmul.f32 %v6355_v18, %v9725_v59 }
 0x180   : > { %5768 = vmatmul.mubr.msk.bf16.gmra.mxu0 %vm420_vm0, %v1405_v37  ;;  %v907_v13 = vpop.xlane.xlu1 %906  ;;  %v910_v62 = vpop.xlane.xlu0 %909  ;;  %v1214_v10 = vmul.f32 %v6357_v7, %v7396_v15  ;;  %2756 = vperm.xlu1 %5875, %v1866_v54   ;;  %v1354_v9 = vadd.f32 %v7665_v31, %v1283_v21 }
 0x181   : > { %6370 = vrsqrt.f32 %v1093_v32  ;;  %v1031_v44 = vmul.f32 0.03125, %v907_v13  ;;  %v1032_v8 = vmul.f32 0.03125, %v910_v62  ;;  %v1406_v58 = vpack.c.bf16 %v1353_v16, %v1352_v5  ;;  %2761 = vperm.xlu0 %5874, %v1867_v24  }
 0x182   : > { %v6359_v22 = vpop.eup %6358  ;;  %6372 = vrsqrt.f32 %v1094_v26  ;;  %v1284_v46 = vmul.f32 %v7656_v34, %v1213_v29  ;;  %v1285_v6 = vmul.f32 %v7656_v34, %v1214_v10  ;;  %v1872_v26 = vld [vmem:[%s7642_s13 + $0x120] sm:$0xff]  ;;  %v1873_v29 = vld [vmem:[%s7642_s13 + $0x128] sm:$0xff] }
 0x183   : > { %v6361_v50 = vpop.eup %6360  ;;  %v1095_v40 = vadd.f32 1e-05, %v1031_v44  ;;  %v1096_v2 = vadd.f32 1e-05, %v1032_v8  ;;  %5771 = vmatprep.mubr.msk.bf16.mxu0 %vm420_vm0, %v1406_v58  ;;  %v1215_v15 = vmul.f32 %v6359_v22, %v7399_v20 }
 0x184   : > { %v913_v56 = vpop.xlane.xlu1 %912  ;;  %v916_v33 = vpop.xlane.xlu0 %915  ;;  %v1355_v52 = vadd.f32 %v7665_v31, %v1284_v46  ;;  %v1216_v51 = vmul.f32 %v6361_v50, %v7408_v30  ;;  %2766 = vperm.xlu1 %5875, %v1868_v28   ;;  %v1356_v45 = vadd.f32 %v7665_v31, %v1285_v6 }
 0x185   : > { %6374 = vrsqrt.f32 %v1095_v40  ;;  %v1033_v43 = vmul.f32 0.03125, %v913_v56  ;;  %v1034_v25 = vmul.f32 0.03125, %v916_v33  ;;  %v1286_v12 = vmul.f32 %v7656_v34, %v1215_v15  ;;  %2771 = vperm.xlu0 %5874, %v1869_v55   ;;  %v1874_v55 = vld [vmem:[%s7642_s13 + $0x130] sm:$0xff] }
 0x186   : > { %v6363_v47 = vpop.eup %6362  ;;  %6376 = vrsqrt.f32 %v1096_v2  ;;  %v1407_v20 = vpack.c.bf16 %v1355_v52, %v1354_v9  ;;  %v1287_v37 = vmul.f32 %v7656_v34, %v1216_v51  ;;  %v1875_v2 = vld [vmem:[%s7642_s13 + $0x138] sm:$0xff] }
 0x187   : > { %v6365_v60 = vpop.eup %6364  ;;  %v1097_v14 = vadd.f32 1e-05, %v1033_v43  ;;  %v1098_v42 = vadd.f32 1e-05, %v1034_v25  ;;  %v1357_v30 = vadd.f32 %v7665_v31, %v1286_v12  ;;  %v1217_v63 = vmul.f32 %v6363_v47, %v7411_v49 }
 0x188   : > { %5772 = vmatmul.mubr.msk.bf16.gmra.mxu0 %vm420_vm0, %v1407_v20  ;;  %v919_v54 = vpop.xlane.xlu1 %918  ;;  %v922_v18 = vpop.xlane.xlu0 %921  ;;  %v1218_v5 = vmul.f32 %v6365_v60, %v7420_v41  ;;  %2776 = vperm.xlu1 %5875, %v1870_v17   ;;  %v1358_v8 = vadd.f32 %v7665_v31, %v1287_v37  ;;  %v1876_v20 = vld [vmem:[%s7642_s13 + $0x140] sm:$0xff]  ;;  %v1877_v60 = vld [vmem:[%s7642_s13 + $0x148] sm:$0xff] }
 0x189   : > { %6378 = vrsqrt.f32 %v1097_v14  ;;  %v1035_v24 = vmul.f32 0.03125, %v919_v54  ;;  %v1036_v7 = vmul.f32 0.03125, %v922_v18  ;;  %v1408_v32 = vpack.c.bf16 %v1357_v30, %v1356_v45  ;;  %2781 = vperm.xlu0 %5874, %v1871_v0  }
 0x18a   : > { %v6367_v16 = vpop.eup %6366  ;;  %6380 = vrsqrt.f32 %v1098_v42  ;;  %v1288_v49 = vmul.f32 %v7656_v34, %v1217_v63  ;;  %v1289_v59 = vmul.f32 %v7656_v34, %v1218_v5 }
 0x18b   : > { %v6369_v13 = vpop.eup %6368  ;;  %v1099_v62 = vadd.f32 1e-05, %v1035_v24  ;;  %v1100_v21 = vadd.f32 1e-05, %v1036_v7  ;;  %5775 = vmatprep.mubr.msk.bf16.mxu0 %vm420_vm0, %v1408_v32  ;;  %v1219_v41 = vmul.f32 %v6367_v16, %v7423_v53 }
 0x18c   : > { %v925_v10 = vpop.xlane.xlu1 %924  ;;  %v928_v44 = vpop.xlane.xlu0 %927  ;;  %v1359_v58 = vadd.f32 %v7665_v31, %v1288_v49  ;;  %v1220_v28 = vmul.f32 %v6369_v13, %v7432_v1  ;;  %2786 = vperm.xlu1 %5875, %v1872_v26   ;;  %v1360_v40 = vadd.f32 %v7665_v31, %v1289_v59  ;;  %v1878_v26 = vld [vmem:[%s7642_s13 + $0x150] sm:$0xff]  ;;  %v1879_v59 = vld [vmem:[%s7642_s13 + $0x158] sm:$0xff] }
 0x18d   : > { %6382 = vrsqrt.f32 %v1099_v62  ;;  %v1037_v22 = vmul.f32 0.03125, %v925_v10  ;;  %v1038_v46 = vmul.f32 0.03125, %v928_v44  ;;  %v1290_v6 = vmul.f32 %v7656_v34, %v1219_v41  ;;  %2791 = vperm.xlu0 %5874, %v1873_v29  }
 0x18e   : > { %v6371_v50 = vpop.eup %6370  ;;  %6384 = vrsqrt.f32 %v1100_v21  ;;  %v1409_v53 = vpack.c.bf16 %v1359_v58, %v1358_v8  ;;  %v1291_v43 = vmul.f32 %v7656_v34, %v1220_v28 }
 0x18f   : > { %v6373_v15 = vpop.eup %6372  ;;  %v1101_v56 = vadd.f32 1e-05, %v1037_v22  ;;  %v1102_v33 = vadd.f32 1e-05, %v1038_v46  ;;  %v1361_v1 = vadd.f32 %v7665_v31, %v1290_v6  ;;  %v1221_v9 = vmul.f32 %v6371_v50, %v7435_v57  ;;  %v1880_v46 = vld [vmem:[%s7642_s13 + $0x160] sm:$0xff]  ;;  %v1881_v50 = vld [vmem:[%s7642_s13 + $0x168] sm:$0xff] }
 0x190   : > { %5776 = vmatmul.mubr.msk.bf16.gmra.mxu0 %vm420_vm0, %v1409_v53  ;;  %v931_v52 = vpop.xlane.xlu1 %930  ;;  %v934_v51 = vpop.xlane.xlu0 %933  ;;  %v1222_v25 = vmul.f32 %v6373_v15, %v7444_v36  ;;  %2796 = vperm.xlu1 %5875, %v1874_v55   ;;  %v1362_v18 = vadd.f32 %v7665_v31, %v1291_v43 }
 0x191   : > { %6386 = vrsqrt.f32 %v1101_v56  ;;  %v1039_v12 = vmul.f32 0.03125, %v931_v52  ;;  %v1040_v17 = vmul.f32 0.03125, %v934_v51  ;;  %v1410_v47 = vpack.c.bf16 %v1361_v1, %v1360_v40  ;;  %2801 = vperm.xlu0 %5874, %v1875_v2  }
 0x192   : > { %v6375_v45 = vpop.eup %6374  ;;  %6388 = vrsqrt.f32 %v1102_v33  ;;  %v1292_v57 = vmul.f32 %v7656_v34, %v1221_v9  ;;  %v1293_v0 = vmul.f32 %v7656_v34, %v1222_v25  ;;  %v1882_v25 = vld [vmem:[%s7642_s13 + $0x170] sm:$0xff] }
 0x193   : > { %v6377_v14 = vpop.eup %6376  ;;  %v1103_v42 = vadd.f32 1e-05, %v1039_v12  ;;  %v1104_v30 = vadd.f32 1e-05, %v1040_v17  ;;  %5779 = vmatprep.mubr.msk.bf16.mxu0 %vm420_vm0, %v1410_v47  ;;  %v1223_v36 = vmul.f32 %v6375_v45, %v7447_v61  ;;  %v1883_v47 = vld [vmem:[%s7642_s13 + $0x178] sm:$0xff] }
 0x194   : > { %v937_v63 = vpop.xlane.xlu1 %936  ;;  %v940_v54 = vpop.xlane.xlu0 %939  ;;  %v1363_v37 = vadd.f32 %v7665_v31, %v1292_v57  ;;  %v1224_v5 = vmul.f32 %v6377_v14, %v7456_v38  ;;  %2806 = vperm.xlu1 %5875, %v1876_v20   ;;  %v1364_v49 = vadd.f32 %v7665_v31, %v1293_v0 }
 0x195   : > { %6390 = vrsqrt.f32 %v1103_v42  ;;  %v1041_v24 = vmul.f32 0.03125, %v937_v63  ;;  %v1042_v7 = vmul.f32 0.03125, %v940_v54  ;;  %v1294_v32 = vmul.f32 %v7656_v34, %v1223_v36  ;;  %2811 = vperm.xlu0 %5874, %v1877_v60  }
 0x196   : > { %v6379_v16 = vpop.eup %6378  ;;  %6392 = vrsqrt.f32 %v1104_v30  ;;  %v1411_v61 = vpack.c.bf16 %v1363_v37, %v1362_v18  ;;  %v1295_v44 = vmul.f32 %v7656_v34, %v1224_v5  ;;  %v1884_v18 = vld [vmem:[%s7642_s13 + $0x180] sm:$0xff] }
 0x197   : > { %v6381_v29 = vpop.eup %6380  ;;  %v1105_v13 = vadd.f32 1e-05, %v1041_v24  ;;  %v1106_v62 = vadd.f32 1e-05, %v1042_v7  ;;  %v1365_v38 = vadd.f32 %v7665_v31, %v1294_v32  ;;  %v1225_v21 = vmul.f32 %v6379_v16, %v7459_v4  ;;  %v1885_v24 = vld [vmem:[%s7642_s13 + $0x188] sm:$0xff] }
 0x198   : > { %5780 = vmatmul.mubr.msk.bf16.gmra.mxu0 %vm420_vm0, %v1411_v61  ;;  %v943_v41 = vpop.xlane.xlu1 %942  ;;  %v946_v10 = vpop.xlane.xlu0 %945  ;;  %v1226_v8 = vmul.f32 %v6381_v29, %v7468_v39  ;;  %2816 = vperm.xlu1 %5875, %v1878_v26   ;;  %v1366_v33 = vadd.f32 %v7665_v31, %v1295_v44  ;;  %v1887_v44 = vld [vmem:[%s7642_s13 + $0x198] sm:$0xff] }
 0x199   : > { %6394 = vrsqrt.f32 %v1105_v13  ;;  %v1043_v58 = vmul.f32 0.03125, %v943_v41  ;;  %v1044_v28 = vmul.f32 0.03125, %v946_v10  ;;  %v1412_v22 = vpack.c.bf16 %v1365_v38, %v1364_v49  ;;  %2821 = vperm.xlu0 %5874, %v1879_v59  }
 0x19a   : > { %v6383_v6 = vpop.eup %6382  ;;  %6396 = vrsqrt.f32 %v1106_v62  ;;  %v1296_v4 = vmul.f32 %v7656_v34, %v1225_v21  ;;  %v1297_v55 = vmul.f32 %v7656_v34, %v1226_v8  ;;  %v1886_v21 = vld [vmem:[%s7642_s13 + $0x190] sm:$0xff] }
 0x19b   : > { %v6385_v53 = vpop.eup %6384  ;;  %v1107_v40 = vadd.f32 1e-05, %v1043_v58  ;;  %v1108_v2 = vadd.f32 1e-05, %v1044_v28  ;;  %5783 = vmatprep.mubr.msk.bf16.mxu1 %vm420_vm0, %v1412_v22  ;;  %v1227_v39 = vmul.f32 %v6383_v6, %v7471_v11 }
 0x19c   : > { %v949_v15 = vpop.xlane.xlu1 %948  ;;  %v952_v56 = vpop.xlane.xlu0 %951  ;;  %v1367_v1 = vadd.f32 %v7665_v31, %v1296_v4  ;;  %v1228_v9 = vmul.f32 %v6385_v53, %v7480_v19  ;;  %2826 = vperm.xlu1 %5875, %v1880_v46   ;;  %v1368_v17 = vadd.f32 %v7665_v31, %v1297_v55  ;;  %v9726_v55 = vld [vmem:[#allocation24_spill] sm:$0xff] }
 0x19d   : > { %6398 = vrsqrt.f32 %v1107_v40  ;;  %v1045_v52 = vmul.f32 0.03125, %v949_v15  ;;  %v1046_v51 = vmul.f32 0.03125, %v952_v56  ;;  %v1298_v43 = vmul.f32 %v7656_v34, %v1227_v39  ;;  %2831 = vperm.xlu0 %5874, %v1881_v50   ;;  %v1888_v39 = vld [vmem:[%s7642_s13 + $0x1a0] sm:$0xff] }
 0x19e   : > { %v6387_v12 = vpop.eup %6386  ;;  %6400 = vrsqrt.f32 %v1108_v2  ;;  %v1413_v11 = vpack.c.bf16 %v1367_v1, %v1366_v33  ;;  %v1299_v42 = vmul.f32 %v7656_v34, %v1228_v9  ;;  %v1889_v33 = vld [vmem:[%s7642_s13 + $0x1a8] sm:$0xff] }
 0x19f   : > { %v6389_v20 = vpop.eup %6388  ;;  %v1109_v45 = vadd.f32 1e-05, %v1045_v52  ;;  %v1110_v57 = vadd.f32 1e-05, %v1046_v51  ;;  %v1369_v19 = vadd.f32 %v7665_v31, %v1298_v43  ;;  %v1229_v0 = vmul.f32 %v6387_v12, %v7483_v23  ;;  %v9727_v51 = vld [vmem:[#allocation25_spill] sm:$0xff] }
 0x1a0   : > { %5784 = vmatmul.mubr.msk.bf16.vlgmr.msra.gmra.mxu1 %vm420_vm0, %v1413_v11  ;;  %v955_v60 = vpop.xlane.xlu1 %954  ;;  %v958_v14 = vpop.xlane.xlu0 %957  ;;  %v1230_v30 = vmul.f32 %v6389_v20, %v7492_v3  ;;  %2836 = vperm.xlu1 %5875, %v1882_v25   ;;  %v1370_v49 = vadd.f32 %v7665_v31, %v1299_v42 }
 0x1a1   : > { %6402 = vrsqrt.f32 %v1109_v45  ;;  %v1047_v36 = vmul.f32 0.03125, %v955_v60  ;;  %v1048_v63 = vmul.f32 0.03125, %v958_v14  ;;  %v1414_v54 = vpack.c.bf16 %v1369_v19, %v1368_v17  ;;  %2841 = vperm.xlu0 %5874, %v1883_v47   ;;  %v9728_v47 = vld [vmem:[#allocation26_spill] sm:$0xff] }
 0x1a2   : > { %v6391_v37 = vpop.eup %6390  ;;  %6404 = vrsqrt.f32 %v1110_v57  ;;  %v1300_v23 = vmul.f32 %v7656_v34, %v1229_v0  ;;  %v1301_v5 = vmul.f32 %v7656_v34, %v1230_v30  ;;  %v1890_v0 = vld [vmem:[%s7642_s13 + $0x1b0] sm:$0xff]  ;;  %v1891_v30 = vld [vmem:[%s7642_s13 + $0x1b8] sm:$0xff] }
 0x1a3   : > { %v6393_v7 = vpop.eup %6392  ;;  %v1111_v32 = vadd.f32 1e-05, %v1047_v36  ;;  %v1112_v26 = vadd.f32 1e-05, %v1048_v63  ;;  %5787 = vmatprep.mubr.msk.bf16.mxu1 %vm420_vm0, %v1414_v54  ;;  %v1231_v3 = vmul.f32 %v6391_v37, %v7495_v27  ;;  %v9729_v37 = vld [vmem:[#allocation27_spill] sm:$0xff] }
 0x1a4   : > { %v961_v16 = vpop.xlane.xlu1 %960  ;;  %v964_v61 = vpop.xlane.xlu0 %963  ;;  %v1371_v59 = vadd.f32 %v7665_v31, %v1300_v23  ;;  %v1232_v29 = vmul.f32 %v6393_v7, %v7504_v48  ;;  %2846 = vperm.xlu1 %5875, %v1884_v18   ;;  %v1372_v10 = vadd.f32 %v7665_v31, %v1301_v5 }
 0x1a5   : > { %6406 = vrsqrt.f32 %v1111_v32  ;;  %v1049_v13 = vmul.f32 0.03125, %v961_v16  ;;  %v1050_v62 = vmul.f32 0.03125, %v964_v61  ;;  %v1302_v38 = vmul.f32 %v7656_v34, %v1231_v3  ;;  %2851 = vperm.xlu0 %5874, %v1885_v24   ;;  %v7875_v24 = vld [vmem:[%s9723_s2] ss:$0 sm:$0xff]  ;;  %v9730_v32 = vld [vmem:[#allocation28_spill] sm:$0xff] }
 0x1a6   : > { %v6395_v41 = vpop.eup %6394  ;;  %6408 = vrsqrt.f32 %v1112_v26  ;;  %v1415_v27 = vpack.c.bf16 %v1371_v59, %v1370_v49  ;;  %v1303_v4 = vmul.f32 %v7656_v34, %v1232_v29  ;;  %v1892_v61 = vld [vmem:[%s7642_s13 + $0x1c0] sm:$0xff] }
 0x1a7   : > { %v6397_v8 = vpop.eup %6396  ;;  %v1113_v58 = vadd.f32 1e-05, %v1049_v13  ;;  %v1114_v28 = vadd.f32 1e-05, %v1050_v62  ;;  %v1373_v48 = vadd.f32 %v7665_v31, %v1302_v38  ;;  %v1233_v22 = vmul.f32 %v6395_v41, %v7507_v35  ;;  %v1893_v13 = vld [vmem:[%s7642_s13 + $0x1c8] sm:$0xff]  ;;  %v9731_v41 = vld [vmem:[#allocation29_spill] sm:$0xff] }
 0x1a8   : > { %5788 = vmatmul.mubr.msk.bf16.gmra.mxu1 %vm420_vm0, %v1415_v27  ;;  %v967_v46 = vpop.xlane.xlu1 %966  ;;  %v970_v6 = vpop.xlane.xlu0 %969  ;;  %v1234_v50 = vmul.f32 %v6397_v8, %v9726_v55  ;;  %2856 = vperm.xlu1 %5875, %v1886_v21   ;;  %v1374_v11 = vadd.f32 %v7665_v31, %v1303_v4  ;;  %v7888_v8 = vld [vmem:[%s9556_s3] ss:$0 sm:$0xff]  ;;  %v1894_v55 = vld [vmem:[%s7642_s13 + $0x1d0] sm:$0xff] }
 0x1a9   : > { %6410 = vrsqrt.f32 %v1113_v58  ;;  %v1051_v53 = vmul.f32 0.03125, %v967_v46  ;;  %v1052_v40 = vmul.f32 0.03125, %v970_v6  ;;  %v1416_v2 = vpack.c.bf16 %v1373_v48, %v1372_v10  ;;  %2861 = vperm.xlu0 %5874, %v1887_v44   ;;  %v9732_v48 = vld [vmem:[#allocation9_spill] sm:$0xff] }
 0x1aa   : > { %v6399_v15 = vpop.eup %6398  ;;  %6412 = vrsqrt.f32 %v1114_v28  ;;  %v1304_v35 = vmul.f32 %v7656_v34, %v1233_v22  ;;  %v1305_v56 = vmul.f32 %v7656_v34, %v1234_v50 }
 0x1ab   : > { %v6401_v1 = vpop.eup %6400  ;;  %v1115_v9 = vadd.f32 1e-05, %v1051_v53  ;;  %v1116_v52 = vadd.f32 1e-05, %v1052_v40  ;;  %5791 = vmatprep.mubr.msk.bf16.mxu1 %vm420_vm0, %v1416_v2  ;;  %v1235_v43 = vmul.f32 %v6399_v15, %v9727_v51  ;;  %v1895_v2 = vld [vmem:[%s7642_s13 + $0x1d8] sm:$0xff] }
 0x1ac   : > { %v973_v25 = vpop.xlane.xlu1 %972  ;;  %v976_v12 = vpop.xlane.xlu0 %975  ;;  %v1375_v17 = vadd.f32 %v7665_v31, %v1304_v35  ;;  %v1236_v20 = vmul.f32 %v6401_v1, %v9728_v47  ;;  %2866 = vperm.xlu1 %5875, %v1888_v39   ;;  %v1376_v42 = vadd.f32 %v7665_v31, %v1305_v56  ;;  %v1896_v47 = vld [vmem:[%s7642_s13 + $0x1e0] sm:$0xff] }
 0x1ad   : > { %6414 = vrsqrt.f32 %v1115_v9  ;;  %v1053_v45 = vmul.f32 0.03125, %v973_v25  ;;  %v1054_v57 = vmul.f32 0.03125, %v976_v12  ;;  %v1306_v19 = vmul.f32 %v7656_v34, %v1235_v43  ;;  %2871 = vperm.xlu0 %5874, %v1889_v33   ;;  %v9733_v33 = vld [vmem:[#allocation10_spill] sm:$0xff]  ;;  %v9734_v43 = vld [vmem:[#allocation11_spill] sm:$0xff] }
 0x1ae   : > { %v6403_v60 = vpop.eup %6402  ;;  %6416 = vrsqrt.f32 %v1116_v52  ;;  %v1417_v14 = vpack.c.bf16 %v1375_v17, %v1374_v11  ;;  %v1307_v7 = vmul.f32 %v7875_v24, %v1236_v20 }
 0x1af   : > { %v6405_v36 = vpop.eup %6404  ;;  %v1117_v63 = vadd.f32 1e-05, %v1053_v45  ;;  %v1118_v54 = vadd.f32 1e-05, %v1054_v57  ;;  %v1377_v18 = vadd.f32 %v7665_v31, %v1306_v19  ;;  %v1237_v23 = vmul.f32 %v6403_v60, %v9729_v37  ;;  %v1897_v19 = vld [vmem:[%s7642_s13 + $0x1e8] sm:$0xff] }
 0x1b0   : > { %5792 = vmatmul.mubr.msk.bf16.gmra.mxu1 %vm420_vm0, %v1417_v14  ;;  %v979_v5 = vpop.xlane.xlu1 %978  ;;  %v982_v34 = vpop.xlane.xlu0 %981  ;;  %v1238_v26 = vmul.f32 %v6405_v36, %v9730_v32  ;;  %2876 = vperm.xlu1 %5875, %v1890_v0   ;;  %v1378_v58 = vadd.f32 %v7888_v8, %v1307_v7 }
 0x1b1   : > { %6418 = vrsqrt.f32 %v1117_v63  ;;  %v1055_v3 = vmul.f32 0.03125, %v979_v5  ;;  %v1056_v31 = vmul.f32 0.03125, %v982_v34  ;;  %v1418_v16 = vpack.c.bf16 %v1377_v18, %v1376_v42  ;;  %2881 = vperm.xlu0 %5874, %v1891_v30   ;;  %v9735_v42 = vld [vmem:[#allocation12_spill] sm:$0xff]  ;;  %v9736_v18 = vld [vmem:[#allocation13_spill] sm:$0xff]  ;;  %v1898_v34 = vld [vmem:[%s7642_s13 + $0x1f0] sm:$0xff] }
 0x1b2   : > { %v6407_v49 = vpop.eup %6406  ;;  %6420 = vrsqrt.f32 %v1118_v54  ;;  %v1308_v59 = vmul.f32 %v7875_v24, %v1237_v23  ;;  %v1309_v29 = vmul.f32 %v7875_v24, %v1238_v26 }
 0x1b3   : > { %v6409_v62 = vpop.eup %6408  ;;  %v1119_v38 = vadd.f32 1e-05, %v1055_v3  ;;  %v1120_v21 = vadd.f32 1e-05, %v1056_v31  ;;  %5795 = vmatprep.mubr.msk.bf16.mxu1 %vm420_vm0, %v1418_v16  ;;  %v1239_v27 = vmul.f32 %v6407_v49, %v9731_v41  ;;  %v1899_v3 = vld [vmem:[%s7642_s13 + $0x1f8] sm:$0xff]  ;;  %v9737_v49 = vld [vmem:[#allocation14_spill] sm:$0xff] }
 0x1b4   : > { %v985_v10 = vpop.xlane.xlu1 %984  ;;  %v988_v44 = vpop.xlane.xlu0 %987  ;;  %v1379_v28 = vadd.f32 %v7888_v8, %v1308_v59  ;;  %v1240_v22 = vmul.f32 %v6409_v62, %v9732_v48  ;;  %2886 = vperm.xlu1 %5875, %v1892_v61   ;;  %v1380_v40 = vadd.f32 %v7888_v8, %v1309_v29  ;;  %s9666_s13 = smov 64  }
 0x1b5   : > { %6422 = vrsqrt.f32 %v1119_v38  ;;  %v1057_v46 = vmul.f32 0.03125, %v985_v10  ;;  %v1058_v6 = vmul.f32 0.03125, %v988_v44  ;;  %v1310_v4 = vmul.f32 %v7875_v24, %v1239_v27  ;;  %2891 = vperm.xlu0 %5874, %v1893_v13   ;;  %v9738_v13 = vld [vmem:[#allocation15_spill] sm:$0xff] }
 0x1b6   : > { %v6411_v50 = vpop.eup %6410  ;;  %6424 = vrsqrt.f32 %v1120_v21  ;;  %v1419_v53 = vpack.c.bf16 %v1379_v28, %v1378_v58  ;;  %v1311_v51 = vmul.f32 %v7875_v24, %v1240_v22  ;;  %v9739_v58 = vld [vmem:[#allocation16_spill] sm:$0xff]  ;;  %v9740_v22 = vld [vmem:[#allocation17_spill] sm:$0xff] }
 0x1b7   : > { %v6413_v39 = vpop.eup %6412  ;;  %v1121_v15 = vadd.f32 1e-05, %v1057_v46  ;;  %v1122_v35 = vadd.f32 1e-05, %v1058_v6  ;;  %v1381_v56 = vadd.f32 %v7888_v8, %v1310_v4  ;;  %v1241_v1 = vmul.f32 %v6411_v50, %v9733_v33 }
 0x1b8   : > { %5796 = vmatmul.mubr.msk.bf16.gmra.mxu1 %vm420_vm0, %v1419_v53  ;;  %v991_v9 = vpop.xlane.xlu1 %990  ;;  %v994_v52 = vpop.xlane.xlu0 %993  ;;  %v1242_v25 = vmul.f32 %v6413_v39, %v9734_v43  ;;  %2896 = vperm.xlu1 %5875, %v1894_v55   ;;  %v1382_v63 = vadd.f32 %v7888_v8, %v1311_v51 }
 0x1b9   : > { %6426 = vrsqrt.f32 %v1121_v15  ;;  %v1059_v12 = vmul.f32 0.03125, %v991_v9  ;;  %v1060_v11 = vmul.f32 0.03125, %v994_v52  ;;  %v1420_v17 = vpack.c.bf16 %v1381_v56, %v1380_v40  ;;  %2901 = vperm.xlu0 %5874, %v1895_v2   ;;  %v9741_v2 = vld [vmem:[#allocation18_spill] sm:$0xff] }
 0x1ba   : > { %v6415_v20 = vpop.eup %6414  ;;  %6428 = vrsqrt.f32 %v1122_v35  ;;  %v1312_v45 = vmul.f32 %v7875_v24, %v1241_v1  ;;  %v1313_v57 = vmul.f32 %v7875_v24, %v1242_v25  ;;  %v9742_v35 = vld [vmem:[#allocation19_spill] sm:$0xff]  ;;  %v9743_v25 = vld [vmem:[#allocation20_spill] sm:$0xff] }
 0x1bb   : > { %v6417_v0 = vpop.eup %6416  ;;  %v1123_v60 = vadd.f32 1e-05, %v1059_v12  ;;  %v1124_v14 = vadd.f32 1e-05, %v1060_v11  ;;  %5799 = vmatprep.mubr.msk.bf16.mxu1 %vm420_vm0, %v1420_v17  ;;  %v1243_v30 = vmul.f32 %v6415_v20, %v9735_v42  ;;  %v9744_v17 = vld [vmem:[#allocation21_spill] sm:$0xff] }
 0x1bc   : > { %v997_v36 = vpop.xlane.xlu1 %996  ;;  %v1383_v54 = vadd.f32 %v7888_v8, %v1312_v45  ;;  %v1244_v37 = vmul.f32 %v6417_v0, %v9736_v18  ;;  %2906 = vperm.xlu1 %5875, %v1896_v47   ;;  %v1384_v26 = vadd.f32 %v7888_v8, %v1313_v57 }
 0x1bd   : > { %6430 = vrsqrt.f32 %v1123_v60  ;;  %v1061_v23 = vmul.f32 0.03125, %v997_v36  ;;  %v1314_v5 = vmul.f32 %v7875_v24, %v1243_v30  ;;  %2911 = vperm.xlu0 %5874, %v1897_v19   ;;  %v9745_v60 = vld [vmem:[#allocation30_spill] sm:$0xff] }
 0x1be   : > { %v6419_v7 = vpop.eup %6418  ;;  %6432 = vrsqrt.f32 %v1124_v14  ;;  %v1421_v32 = vpack.c.bf16 %v1383_v54, %v1382_v63  ;;  %v1315_v29 = vmul.f32 %v7875_v24, %v1244_v37 }
 0x1bf   : > { %v6421_v31 = vpop.eup %6420  ;;  %v1125_v16 = vadd.f32 1e-05, %v1061_v23  ;;  %v1385_v61 = vadd.f32 %v7888_v8, %v1314_v5  ;;  %v1245_v59 = vmul.f32 %v6419_v7, %v9737_v49 }
 0x1c0   : > { %5800 = vmatmul.mubr.msk.bf16.gmra.mxu1 %vm420_vm0, %v1421_v32  ;;  %v1246_v62 = vmul.f32 %v6421_v31, %v9738_v13  ;;  %2916 = vperm.xlu1 %5875, %v1898_v34   ;;  %v1386_v10 = vadd.f32 %v7888_v8, %v1315_v29  ;;  %v7952_v37 = vpop.permute.xlu1 %2611 }
 0x1c1   : > { %6434 = vrsqrt.f32 %v1125_v16  ;;  %v1422_v38 = vpack.c.bf16 %v1385_v61, %v1384_v26  ;;  %v1316_v21 = vmul.f32 %v7875_v24, %v1245_v59  ;;  %2921 = vperm.xlu0 %5874, %v1899_v3  }
 0x1c2   : > { %v6423_v41 = vpop.eup %6422  ;;  %v1317_v48 = vmul.f32 %v7875_v24, %v1246_v62  ;;  %v7983_v62 = vpop.permute.xlu0 %2606 }
 0x1c3   : > { %v6425_v27 = vpop.eup %6424  ;;  %5803 = vmatprep.mubr.msk.bf16.mxu1 %vm420_vm0, %v1422_v38  ;;  %v1387_v44 = vadd.f32 %v7888_v8, %v1316_v21  ;;  %v1247_v28 = vmul.f32 %v6423_v41, %v9739_v58 }
 0x1c4   : > { %v1248_v46 = vmul.f32 %v6425_v27, %v9740_v22  ;;  %v1388_v53 = vadd.f32 %v7888_v8, %v1317_v48  ;;  %v7954_v23 = vpop.permute.xlu1 %2616 }
 0x1c5   : > { %v1423_v6 = vpack.c.bf16 %v1387_v44, %v1386_v10  ;;  %v1318_v4 = vmul.f32 %v7875_v24, %v1247_v28 }
 0x1c6   : > { %v6427_v55 = vpop.eup %6426  ;;  %v1319_v15 = vmul.f32 %v7875_v24, %v1248_v46  ;;  %v7987_v21 = vpop.permute.xlu0 %2621 }
 0x1c7   : > { %v6429_v50 = vpop.eup %6428  ;;  %v1389_v40 = vadd.f32 %v7888_v8, %v1318_v4  ;;  %v1249_v39 = vmul.f32 %v6427_v55, %v9741_v2 }
 0x1c8   : > { %5804 = vmatmul.mubr.msk.bf16.gmra.mxu1 %vm420_vm0, %v1423_v6  ;;  %v1250_v56 = vmul.f32 %v6429_v50, %v9742_v35  ;;  %v1390_v51 = vadd.f32 %v7888_v8, %v1319_v15  ;;  %v7956_v5 = vpop.permute.xlu1 %2626 }
 0x1c9   : > { %v1424_v33 = vpack.c.bf16 %v1389_v40, %v1388_v53  ;;  %v1320_v1 = vmul.f32 %v7875_v24, %v1249_v39 }
 0x1ca   : > { %v6431_v9 = vpop.eup %6430  ;;  %v1321_v11 = vmul.f32 %v7875_v24, %v1250_v56  ;;  %v7991_v10 = vpop.permute.xlu0 %2631 }
 0x1cb   : > { %v6433_v52 = vpop.eup %6432  ;;  %5807 = vmatprep.mubr.msk.bf16.mxu1 %vm420_vm0, %v1424_v33  ;;  %v1391_v43 = vadd.f32 %v7888_v8, %v1320_v1  ;;  %v1251_v12 = vmul.f32 %v6431_v9, %v9743_v25 }
 0x1cc   : > { %v1252_v47 = vmul.f32 %v6433_v52, %v9744_v17  ;;  %v1392_v19 = vadd.f32 %v7888_v8, %v1321_v11  ;;  %v7958_v34 = vpop.permute.xlu1 %2636 }
 0x1cd   : > { %v1425_v20 = vpack.c.bf16 %v1391_v43, %v1390_v51  ;;  %v1322_v45 = vmul.f32 %v7875_v24, %v1251_v12 }
 0x1ce   : > { %v6435_v57 = vpop.eup %6434  ;;  %v1323_v42 = vmul.f32 %v7875_v24, %v1252_v47  ;;  %v7997_v28 = vpop.permute.xlu0 %2641 }
 0x1cf   : > { %v1393_v0 = vadd.f32 %v7888_v8, %v1322_v45  ;;  %v1253_v14 = vmul.f32 %v6435_v57, %v9745_v60 }
 0x1d0   : > { %5808 = vmatmul.mubr.msk.bf16.gmra.mxu1 %vm420_vm0, %v1425_v20  ;;  %v1394_v63 = vadd.f32 %v7888_v8, %v1323_v42  ;;  %v7960_v7 = vpop.permute.xlu1 %2646 }
 0x1d1   : > { %v1426_v30 = vpack.c.bf16 %v1393_v0, %v1392_v19  ;;  %v1324_v36 = vmul.f32 %v7875_v24, %v1253_v14  ;;  %9746 = vst [vmem:[#allocation22_spill] sm:$0xff] %v7960_v7 }
 0x1d2   : > { %v8001_v22 = vpop.permute.xlu0 %2651 }
 0x1d3   : > { %5811 = vmatprep.mubr.msk.bf16.mxu1 %vm420_vm0, %v1426_v30  ;;  %v1395_v54 = vadd.f32 %v7888_v8, %v1324_v36  ;;  %v7969_v8 = vld [vmem:[%s9558_s5] ss:$0 sm:$0xff]  ;;  %9756 = vst [vmem:[#allocation11_spill] sm:$0xff] %v8001_v22 }
 0x1d4   : > { %v7962_v24 = vpop.permute.xlu1 %2656 }
 0x1d5   : > { %v1427_v18 = vpack.c.bf16 %v1395_v54, %v1394_v63  ;;  %9747 = vst [vmem:[#allocation23_spill] sm:$0xff] %v7962_v24 }
 0x1d6   : > { %v8005_v6 = vpop.permute.xlu0 %2661 }
 0x1d7   : > { %9758 = vst [vmem:[#allocation13_spill] sm:$0xff] %v8005_v6 }
 0x1d8   : > { %5812 = vmatmul.mubr.msk.bf16.gmra.mxu1 %vm420_vm0, %v1427_v18  ;;  %v7964_v32 = vpop.permute.xlu1 %2666 }
 0x1da   : > { %v8009_v50 = vpop.permute.xlu0 %2671 }
 0x1dc   : > { %v7971_v3 = vpop.permute.xlu1 %2676 }
 0x1dd   : > { %9748 = vst [vmem:[#allocation24_spill] sm:$0xff] %v7971_v3 }
 0x1de   : > { %v8020_v56 = vpop.permute.xlu0 %2681 }
 0x1df   : > { %9761 = vst [vmem:[#allocation16_spill] sm:$0xff] %v8020_v56 }
 0x1e0   : > { %v7977_v61 = vpop.permute.xlu1 %2686 }
 0x1e1   : > { %9749 = vst [vmem:[#allocation25_spill] sm:$0xff] %v7977_v61 }
 0x1e2   : > { %v8036_v47 = vpop.permute.xlu0 %2691 }
 0x1e3   : > { %9766 = vst [vmem:[#allocation21_spill] sm:$0xff] %v8036_v47 }
 0x1e4   : > { %v7979_v49 = vpop.permute.xlu1 %2696 }
 0x1e5   : > { %9750 = vst [vmem:[#allocation26_spill] sm:$0xff] %v7979_v49 }
 0x1e6   : > { %v8044_v60 = vpop.permute.xlu0 %2701 }
 0x1e7   : > { %9768 = vst [vmem:[#allocation31_spill] sm:$0xff] %v8044_v60 }
 0x1e8   : > { %v7981_v29 = vpop.permute.xlu1 %2706 }
 0x1e9   : > { %9751 = vst [vmem:[#allocation27_spill] sm:$0xff] %v7981_v29 }
 0x1ec   : > { %v7985_v38 = vpop.permute.xlu1 %2716 }
 0x1ed   : > { %9752 = vst [vmem:[#allocation28_spill] sm:$0xff] %v7985_v38 }
 0x1f0   : > { %v7989_v41 = vpop.permute.xlu1 %2726 }
 0x1f1   : > { %9753 = vst [vmem:[#allocation29_spill] sm:$0xff] %v7989_v41 }
 0x1f4   : > { %v7994_v44 = vpop.permute.xlu1 %2736 }
 0x1f5   : > { %9754 = vst [vmem:[#allocation9_spill] sm:$0xff] %v7994_v44 }
 0x1f8   : > { %v7999_v48 = vpop.permute.xlu1 %2746 }
 0x1f9   : > { %9755 = vst [vmem:[#allocation10_spill] sm:$0xff] %v7999_v48 }
 0x1fc   : > { %v8003_v46 = vpop.permute.xlu1 %2756 }
 0x1fd   : > { %9757 = vst [vmem:[#allocation12_spill] sm:$0xff] %v8003_v46 }
 0x200   : > { %v8007_v55 = vpop.permute.xlu1 %2766 }
 0x201   : > { %9759 = vst [vmem:[#allocation14_spill] sm:$0xff] %v8007_v55 }
 0x204   : > { %v8014_v2 = vpop.permute.xlu1 %2776 }
 0x205   : > { %9760 = vst [vmem:[#allocation15_spill] sm:$0xff] %v8014_v2 }
 0x208   : > { %v8026_v52 = vpop.permute.xlu1 %2786 }
 0x209   : > { %9763 = vst [vmem:[#allocation18_spill] sm:$0xff] %v8026_v52 }
 0x20c   : > { %v8039_v57 = vpop.permute.xlu1 %2796 }
 0x20d   : > { %9767 = vst [vmem:[#allocation30_spill] sm:$0xff] %v8039_v57 }
 0x210   : > { %v8049_v30 = vpop.permute.xlu1 %2806 }
 0x211   : > { %9769 = vst [vmem:[#allocation32_spill] sm:$0xff] %v8049_v30 }
 0x220   : > { %v5753_v26 = vpop.f32.mrf.mxu0 }
 0x221   : > { %v7974_v31 = vadd.f32 %v5753_v26, %v7969_v8 }
 0x222   : > { %v1581_v4 = vpop.f32.mrf.mxu0 }
 0x223   : > { %v5313_v16 = vmul.f32 -1.442695, %v7974_v31  ;;  %v8012_v40 = vadd.f32 %v7969_v8, %v1581_v4  ;;  %v8061_v4 = vpop.permute.xlu1 %2816 }
 0x224   : > { %v5754_v53 = vpop.f32.mrf.mxu0  ;;  %9773 = vst [vmem:[#allocation36_spill] sm:$0xff] %v8061_v4 }
 0x225   : > { %6436 = vpow2.f32 %v5313_v16  ;;  %v8017_v39 = vadd.f32 %v5754_v53, %v7969_v8  ;;  %v5311_v15 = vmul.f32 -1.442695, %v8012_v40 }
 0x226   : > { %v1584_v12 = vpop.f32.mrf.mxu0 }
 0x227   : > { %v5314_v1 = vmul.f32 -1.442695, %v8017_v39  ;;  %v8047_v14 = vadd.f32 %v7969_v8, %v1584_v12 }
 0x228   : > { %v5757_v45 = vpop.f32.mrf.mxu0 }
 0x229   : > { %v8042_v0 = vadd.f32 %v5757_v45, %v7969_v8  ;;  %v5312_v26 = vmul.f32 -1.442695, %v8047_v14 }
 0x22b   : > { %v5317_v36 = vmul.f32 -1.442695, %v8042_v0 }
 0x232   : > { %v6437_v59 = vpop.eup %6436 }
 0x233   : > { %v2094_v13 = vadd.f32 1.0, %v6437_v59  ;;  %v8056_v59 = vpop.permute.xlu0 %2711 }
 0x234   : > { %9771 = vst [vmem:[#allocation34_spill] sm:$0xff] %v8056_v59 }
 0x235   : > { %6438 = vrcp.f32 %v2094_v13 }
 0x236   : > { %6440 = vpow2.f32 %v5311_v15 }
 0x242   : > { %v6439_v27 = vpop.eup %6438 }
 0x243   : > { %2352 = vrot.lane.b32.xlu1 %v6439_v27, %s6814_s12  ;;  %v5581_v58 = vpack.c.bf16 %v6439_v27, %v6439_v27  ;;  %v6441_v63 = vpop.eup %6440 }
 0x247   : > { %3184 = vrot.lane.b32.xlu1 %v5581_v58, %s9666_s13  ;;  %v2092_v58 = vadd.f32 1.0, %v6441_v63 }
 0x260   : > { %v5785_v35 = vpop.f32.mrf.mxu1 }
 0x261   : > { %v8023_v33 = vadd.f32 %v5785_v35, %v7969_v8 }
 0x262   : > { %v1709_v9 = vpop.f32.mrf.mxu1 }
 0x263   : > { %9762 = vst [vmem:[#allocation17_spill] sm:$0xff] %v8023_v33  ;;  %v5345_v51 = vmul.f32 -1.442695, %v8023_v33  ;;  %v8030_v43 = vadd.f32 %v7969_v8, %v1709_v9 }
 0x264   : > { %v5786_v25 = vpop.f32.mrf.mxu1 }
 0x265   : > { %9764 = vst [vmem:[#allocation19_spill] sm:$0xff] %v8030_v43  ;;  %6442 = vpow2.f32 %v5345_v51  ;;  %v5343_v11 = vmul.f32 -1.442695, %v8030_v43  ;;  %v8034_v17 = vadd.f32 %v5786_v25, %v7969_v8  ;;  %v8065_v25 = vpop.permute.xlu0 %2721 }
 0x266   : > { %6444 = vpow2.f32 %v5314_v1  ;;  %v1712_v19 = vpop.f32.mrf.mxu1  ;;  %v1597_v1 = vpop.f32.mrf.mxu0  ;;  %9774 = vst [vmem:[#allocation37_spill] sm:$0xff] %v8065_v25 }
 0x267   : > { %9765 = vst [vmem:[#allocation20_spill] sm:$0xff] %v8034_v17  ;;  %v5346_v20 = vmul.f32 -1.442695, %v8034_v17  ;;  %6446 = vpow2.f32 %v5343_v11  ;;  %v8059_v27 = vadd.f32 %v7969_v8, %v1712_v19  ;;  %v8070_v19 = vadd.f32 %v7969_v8, %v1597_v1 }
 0x268   : > { %v5789_v42 = vpop.f32.mrf.mxu1  ;;  %v5758_v11 = vpop.f32.mrf.mxu0 }
 0x269   : > { %6448 = vpow2.f32 %v5346_v20  ;;  %v8053_v54 = vadd.f32 %v5789_v42, %v7969_v8  ;;  %9772 = vst [vmem:[#allocation35_spill] sm:$0xff] %v8059_v27  ;;  %v5344_v9 = vmul.f32 -1.442695, %v8059_v27  ;;  %v8067_v20 = vpop.permute.xlu1 %2826  ;;  %v8075_v63 = vpop.permute.xlu0 %2731 }
 0x26a   : > { %6450 = vpow2.f32 %v5317_v36  ;;  %9775 = vst [vmem:[#allocation38_spill] sm:$0xff] %v8067_v20  ;;  %v1725_v42 = vpop.f32.mrf.mxu1  ;;  %v8073_v36 = vadd.f32 %v5758_v11, %v7969_v8  ;;  %9776 = vst [vmem:[#allocation39_spill] sm:$0xff] %v8075_v63  ;;  %v1600_v11 = vpop.f32.mrf.mxu0 }
 0x26b   : > { %9770 = vst [vmem:[#allocation33_spill] sm:$0xff] %v8053_v54  ;;  %v5349_v53 = vmul.f32 -1.442695, %v8053_v54 }
 0x272   : > { %v6443_v18 = vpop.eup %6442 }
 0x273   : > { %v6445_v16 = vpop.eup %6444  ;;  %v2126_v13 = vadd.f32 1.0, %v6443_v18  ;;  %v5315_v18 = vmul.f32 -1.442695, %v8070_v19 }
 0x274   : > { %v6447_v15 = vpop.eup %6446  ;;  %v2095_v35 = vadd.f32 1.0, %v6445_v16 }
 0x275   : > { %6452 = vrcp.f32 %v2126_v13  ;;  %v2124_v12 = vadd.f32 1.0, %v6447_v15  ;;  %v8078_v13 = vpop.permute.xlu1 %2836  ;;  %v5318_v15 = vmul.f32 -1.442695, %v8073_v36 }
 0x276   : > { %6454 = vpow2.f32 %v5312_v26  ;;  %v6449_v51 = vpop.eup %6448  ;;  %v5790_v26 = vpop.f32.mrf.mxu1  ;;  %9777 = vst [vmem:[#allocation40_spill] sm:$0xff] %v8078_v13 }
 0x277   : > { %6456 = vrcp.f32 %v2092_v58  ;;  %v2127_v45 = vadd.f32 1.0, %v6449_v51  ;;  %v6451_v16 = vpop.eup %6450  ;;  %v8081_v58 = vadd.f32 %v7969_v8, %v1725_v42  ;;  %v8085_v1 = vadd.f32 %v5790_v26, %v7969_v8 }
 0x278   : > { %6458 = vpow2.f32 %v5349_v53  ;;  %v2098_v51 = vadd.f32 1.0, %v6451_v16 }
 0x279   : > { %6460 = vrcp.f32 %v2095_v35  ;;  %9778 = vst [vmem:[#allocation41_spill] sm:$0xff] %v8081_v58  ;;  %9779 = vst [vmem:[#allocation42_spill] sm:$0xff] %v8085_v1  ;;  %v5347_v13 = vmul.f32 -1.442695, %v8081_v58  ;;  %v8092_v30 = vpop.permute.xlu1 %2846  ;;  %v5350_v26 = vmul.f32 -1.442695, %v8085_v1 }
 0x27a   : > { %6462 = vpow2.f32 %v5344_v9  ;;  %9781 = vst [vmem:[#allocation44_spill] sm:$0xff] %v8092_v30 }
 0x27b   : > { %6464 = vrcp.f32 %v2124_v12 }
 0x27c   : > { %6466 = vrcp.f32 %v2127_v45  ;;  %v8088_v45 = vpop.permute.xlu0 %2741 }
 0x27d   : > { %6468 = vpow2.f32 %v5315_v18  ;;  %9780 = vst [vmem:[#allocation43_spill] sm:$0xff] %v8088_v45  ;;  %v5761_v18 = vpop.f32.mrf.mxu0  ;;  %v8103_v58 = vpop.permute.xlu1 %2856 }
 0x27e   : > { %6470 = vpow2.f32 %v5318_v15  ;;  %v8101_v30 = vadd.f32 %v5761_v18, %v7969_v8  ;;  %9784 = vst [vmem:[#allocation47_spill] sm:$0xff] %v8103_v58 }
 0x27f   : > { %6472 = vrcp.f32 %v2098_v51  ;;  %v1613_v57 = vpop.f32.mrf.mxu0 }
 0x280   : > { %6474 = vpow2.f32 %v5347_v13  ;;  %v8097_v48 = vpop.permute.xlu0 %2751  ;;  %9783 = vst [vmem:[#allocation46_spill] sm:$0xff] %v8101_v30 }
 0x281   : > { %9782 = vst [vmem:[#allocation45_spill] sm:$0xff] %v8097_v48 }
 0x282   : > { %v6453_v53 = vpop.eup %6452 }
 0x283   : > { %v6455_v35 = vpop.eup %6454  ;;  %2416 = vrot.lane.b32.xlu0 %v6453_v53, %s6814_s12  ;;  %v5613_v9 = vpack.c.bf16 %v6453_v53, %v6453_v53 }
 0x284   : > { %v6457_v12 = vpop.eup %6456  ;;  %v2093_v20 = vadd.f32 1.0, %v6455_v35  ;;  %v8111_v48 = vpop.permute.xlu0 %2761 }
 0x285   : > { %3248 = vrot.lane.b32.xlu1 %v5613_v9, %s9666_s13  ;;  %v6459_v42 = vpop.eup %6458  ;;  %v1728_v9 = vpop.f32.mrf.mxu1  ;;  %9785 = vst [vmem:[#allocation48_spill] sm:$0xff] %v8111_v48 }
 0x286   : > { %v6461_v4 = vpop.eup %6460  ;;  %v2130_v53 = vadd.f32 1.0, %v6459_v42  ;;  %6476 = vrcp.f32 %v2093_v20  ;;  %v8107_v20 = vadd.f32 %v7969_v8, %v1600_v11  ;;  %v5579_v42 = vpack.c.bf16 %v6457_v12, %v6457_v12  ;;  %v8118_v11 = vpop.permute.xlu1 %2866 }
 0x287   : > { %2348 = vrot.lane.b32.xlu0 %v6457_v12, %s6814_s12  ;;  %v6463_v16 = vpop.eup %6462  ;;  %6478 = vpow2.f32 %v5350_v26  ;;  %v5582_v13 = vpack.c.bf16 %v6461_v4, %v6461_v4  ;;  %v5793_v51 = vpop.f32.mrf.mxu1  ;;  %v5321_v26 = vmul.f32 -1.442695, %v8101_v30  ;;  %9787 = vst [vmem:[#allocation50_spill] sm:$0xff] %v8118_v11 }
 0x288   : > { %v6465_v52 = vpop.eup %6464  ;;  %v2125_v15 = vadd.f32 1.0, %v6463_v16  ;;  %6480 = vrcp.f32 %v2130_v53  ;;  %v8114_v18 = vadd.f32 %v5793_v51, %v7969_v8  ;;  %v5316_v58 = vmul.f32 -1.442695, %v8107_v20  ;;  %v8126_v1 = vpop.permute.xlu0 %2771 }
 0x289   : > { %2354 = vrot.lane.b32.xlu1 %v6461_v4, %s6814_s12  ;;  %v6467_v35 = vpop.eup %6466  ;;  %v5611_v12 = vpack.c.bf16 %v6465_v52, %v6465_v52  ;;  %9789 = vst [vmem:[#allocation52_spill] sm:$0xff] %v8126_v1 }
 0x28a   : > { %6482 = vrcp.f32 %v2125_v15  ;;  %v6469_v16 = vpop.eup %6468  ;;  %9786 = vst [vmem:[#allocation49_spill] sm:$0xff] %v8114_v18  ;;  %v5614_v53 = vpack.c.bf16 %v6467_v35, %v6467_v35  ;;  %v8121_v15 = vadd.f32 %v7969_v8, %v1728_v9  ;;  %v5353_v51 = vmul.f32 -1.442695, %v8114_v18 }
 0x28b   : > { %2412 = vrot.lane.b32.xlu0 %v6465_v52, %s6814_s12  ;;  %v6471_v4 = vpop.eup %6470  ;;  %6484 = vpow2.f32 %v5321_v26  ;;  %v5762_v52 = vpop.f32.mrf.mxu0 }
 0x28c   : > { %9788 = vst [vmem:[#allocation51_spill] sm:$0xff] %v8121_v15  ;;  %v6473_v2 = vpop.eup %6472  ;;  %6486 = vpow2.f32 %v5316_v58  ;;  %v5348_v9 = vmul.f32 -1.442695, %v8121_v15  ;;  %v1741_v26 = vpop.f32.mrf.mxu1  ;;  %v8134_v58 = vadd.f32 %v5762_v52, %v7969_v8 }
 0x28d   : > { %2418 = vrot.lane.b32.xlu1 %v6467_v35, %s6814_s12  ;;  %v6475_v35 = vpop.eup %6474  ;;  %v8140_v55 = vpop.permute.xlu0 %2781 }
 0x28e   : > { %v2128_v11 = vadd.f32 1.0, %v6475_v35  ;;  %9791 = vst [vmem:[#allocation54_spill] sm:$0xff] %v8134_v58  ;;  %v5794_v15 = vpop.f32.mrf.mxu1  ;;  %9792 = vst [vmem:[#allocation55_spill] sm:$0xff] %v8140_v55  ;;  %v5322_v35 = vmul.f32 -1.442695, %v8134_v58 }
 0x28f   : > { %3186 = vrot.lane.b32.xlu0 %v5582_v13, %s9666_s13  ;;  %v2096_v13 = vadd.f32 1.0, %v6469_v16  ;;  %v8130_v16 = vpop.permute.xlu1 %2876 }
 0x290   : > { %9790 = vst [vmem:[#allocation53_spill] sm:$0xff] %v8130_v16  ;;  %v8152_v16 = vadd.f32 %v7969_v8, %v1741_v26 }
 0x291   : > { %3180 = vrot.lane.b32.xlu1 %v5579_v42, %s9666_s13  ;;  %v2099_v42 = vadd.f32 1.0, %v6471_v4  ;;  %6488 = vrcp.f32 %v2096_v13  ;;  %v8138_v13 = vadd.f32 %v7969_v8, %v1613_v57  ;;  %v8155_v55 = vpop.permute.xlu0 %2791 }
 0x292   : > { %6490 = vpow2.f32 %v5353_v51  ;;  %9795 = vst [vmem:[#allocation58_spill] sm:$0xff] %v8152_v16  ;;  %9796 = vst [vmem:[#allocation59_spill] sm:$0xff] %v8155_v55  ;;  %v5351_v26 = vmul.f32 -1.442695, %v8152_v16  ;;  %v1744_v55 = vpop.f32.mrf.mxu1 }
 0x293   : > { %3250 = vrot.lane.b32.xlu0 %v5614_v53, %s9666_s13  ;;  %v6477_v54 = vpop.eup %6476  ;;  %6492 = vrcp.f32 %v2099_v42  ;;  %v8144_v42 = vpop.permute.xlu1 %2886  ;;  %v5319_v57 = vmul.f32 -1.442695, %v8138_v13 }
 0x294   : > { %v6479_v53 = vpop.eup %6478  ;;  %6494 = vpow2.f32 %v5348_v9  ;;  %v5580_v51 = vpack.c.bf16 %v6477_v54, %v6477_v54  ;;  %9793 = vst [vmem:[#allocation56_spill] sm:$0xff] %v8144_v42  ;;  %v8147_v9 = vadd.f32 %v5794_v15, %v7969_v8 }
 0x295   : > { %3244 = vrot.lane.b32.xlu1 %v5611_v12, %s9666_s13  ;;  %v6481_v12 = vpop.eup %6480  ;;  %v2131_v4 = vadd.f32 1.0, %v6479_v53  ;;  %6496 = vrcp.f32 %v2128_v11  ;;  %v5585_v53 = vpack.c.bf16 %v6473_v2, %v6473_v2  ;;  %v1616_v11 = vpop.f32.mrf.mxu0 }
 0x296   : > { %9794 = vst [vmem:[#allocation57_spill] sm:$0xff] %v8147_v9  ;;  %v5617_v15 = vpack.c.bf16 %v6481_v12, %v6481_v12 }
 0x297   : > { %2360 = vrot.lane.b32.xlu0 %v6473_v2, %s6814_s12  ;;  %v6483_v18 = vpop.eup %6482  ;;  %6498 = vrcp.f32 %v2131_v4  ;;  %v5354_v4 = vmul.f32 -1.442695, %v8147_v9  ;;  %v8159_v33 = vpop.permute.xlu1 %2896 }
 0x298   : > { %v6485_v52 = vpop.eup %6484  ;;  %6500 = vpow2.f32 %v5322_v35  ;;  %9797 = vst [vmem:[#allocation60_spill] sm:$0xff] %v8159_v33  ;;  %v8164_v35 = vadd.f32 %v7969_v8, %v1616_v11  ;;  %v5797_v33 = vpop.f32.mrf.mxu1 }
 0x299   : > { %2350 = vrot.lane.b32.xlu1 %v6477_v54, %s6814_s12  ;;  %v5612_v54 = vpack.c.bf16 %v6483_v18, %v6483_v18  ;;  %v2102_v2 = vadd.f32 1.0, %v6485_v52  ;;  %6502 = vpow2.f32 %v5319_v57  ;;  %v8170_v57 = vpop.permute.xlu0 %2801 }
 0x29a   : > { %6504 = vpow2.f32 %v5354_v4  ;;  %9799 = vst [vmem:[#allocation62_spill] sm:$0xff] %v8170_v57  ;;  %v1757_v48 = vpop.f32.mrf.mxu1 }
 0x29b   : > { %2424 = vrot.lane.b32.xlu0 %v6481_v12, %s6814_s12  ;;  %6506 = vrcp.f32 %v2102_v2  ;;  %v8174_v4 = vpop.permute.xlu1 %2906  ;;  %v8177_v2 = vadd.f32 %v7969_v8, %v1744_v55 }
 0x29c   : > { %6508 = vpow2.f32 %v5351_v26  ;;  %9800 = vst [vmem:[#allocation63_spill] sm:$0xff] %v8174_v4  ;;  %v8182_v26 = vadd.f32 %v5797_v33, %v7969_v8 }
 0x29d   : > { %2414 = vrot.lane.b32.xlu1 %v6483_v18, %s6814_s12  ;;  %9801 = vst [vmem:[#allocation64_spill] sm:$0xff] %v8177_v2  ;;  %v8185_v4 = vpop.permute.xlu0 %2811  ;;  %v5352_v55 = vmul.f32 -1.442695, %v8177_v2 }
 0x29e   : > { %9802 = vst [vmem:[#allocation65_spill] sm:$0xff] %v8182_v26  ;;  %9803 = vst [vmem:[#allocation66_spill] sm:$0xff] %v8185_v4  ;;  %v5357_v33 = vmul.f32 -1.442695, %v8182_v26 }
 0x29f   : > { %3182 = vrot.lane.b32.xlu0 %v5580_v51, %s9666_s13  ;;  %v6487_v51 = vpop.eup %6486 }
 0x2a0   : > { %v6489_v42 = vpop.eup %6488  ;;  %v2097_v1 = vadd.f32 1.0, %v6487_v51 }
 0x2a1   : > { %3192 = vrot.lane.b32.xlu1 %v5585_v53, %s9666_s13  ;;  %v6491_v18 = vpop.eup %6490  ;;  %v5765_v53 = vpop.f32.mrf.mxu0 }
 0x2a2   : > { %v6493_v9 = vpop.eup %6492  ;;  %v8168_v52 = vadd.f32 %v5765_v53, %v7969_v8  ;;  %6510 = vrcp.f32 %v2097_v1  ;;  %v8204_v26 = vpop.permute.xlu0 %2821 }
 0x2a3   : > { %3246 = vrot.lane.b32.xlu0 %v5612_v54, %s9666_s13  ;;  %v6495_v12 = vpop.eup %6494  ;;  %v2134_v54 = vadd.f32 1.0, %v6491_v18  ;;  %v1629_v51 = vpop.f32.mrf.mxu0  ;;  %v5586_v1 = vpack.c.bf16 %v6493_v9, %v6493_v9  ;;  %9806 = vst [vmem:[#allocation69_spill] sm:$0xff] %v8204_v26  ;;  %v8216_v26 = vadd.f32 %v7969_v8, %v1757_v48 }
 0x2a4   : > { %9798 = vst [vmem:[#allocation61_spill] sm:$0xff] %v8168_v52  ;;  %v6497_v11 = vpop.eup %6496  ;;  %v2129_v16 = vadd.f32 1.0, %v6495_v12  ;;  %v5325_v18 = vmul.f32 -1.442695, %v8168_v52  ;;  %v5583_v12 = vpack.c.bf16 %v6489_v42, %v6489_v42 }
 0x2a5   : > { %3256 = vrot.lane.b32.xlu1 %v5617_v15, %s9666_s13  ;;  %v5320_v15 = vmul.f32 -1.442695, %v8164_v35  ;;  %v6499_v53 = vpop.eup %6498  ;;  %6512 = vrcp.f32 %v2134_v54  ;;  %v5766_v57 = vpop.f32.mrf.mxu0  ;;  %9808 = vst [vmem:[#allocation71_spill] sm:$0xff] %v8216_v26 }
 0x2a6   : > { %v6501_v17 = vpop.eup %6500  ;;  %v8189_v54 = vpop.permute.xlu1 %2916 }
 0x2a7   : > { %2356 = vrot.lane.b32.xlu0 %v6489_v42, %s6814_s12  ;;  %6514 = vpow2.f32 %v5320_v15  ;;  %9804 = vst [vmem:[#allocation67_spill] sm:$0xff] %v8189_v54  ;;  %v6503_v15 = vpop.eup %6502  ;;  %v2103_v4 = vadd.f32 1.0, %v6501_v17  ;;  %v5615_v42 = vpack.c.bf16 %v6497_v11, %v6497_v11  ;;  %v5798_v54 = vpop.f32.mrf.mxu1 }
 0x2a8   : > { %6516 = vrcp.f32 %v2129_v16  ;;  %v8197_v16 = vadd.f32 %v5766_v57, %v7969_v8 }
 0x2a9   : > { %2362 = vrot.lane.b32.xlu1 %v6493_v9, %s6814_s12  ;;  %6518 = vpow2.f32 %v5325_v18  ;;  %v5618_v9 = vpack.c.bf16 %v6499_v53, %v6499_v53  ;;  %v6505_v18 = vpop.eup %6504 }
 0x2aa   : > { %9805 = vst [vmem:[#allocation68_spill] sm:$0xff] %v8197_v16  ;;  %6520 = vpow2.f32 %v5352_v55  ;;  %v5326_v57 = vmul.f32 -1.442695, %v8197_v16  ;;  %v8211_v55 = vadd.f32 %v5798_v54, %v7969_v8 }
 0x2ab   : > { %2420 = vrot.lane.b32.xlu0 %v6497_v11, %s6814_s12  ;;  %6522 = vpow2.f32 %v5357_v33  ;;  %v2135_v11 = vadd.f32 1.0, %v6505_v18  ;;  %v1632_v33 = vpop.f32.mrf.mxu0  ;;  %v8225_v18 = vpop.permute.xlu0 %2831 }
 0x2ac   : > { %6524 = vrcp.f32 %v2103_v4  ;;  %9807 = vst [vmem:[#allocation70_spill] sm:$0xff] %v8211_v55  ;;  %9809 = vst [vmem:[#allocation72_spill] sm:$0xff] %v8225_v18  ;;  %v1760_v18 = vpop.f32.mrf.mxu1 }
 0x2ad   : > { %2426 = vrot.lane.b32.xlu1 %v6499_v53, %s6814_s12  ;;  %v2100_v53 = vadd.f32 1.0, %v6503_v15 }
 0x2ae   : > { %v5801_v45 = vpop.f32.mrf.mxu1 }
 0x2af   : > { %3194 = vrot.lane.b32.xlu0 %v5586_v1, %s9666_s13  ;;  %v8201_v1 = vadd.f32 %v7969_v8, %v1629_v51  ;;  %6526 = vrcp.f32 %v2100_v53  ;;  %v5358_v53 = vmul.f32 -1.442695, %v8211_v55  ;;  %v8239_v44 = vpop.permute.xlu0 %2841 }
 0x2b0   : > { %6528 = vpow2.f32 %v5326_v57  ;;  %v5355_v57 = vmul.f32 -1.442695, %v8216_v26  ;;  %9811 = vst [vmem:[#allocation74_spill] sm:$0xff] %v8239_v44 }
 0x2b1   : > { %3188 = vrot.lane.b32.xlu1 %v5583_v12, %s9666_s13  ;;  %v6507_v12 = vpop.eup %6506  ;;  %6530 = vrcp.f32 %v2135_v11 }
 0x2b2   : > { %v6509_v17 = vpop.eup %6508  ;;  %v5589_v55 = vpack.c.bf16 %v6507_v12, %v6507_v12 }
 0x2b3   : > { %3258 = vrot.lane.b32.xlu0 %v5618_v9, %s9666_s13  ;;  %v6511_v51 = vpop.eup %6510  ;;  %v5323_v9 = vmul.f32 -1.442695, %v8201_v1  ;;  %v2132_v15 = vadd.f32 1.0, %v6509_v17  ;;  %v5769_v17 = vpop.f32.mrf.mxu0 }
 0x2b4   : > { %v8219_v4 = vpop.eup %6512  ;;  %v5584_v46 = vpack.c.bf16 %v6511_v51, %v6511_v51 }
 0x2b5   : > { %v8206_v2 = vpop.permute.xlu1 %2352  ;;  %3252 = vrot.lane.b32.xlu1 %v5615_v42, %s9666_s13  ;;  %v6515_v54 = vpop.eup %6514  ;;  %6532 = vpow2.f32 %v5323_v9  ;;  %v8237_v9 = vadd.f32 %v5769_v17, %v7969_v8 }
 0x2b6   : > { %v6517_v48 = vpop.eup %6516  ;;  %6534 = vrcp.f32 %v2132_v15  ;;  %v2101_v11 = vadd.f32 1.0, %v6515_v54  ;;  %v1645_v54 = vpop.f32.mrf.mxu0 }
 0x2b7   : > { %2368 = vrot.lane.b32.xlu0 %v6507_v12, %s6814_s12  ;;  %v6519_v43 = vpop.eup %6518  ;;  %6536 = vpow2.f32 %v5358_v53  ;;  %9810 = vst [vmem:[#allocation73_spill] sm:$0xff] %v8237_v9 }
 0x2b8   : > { %v6521_v27 = vpop.eup %6520  ;;  %v2106_v15 = vadd.f32 1.0, %v6519_v43  ;;  %6538 = vpow2.f32 %v5355_v57  ;;  %v5329_v43 = vmul.f32 -1.442695, %v8237_v9 }
 0x2b9   : > { %v3185_v42 = vpop.permute.xlu1 %3184  ;;  %2358 = vrot.lane.b32.xlu1 %v6511_v51, %s6814_s12  ;;  %v5616_v51 = vpack.c.bf16 %v6517_v48, %v6517_v48  ;;  %v6523_v26 = vpop.eup %6522  ;;  %6540 = vrcp.f32 %v2101_v11  ;;  %v2133_v53 = vadd.f32 1.0, %v6521_v27 }
 0x2ba   : > { %3375 = vst.msk [vmem:[%s8221_s19 + $0x8] sm:$0xf] %vm3372_vm1, %v3185_v42  ;;  %v8233_v42 = vadd.f32 %v7969_v8, %v1632_v33  ;;  %v6525_v12 = vpop.eup %6524  ;;  %6542 = vrcp.f32 %v2106_v15  ;;  %v2138_v17 = vadd.f32 1.0, %v6523_v26  ;;  %v5770_v11 = vpop.f32.mrf.mxu0 }
 0x2bb   : > { %2432 = vrot.lane.b32.xlu0 %v8219_v4, %s6814_s12  ;;  %v8252_v27 = vpop.permute.xlu0 %2851  ;;  %v1773_v26 = vpop.f32.mrf.mxu1  ;;  %v5590_v41 = vpack.c.bf16 %v6525_v12, %v6525_v12 }
 0x2bc   : > { %v5324_v33 = vmul.f32 -1.442695, %v8233_v42  ;;  %9814 = vst [vmem:[#allocation77_spill] sm:$0xff] %v8252_v27  ;;  %v8264_v27 = vadd.f32 %v5770_v11, %v7969_v8 }
 0x2bd   : > { %2422 = vrot.lane.b32.xlu1 %v6517_v48, %s6814_s12  ;;  %v6527_v48 = vpop.eup %6526 }
 0x2be   : > { %6544 = vpow2.f32 %v5324_v33  ;;  %v6529_v57 = vpop.eup %6528  ;;  %9815 = vst [vmem:[#allocation78_spill] sm:$0xff] %v8264_v27  ;;  %v5587_v44 = vpack.c.bf16 %v6527_v48, %v6527_v48 }
 0x2bf   : > { %3190 = vrot.lane.b32.xlu0 %v5584_v46, %s9666_s13  ;;  %v8244_v46 = vadd.f32 %v7969_v8, %v1760_v18  ;;  %6546 = vrcp.f32 %v2133_v53  ;;  %v2107_v53 = vadd.f32 1.0, %v6529_v57  ;;  %v8271_v63 = vpop.permute.xlu0 %2861  ;;  %v5330_v57 = vmul.f32 -1.442695, %v8264_v27 }
 0x2c0   : > { %6548 = vpow2.f32 %v5329_v43  ;;  %9817 = vst [vmem:[#allocation80_spill] sm:$0xff] %v8271_v63 }
 0x2c1   : > { %3200 = vrot.lane.b32.xlu1 %v5589_v55, %s9666_s13  ;;  %9812 = vst [vmem:[#allocation75_spill] sm:$0xff] %v8244_v46  ;;  %v8249_v55 = vadd.f32 %v5801_v45, %v7969_v8  ;;  %v5356_v18 = vmul.f32 -1.442695, %v8244_v46  ;;  %6550 = vrcp.f32 %v2138_v17  ;;  %v8269_v46 = vadd.f32 %v7969_v8, %v1645_v54  ;;  %v5802_v17 = vpop.f32.mrf.mxu1 }
 0x2c2   : > { %v8276_v38 = vadd.f32 %v5802_v17, %v7969_v8 }
 0x2c3   : > { %3254 = vrot.lane.b32.xlu0 %v5616_v51, %s9666_s13  ;;  %9813 = vst [vmem:[#allocation76_spill] sm:$0xff] %v8249_v55  ;;  %v8256_v51 = vpop.eup %6530  ;;  %v5361_v45 = vmul.f32 -1.442695, %v8249_v55  ;;  %6552 = vpow2.f32 %v5356_v18  ;;  %9816 = vst [vmem:[#allocation79_spill] sm:$0xff] %v8269_v46 }
 0x2c4   : > { %v6533_v15 = vpop.eup %6532  ;;  %9818 = vst [vmem:[#allocation81_spill] sm:$0xff] %v8276_v38 }
 0x2c5   : > { %2370 = vrot.lane.b32.xlu1 %v6525_v12, %s6814_s12  ;;  %v8261_v33 = vpop.eup %6534  ;;  %v2104_v55 = vadd.f32 1.0, %v6533_v15  ;;  %6554 = vpow2.f32 %v5361_v45  ;;  %v1648_v15 = vpop.f32.mrf.mxu0  ;;  %v8281_v45 = vadd.f32 %v7969_v8, %v1773_v26 }
 0x2c6   : > { %v6537_v43 = vpop.eup %6536  ;;  %6556 = vrcp.f32 %v2107_v53  ;;  %v8284_v53 = vpop.permute.xlu0 %2871 }
 0x2c7   : > { %2364 = vrot.lane.b32.xlu0 %v6527_v48, %s6814_s12  ;;  %v6539_v11 = vpop.eup %6538  ;;  %v2139_v18 = vadd.f32 1.0, %v6537_v43  ;;  %v5327_v48 = vmul.f32 -1.442695, %v8269_v46  ;;  %6558 = vrcp.f32 %v2104_v55  ;;  %9819 = vst [vmem:[#allocation82_spill] sm:$0xff] %v8281_v45  ;;  %9820 = vst [vmem:[#allocation83_spill] sm:$0xff] %v8284_v53  ;;  %v5773_v17 = vpop.f32.mrf.mxu0 }
 0x2c8   : > { %v6541_v54 = vpop.eup %6540  ;;  %v2136_v63 = vadd.f32 1.0, %v6539_v11  ;;  %6560 = vpow2.f32 %v5330_v57  ;;  %v5362_v43 = vmul.f32 -1.442695, %v8276_v38  ;;  %v5359_v26 = vmul.f32 -1.442695, %v8281_v45 }
 0x2c9   : > { %2434 = vrot.lane.b32.xlu1 %v8256_v51, %s6814_s12  ;;  %6562 = vrcp.f32 %v2139_v18  ;;  %v8296_v57 = vadd.f32 %v7969_v8, %v1648_v15  ;;  %v1776_v18 = vpop.f32.mrf.mxu1  ;;  %v5588_v49 = vpack.c.bf16 %v6541_v54, %v6541_v54 }
 0x2ca   : > { %6564 = vpow2.f32 %v5327_v48  ;;  %v8303_v25 = vpop.permute.xlu0 %2881 }
 0x2cb   : > { %2428 = vrot.lane.b32.xlu0 %v8261_v33, %s6814_s12  ;;  %6566 = vrcp.f32 %v2136_v63  ;;  %9821 = vst [vmem:[#allocation84_spill] sm:$0xff] %v8296_v57  ;;  %v8301_v63 = vadd.f32 %v5773_v17, %v7969_v8  ;;  %9823 = vst [vmem:[#allocation86_spill] sm:$0xff] %v8303_v25  ;;  %v5328_v60 = vmul.f32 -1.442695, %v8296_v57 }
 0x2cc   : > { %6568 = vpow2.f32 %v5362_v43  ;;  %v1661_v43 = vpop.f32.mrf.mxu0 }
 0x2cd   : > { %3196 = vrot.lane.b32.xlu1 %v5587_v44, %s9666_s13  ;;  %v6543_v44 = vpop.eup %6542  ;;  %9822 = vst [vmem:[#allocation85_spill] sm:$0xff] %v8301_v63  ;;  %6570 = vpow2.f32 %v5359_v26 }
 0x2ce   : > { %v6545_v12 = vpop.eup %6544  ;;  %v5593_v48 = vpack.c.bf16 %v6543_v44, %v6543_v44  ;;  %v5774_v25 = vpop.f32.mrf.mxu0 }
 0x2cf   : > { %3202 = vrot.lane.b32.xlu0 %v5590_v41, %s9666_s13  ;;  %v8288_v41 = vpop.eup %6546  ;;  %v2105_v53 = vadd.f32 1.0, %v6545_v12  ;;  %v5805_v12 = vpop.f32.mrf.mxu1 }
 0x2d0   : > { %v6549_v55 = vpop.eup %6548 }
 0x2d1   : > { %2366 = vrot.lane.b32.xlu1 %v6541_v54, %s6814_s12  ;;  %v8293_v11 = vpop.eup %6550  ;;  %v2110_v45 = vadd.f32 1.0, %v6549_v55  ;;  %6572 = vrcp.f32 %v2105_v53  ;;  %v5333_v55 = vmul.f32 -1.442695, %v8301_v63  ;;  %v8333_v63 = vadd.f32 %v7969_v8, %v1661_v43 }
 0x2d2   : > { %v6553_v38 = vpop.eup %6552 }
 0x2d3   : > { %2376 = vrot.lane.b32.xlu0 %v6543_v44, %s6814_s12  ;;  %v6555_v15 = vpop.eup %6554  ;;  %v2137_v61 = vadd.f32 1.0, %v6553_v38  ;;  %v8308_v44 = vadd.f32 %v7969_v8, %v1776_v18  ;;  %6574 = vrcp.f32 %v2110_v45  ;;  %v8316_v38 = vpop.permute.xlu0 %2891  ;;  %9828 = vst [vmem:[#allocation91_spill] sm:$0xff] %v8333_v63 }
 0x2d4   : > { %v6557_v17 = vpop.eup %6556  ;;  %v2142_v26 = vadd.f32 1.0, %v6555_v15  ;;  %6576 = vpow2.f32 %v5328_v60  ;;  %9826 = vst [vmem:[#allocation89_spill] sm:$0xff] %v8316_v38  ;;  %v1789_v45 = vpop.f32.mrf.mxu1  ;;  %v8328_v38 = vadd.f32 %v5774_v25, %v7969_v8 }
 0x2d5   : > { %2430 = vrot.lane.b32.xlu1 %v8288_v41, %s6814_s12  ;;  %9824 = vst [vmem:[#allocation87_spill] sm:$0xff] %v8308_v44  ;;  %v6559_v54 = vpop.eup %6558  ;;  %6578 = vrcp.f32 %v2137_v61  ;;  %v5360_v18 = vmul.f32 -1.442695, %v8308_v44  ;;  %v5594_v47 = vpack.c.bf16 %v6557_v17, %v6557_v17 }
 0x2d6   : > { %v6561_v53 = vpop.eup %6560  ;;  %6580 = vpow2.f32 %v5333_v55  ;;  %9827 = vst [vmem:[#allocation90_spill] sm:$0xff] %v8328_v38  ;;  %v5591_v44 = vpack.c.bf16 %v6559_v54, %v6559_v54 }
 0x2d7   : > { %2440 = vrot.lane.b32.xlu0 %v8293_v11, %s6814_s12  ;;  %6582 = vrcp.f32 %v2142_v26  ;;  %v2111_v61 = vadd.f32 1.0, %v6561_v53  ;;  %v5806_v26 = vpop.f32.mrf.mxu1  ;;  %v8335_v9 = vpop.permute.xlu0 %2901  ;;  %v5334_v53 = vmul.f32 -1.442695, %v8328_v38 }
 0x2d8   : > { %6584 = vpow2.f32 %v5360_v18  ;;  %9829 = vst [vmem:[#allocation92_spill] sm:$0xff] %v8335_v9  ;;  %v8340_v27 = vadd.f32 %v5806_v26, %v7969_v8 }
 0x2d9   : > { %3208 = vrot.lane.b32.xlu1 %v5593_v48, %s9666_s13  ;;  %v8313_v48 = vadd.f32 %v5805_v12, %v7969_v8 }
 0x2da   : > { %9830 = vst [vmem:[#allocation93_spill] sm:$0xff] %v8340_v27 }
 0x2db   : > { %3198 = vrot.lane.b32.xlu0 %v5588_v49, %s9666_s13  ;;  %9825 = vst [vmem:[#allocation88_spill] sm:$0xff] %v8313_v48  ;;  %v8320_v49 = vpop.eup %6562  ;;  %v5365_v12 = vmul.f32 -1.442695, %v8313_v48 }
 0x2dc   : > { %v6565_v15 = vpop.eup %6564 }
 0x2dd   : > { %2378 = vrot.lane.b32.xlu1 %v6557_v17, %s6814_s12  ;;  %v8325_v60 = vpop.eup %6566  ;;  %v2108_v48 = vadd.f32 1.0, %v6565_v15  ;;  %6586 = vpow2.f32 %v5365_v12  ;;  %v1664_v15 = vpop.f32.mrf.mxu0  ;;  %v8345_v12 = vadd.f32 %v7969_v8, %v1789_v45 }
 0x2de   : > { %v6569_v55 = vpop.eup %6568  ;;  %6588 = vrcp.f32 %v2111_v61  ;;  %v8348_v61 = vpop.permute.xlu0 %2911 }
 0x2df   : > { %2372 = vrot.lane.b32.xlu0 %v6559_v54, %s6814_s12  ;;  %v6571_v25 = vpop.eup %6570  ;;  %v2143_v18 = vadd.f32 1.0, %v6569_v55  ;;  %v5331_v54 = vmul.f32 -1.442695, %v8333_v63  ;;  %6590 = vrcp.f32 %v2108_v48  ;;  %9831 = vst [vmem:[#allocation94_spill] sm:$0xff] %v8345_v12  ;;  %9832 = vst [vmem:[#allocation95_spill] sm:$0xff] %v8348_v61  ;;  %v5777_v26 = vpop.f32.mrf.mxu0 }
 0x2e0   : > { %v6573_v43 = vpop.eup %6572  ;;  %v2140_v9 = vadd.f32 1.0, %v6571_v25  ;;  %6592 = vpow2.f32 %v5334_v53  ;;  %v5366_v55 = vmul.f32 -1.442695, %v8340_v27  ;;  %v5363_v45 = vmul.f32 -1.442695, %v8345_v12 }
 0x2e1   : > { %2442 = vrot.lane.b32.xlu1 %v8320_v49, %s6814_s12  ;;  %6594 = vrcp.f32 %v2143_v18  ;;  %v8360_v53 = vadd.f32 %v7969_v8, %v1664_v15  ;;  %v1792_v18 = vpop.f32.mrf.mxu1  ;;  %v5592_v46 = vpack.c.bf16 %v6573_v43, %v6573_v43 }
 0x2e2   : > { %6596 = vpow2.f32 %v5331_v54  ;;  %v8367_v38 = vpop.permute.xlu0 %2921 }
 0x2e3   : > { %2436 = vrot.lane.b32.xlu0 %v8325_v60, %s6814_s12  ;;  %6598 = vrcp.f32 %v2140_v9  ;;  %9833 = vst [vmem:[#allocation96_spill] sm:$0xff] %v8360_v53  ;;  %v8365_v9 = vadd.f32 %v5777_v26, %v7969_v8  ;;  %9835 = vst [vmem:[#allocation98_spill] sm:$0xff] %v8367_v38  ;;  %v5332_v3 = vmul.f32 -1.442695, %v8360_v53 }
 0x2e4   : > { %6600 = vpow2.f32 %v5366_v55  ;;  %v1677_v55 = vpop.f32.mrf.mxu0 }
 0x2e5   : > { %3204 = vrot.lane.b32.xlu1 %v5591_v44, %s9666_s13  ;;  %v6575_v44 = vpop.eup %6574  ;;  %9834 = vst [vmem:[#allocation97_spill] sm:$0xff] %v8365_v9  ;;  %6602 = vpow2.f32 %v5363_v45 }
 0x2e6   : > { %v6577_v17 = vpop.eup %6576  ;;  %v5597_v54 = vpack.c.bf16 %v6575_v44, %v6575_v44 }
 0x2e7   : > { %3210 = vrot.lane.b32.xlu0 %v5594_v47, %s9666_s13  ;;  %v8352_v47 = vpop.eup %6578  ;;  %v2109_v61 = vadd.f32 1.0, %v6577_v17  ;;  %v5809_v17 = vpop.f32.mrf.mxu1 }
 0x2e8   : > { %v6581_v48 = vpop.eup %6580 }
 0x2e9   : > { %2374 = vrot.lane.b32.xlu1 %v6573_v43, %s6814_s12  ;;  %v8357_v25 = vpop.eup %6582  ;;  %v2114_v12 = vadd.f32 1.0, %v6581_v48  ;;  %6604 = vrcp.f32 %v2109_v61  ;;  %v5337_v48 = vmul.f32 -1.442695, %v8365_v9  ;;  %v8377_v43 = vadd.f32 %v5809_v17, %v7969_v8 }
 0x2ea   : > { %v6585_v27 = vpop.eup %6584 }
 0x2eb   : > { %2384 = vrot.lane.b32.xlu0 %v6575_v44, %s6814_s12  ;;  %v6587_v15 = vpop.eup %6586  ;;  %v2141_v59 = vadd.f32 1.0, %v6585_v27  ;;  %v8372_v44 = vadd.f32 %v7969_v8, %v1792_v18  ;;  %6606 = vrcp.f32 %v2114_v12  ;;  %9837 = vst [vmem:[#allocation100_spill] sm:$0xff] %v8377_v43  ;;  %v5778_v18 = vpop.f32.mrf.mxu0  ;;  %v5369_v17 = vmul.f32 -1.442695, %v8377_v43 }
 0x2ec   : > { %v6589_v26 = vpop.eup %6588  ;;  %v2146_v45 = vadd.f32 1.0, %v6587_v15  ;;  %6608 = vpow2.f32 %v5332_v3  ;;  %v1805_v15 = vpop.f32.mrf.mxu1 }
 0x2ed   : > { %2438 = vrot.lane.b32.xlu1 %v8352_v47, %s6814_s12  ;;  %9836 = vst [vmem:[#allocation99_spill] sm:$0xff] %v8372_v44  ;;  %v6591_v61 = vpop.eup %6590  ;;  %6610 = vrcp.f32 %v2141_v59 }
 0x2ee   : > { %v6593_v27 = vpop.eup %6592  ;;  %6612 = vpow2.f32 %v5337_v48  ;;  %v5595_v43 = vpack.c.bf16 %v6591_v61, %v6591_v61  ;;  %v5810_v29 = vpop.f32.mrf.mxu1 }
 0x2ef   : > { %2448 = vrot.lane.b32.xlu0 %v8357_v25, %s6814_s12  ;;  %v8384_v12 = vpop.eup %6594  ;;  %6614 = vrcp.f32 %v2146_v45 }
 0x2f0   : > { %v6597_v8 = vpop.eup %6596 }
 0x2f1   : > { %3216 = vrot.lane.b32.xlu1 %v5597_v54, %s9666_s13  ;;  %v8393_v59 = vpop.eup %6598  ;;  %v2112_v57 = vadd.f32 1.0, %v6597_v8 }
 0x2f3   : > { %3206 = vrot.lane.b32.xlu0 %v5592_v46, %s9666_s13  ;;  %v5364_v46 = vmul.f32 -1.442695, %v8372_v44  ;;  %v8398_v44 = vld [vmem:[%s9558_s5] ss:$0 sm:$0xff] }
 0x2f4   : > { %v8401_v48 = vadd.f32 %v8398_v44, %v5778_v18  ;;  %v8408_v9 = vadd.f32 %v8398_v44, %v1677_v55  ;;  %v5598_v18 = vpack.c.bf16 %v6589_v26, %v6589_v26 }
 0x2f5   : > { %2386 = vrot.lane.b32.xlu1 %v6589_v26, %s6814_s12  ;;  %v8380_v54 = vpop.permute.xlu0 %2416  ;;  %6616 = vpow2.f32 %v5364_v46 }
 0x2f6   : > { %9838 = vst [vmem:[#allocation101_spill] sm:$0xff] %v8380_v54  ;;  %9839 = vst [vmem:[#allocation102_spill] sm:$0xff] %v8401_v48  ;;  %v6601_v54 = vpop.eup %6600  ;;  %6618 = vpow2.f32 %v5369_v17  ;;  %v5338_v46 = vmul.f32 -1.442695, %v8401_v48  ;;  %v5335_v8 = vmul.f32 -1.442695, %v8408_v9  ;;  %v8422_v17 = vadd.f32 %v8398_v44, %v1805_v15 }
 0x2f7   : > { %v3249_v38 = vpop.permute.xlu1 %3248  ;;  %2380 = vrot.lane.b32.xlu0 %v6591_v61, %s6814_s12  ;;  %9840 = vst [vmem:[#allocation103_spill] sm:$0xff] %v8408_v9  ;;  %v2147_v53 = vadd.f32 1.0, %v6601_v54  ;;  %v8415_v61 = vadd.f32 %v8398_v44, %v5810_v29 }
 0x2f8   : > { %3407 = vst.msk [vmem:[%s8221_s19 + $0x88] sm:$0xf] %vm3372_vm1, %v3249_v38  ;;  %v2115_v38 = vadd.f32 1.0, %v6593_v27  ;;  %v6603_v27 = vpop.eup %6602  ;;  %9844 = vst [vmem:[#allocation107_spill] sm:$0xff] %v8422_v17 }
 0x2f9   : > { %2450 = vrot.lane.b32.xlu1 %v8384_v12, %s6814_s12  ;;  %v8391_v3 = vpop.permute.xlu0 %2348  ;;  %9842 = vst [vmem:[#allocation105_spill] sm:$0xff] %v8415_v61  ;;  %v6605_v55 = vpop.eup %6604  ;;  %v2144_v26 = vadd.f32 1.0, %v6603_v27 }
 0x2fa   : > { %6620 = vrcp.f32 %v2115_v38  ;;  %v6607_v38 = vpop.eup %6606 }
 0x2fb   : > { %v8403_v45 = vpop.permute.xlu1 %2354  ;;  %2444 = vrot.lane.b32.xlu0 %v8393_v59, %s6814_s12  ;;  %6622 = vrcp.f32 %v2112_v57  ;;  %v6609_v29 = vpop.eup %6608 }
 0x2fc   : > { %6624 = vpow2.f32 %v5338_v46  ;;  %v8429_v57 = vpop.eup %6610  ;;  %v5367_v46 = vmul.f32 -1.442695, %v8422_v17 }
 0x2fd   : > { %3212 = vrot.lane.b32.xlu1 %v5595_v43, %s9666_s13  ;;  %v8411_v56 = vpop.permute.xlu0 %2412  ;;  %v1680_v43 = vpop.f32.mrf.mxu0  ;;  %6626 = vrcp.f32 %v2147_v53 }
 0x2fe   : > { %9841 = vst [vmem:[#allocation104_spill] sm:$0xff] %v8411_v56  ;;  %6628 = vpow2.f32 %v5335_v8  ;;  %v6613_v15 = vpop.eup %6612  ;;  %v1808_v56 = vpop.f32.mrf.mxu1  ;;  %v2113_v8 = vadd.f32 1.0, %v6609_v29 }
 0x2ff   : > { %v8417_v52 = vpop.permute.xlu1 %2418  ;;  %3218 = vrot.lane.b32.xlu0 %v5598_v18, %s9666_s13  ;;  %v5370_v18 = vmul.f32 -1.442695, %v8415_v61  ;;  %v5781_v27 = vpop.f32.mrf.mxu0  ;;  %6630 = vrcp.f32 %v2144_v26  ;;  %v8439_v61 = vadd.f32 %v8398_v44, %v1680_v43  ;;  %v5601_v26 = vpack.c.bf16 %v6607_v38, %v6607_v38 }
 0x300   : > { %9843 = vst [vmem:[#allocation106_spill] sm:$0xff] %v8417_v52  ;;  %v8446_v48 = vadd.f32 %v8398_v44, %v5781_v27  ;;  %v2118_v9 = vadd.f32 1.0, %v6613_v15  ;;  %v5813_v24 = vpop.f32.mrf.mxu1  ;;  %v8455_v16 = vadd.f32 %v8398_v44, %v1808_v56 }
 0x301   : > { %2382 = vrot.lane.b32.xlu1 %v6605_v55, %s6814_s12  ;;  %v3187_v54 = vpop.permute.xlu0 %3186  ;;  %9845 = vst [vmem:[#allocation108_spill] sm:$0xff] %v8439_v61  ;;  %6632 = vpow2.f32 %v5370_v18  ;;  %v5336_v18 = vmul.f32 -1.442695, %v8439_v61  ;;  %v1693_v63 = vpop.f32.mrf.mxu0 }
 0x302   : > { %3376 = vst.msk [vmem:[%s8221_s19 + $0xc] sm:$0xf] %vm3372_vm1, %v3187_v54  ;;  %v8436_v54 = vpop.eup %6614  ;;  %9846 = vst [vmem:[#allocation109_spill] sm:$0xff] %v8446_v48  ;;  %6634 = vpow2.f32 %v5367_v46  ;;  %v5341_v46 = vmul.f32 -1.442695, %v8446_v48  ;;  %v8486_v48 = vadd.f32 %v8398_v44, %v1693_v63 }
 0x303   : > { %v3181_v52 = vpop.permute.xlu1 %3180  ;;  %2392 = vrot.lane.b32.xlu0 %v6607_v38, %s6814_s12  ;;  %v6617_v17 = vpop.eup %6616  ;;  %6636 = vrcp.f32 %v2113_v8  ;;  %9847 = vst [vmem:[#allocation110_spill] sm:$0xff] %v8455_v16 }
 0x304   : > { %3373 = vst.msk [vmem:[%s8221_s19] sm:$0xf] %vm3372_vm1, %v3181_v52  ;;  %v6619_v29 = vpop.eup %6618  ;;  %v2145_v38 = vadd.f32 1.0, %v6617_v17  ;;  %6638 = vrcp.f32 %v2118_v9  ;;  %9852 = vst [vmem:[#allocation115_spill] sm:$0xff] %v8486_v48 }
 0x305   : > { %2446 = vrot.lane.b32.xlu1 %v8429_v57, %s6814_s12  ;;  %v3251_v53 = vpop.permute.xlu0 %3250  ;;  %6640 = vpow2.f32 %v5336_v18 }
 0x306   : > { %3408 = vst.msk [vmem:[%s8221_s19 + $0x8c] sm:$0xf] %vm3372_vm1, %v3251_v53  ;;  %v5596_v53 = vpack.c.bf16 %v6605_v55, %v6605_v55  ;;  %v8462_v55 = vadd.f32 %v8398_v44, %v5813_v24  ;;  %6642 = vrcp.f32 %v2145_v38  ;;  %v1821_v24 = vpop.f32.mrf.mxu1 }
 0x307   : > { %v3245_v52 = vpop.permute.xlu1 %3244  ;;  %2456 = vrot.lane.b32.xlu0 %v8436_v54, %s6814_s12  ;;  %v6621_v15 = vpop.eup %6620  ;;  %6644 = vpow2.f32 %v5341_v46 }
 0x308   : > { %3405 = vst.msk [vmem:[%s8221_s19 + $0x80] sm:$0xf] %vm3372_vm1, %v3245_v52  ;;  %v2150_v52 = vadd.f32 1.0, %v6619_v29  ;;  %9848 = vst [vmem:[#allocation111_spill] sm:$0xff] %v8462_v55  ;;  %v6623_v17 = vpop.eup %6622  ;;  %v5814_v6 = vpop.f32.mrf.mxu1 }
 0x309   : > { %3224 = vrot.lane.b32.xlu1 %v5601_v26, %s9666_s13  ;;  %v8451_v43 = vpop.permute.xlu0 %2360  ;;  %v6625_v56 = vpop.eup %6624  ;;  %v8495_v63 = vadd.f32 %v8398_v44, %v5814_v6 }
 0x30a   : > { %v5782_v26 = vpop.f32.mrf.mxu0  ;;  %v8471_v9 = vpop.eup %6626  ;;  %6646 = vrcp.f32 %v2150_v52  ;;  %v5599_v52 = vpack.c.bf16 %v6623_v17, %v6623_v17 }
 0x30b   : > { %v8457_v27 = vpop.permute.xlu1 %2350  ;;  %3214 = vrot.lane.b32.xlu0 %v5596_v53, %s9666_s13  ;;  %v5368_v53 = vmul.f32 -1.442695, %v8455_v16  ;;  %v6629_v29 = vpop.eup %6628  ;;  %v8479_v16 = vadd.f32 %v8398_v44, %v5782_v26  ;;  %9853 = vst [vmem:[#allocation116_spill] sm:$0xff] %v8495_v63 }
 0x30c   : > { %v8476_v38 = vpop.eup %6630  ;;  %v2116_v26 = vadd.f32 1.0, %v6629_v29  ;;  %v8502_v29 = vadd.f32 %v8398_v44, %v1821_v24 }
 0x30d   : > { %2394 = vrot.lane.b32.xlu1 %v6621_v15, %s6814_s12  ;;  %v8465_v8 = vpop.permute.xlu0 %2424  ;;  %9851 = vst [vmem:[#allocation114_spill] sm:$0xff] %v8479_v16  ;;  %6648 = vpow2.f32 %v5368_v53  ;;  %v5342_v7 = vmul.f32 -1.442695, %v8479_v16 }
 0x30e   : > { %9849 = vst [vmem:[#allocation112_spill] sm:$0xff] %v8465_v8  ;;  %v5373_v8 = vmul.f32 -1.442695, %v8462_v55  ;;  %v6633_v55 = vpop.eup %6632  ;;  %9854 = vst [vmem:[#allocation117_spill] sm:$0xff] %v8502_v29 }
 0x30f   : > { %v8468_v61 = vpop.permute.xlu1 %2414  ;;  %2388 = vrot.lane.b32.xlu0 %v6623_v17, %s6814_s12  ;;  %v6635_v53 = vpop.eup %6634  ;;  %v2151_v17 = vadd.f32 1.0, %v6633_v55 }
 0x310   : > { %9850 = vst [vmem:[#allocation113_spill] sm:$0xff] %v8468_v61  ;;  %v2119_v61 = vadd.f32 1.0, %v6625_v56  ;;  %6650 = vpow2.f32 %v5373_v8  ;;  %v5339_v8 = vmul.f32 -1.442695, %v8486_v48 }
 0x311   : > { %2458 = vrot.lane.b32.xlu1 %v8471_v9, %s6814_s12  ;;  %v3183_v18 = vpop.permute.xlu0 %3182 }
 0x312   : > { %3374 = vst.msk [vmem:[%s8221_s19 + $0x4] sm:$0xf] %vm3372_vm1, %v3183_v18  ;;  %v5602_v18 = vpack.c.bf16 %v6621_v15, %v6621_v15  ;;  %6652 = vrcp.f32 %v2119_v61  ;;  %v2148_v15 = vadd.f32 1.0, %v6635_v53 }
 0x313   : > { %v3193_v46 = vpop.permute.xlu1 %3192  ;;  %2452 = vrot.lane.b32.xlu0 %v8476_v38, %s6814_s12  ;;  %6654 = vrcp.f32 %v2116_v26  ;;  %v5371_v26 = vmul.f32 -1.442695, %v8502_v29  ;;  %v1824_v29 = vpop.f32.mrf.mxu1 }
 0x314   : > { %3379 = vst.msk [vmem:[%s8221_s19 + $0x18] sm:$0xf] %vm3372_vm1, %v3193_v46  ;;  %v6637_v46 = vpop.eup %6636  ;;  %6656 = vpow2.f32 %v5342_v7 }
 0x315   : > { %3220 = vrot.lane.b32.xlu1 %v5599_v52, %s9666_s13  ;;  %v3247_v56 = vpop.permute.xlu0 %3246  ;;  %v6639_v55 = vpop.eup %6638  ;;  %6658 = vrcp.f32 %v2151_v17  ;;  %v5600_v22 = vpack.c.bf16 %v6637_v46, %v6637_v46 }
 0x316   : > { %3406 = vst.msk [vmem:[%s8221_s19 + $0x84] sm:$0xf] %vm3372_vm1, %v3247_v56  ;;  %v6641_v6 = vpop.eup %6640  ;;  %v1696_v52 = vpop.f32.mrf.mxu0  ;;  %v5374_v56 = vmul.f32 -1.442695, %v8495_v63  ;;  %6660 = vpow2.f32 %v5339_v8  ;;  %v5605_v8 = vpack.c.bf16 %v6639_v55, %v6639_v55 }
 0x317   : > { %v3257_v30 = vpop.permute.xlu1 %3256  ;;  %3226 = vrot.lane.b32.xlu0 %v5602_v18, %s9666_s13  ;;  %6662 = vrcp.f32 %v2148_v15  ;;  %v8521_v17 = vadd.f32 %v8398_v44, %v1696_v52  ;;  %v2117_v63 = vadd.f32 1.0, %v6641_v6 }
 0x318   : > { %3411 = vst.msk [vmem:[%s8221_s19 + $0x98] sm:$0xf] %vm3372_vm1, %v3257_v30  ;;  %v8511_v30 = vpop.eup %6642  ;;  %6664 = vpow2.f32 %v5374_v56  ;;  %v8532_v56 = vadd.f32 %v8398_v44, %v1824_v29 }
 0x319   : > { %2390 = vrot.lane.b32.xlu1 %v6637_v46, %s6814_s12  ;;  %v8505_v61 = vpop.permute.xlu0 %2356  ;;  %v6645_v24 = vpop.eup %6644  ;;  %9856 = vst [vmem:[#allocation119_spill] sm:$0xff] %v8521_v17  ;;  %6666 = vpow2.f32 %v5371_v26  ;;  %v5340_v6 = vmul.f32 -1.442695, %v8521_v17 }
 0x31a   : > { %v8518_v53 = vpop.eup %6646  ;;  %v2122_v16 = vadd.f32 1.0, %v6645_v24  ;;  %6668 = vrcp.f32 %v2117_v63  ;;  %9858 = vst [vmem:[#allocation121_spill] sm:$0xff] %v8532_v56  ;;  %v5372_v44 = vmul.f32 -1.442695, %v8532_v56 }
 0x31b   : > { %v8508_v18 = vpop.permute.xlu1 %2362  ;;  %2400 = vrot.lane.b32.xlu0 %v6639_v55, %s6814_s12  ;;  %v6649_v15 = vpop.eup %6648 }
 0x31c   : > { %v2149_v52 = vadd.f32 1.0, %v6649_v15  ;;  %6670 = vrcp.f32 %v2122_v16 }
 0x31d   : > { %2454 = vrot.lane.b32.xlu1 %v8511_v30, %s6814_s12  ;;  %v8516_v7 = vpop.permute.xlu0 %2420  ;;  %v6651_v58 = vpop.eup %6650  ;;  %6672 = vpow2.f32 %v5340_v6 }
 0x31e   : > { %9855 = vst [vmem:[#allocation118_spill] sm:$0xff] %v8516_v7  ;;  %v2154_v46 = vadd.f32 1.0, %v6651_v58  ;;  %6674 = vrcp.f32 %v2149_v52 }
 0x31f   : > { %v8523_v48 = vpop.permute.xlu1 %2426  ;;  %2464 = vrot.lane.b32.xlu0 %v8518_v53, %s6814_s12  ;;  %v6653_v24 = vpop.eup %6652 }
 0x320   : > { %9857 = vst [vmem:[#allocation120_spill] sm:$0xff] %v8523_v48  ;;  %6676 = vrcp.f32 %v2154_v46 }
 0x321   : > { %3232 = vrot.lane.b32.xlu1 %v5605_v8, %s9666_s13  ;;  %v3195_v7 = vpop.permute.xlu0 %3194  ;;  %v6655_v8 = vpop.eup %6654  ;;  %6678 = vpow2.f32 %v5372_v44 }
 0x322   : > { %3380 = vst.msk [vmem:[%s8221_s19 + $0x1c] sm:$0xf] %vm3372_vm1, %v3195_v7  ;;  %v6657_v63 = vpop.eup %6656  ;;  %v5603_v52 = vpack.c.bf16 %v6655_v8, %v6655_v8 }
 0x323   : > { %v3189_v55 = vpop.permute.xlu1 %3188  ;;  %3222 = vrot.lane.b32.xlu0 %v5600_v22, %s9666_s13  ;;  %v8542_v22 = vpop.eup %6658  ;;  %v2123_v15 = vadd.f32 1.0, %v6657_v63 }
 0x324   : > { %3377 = vst.msk [vmem:[%s8221_s19 + $0x10] sm:$0xf] %vm3372_vm1, %v3189_v55  ;;  %v6661_v16 = vpop.eup %6660 }
 0x325   : > { %2402 = vrot.lane.b32.xlu1 %v6653_v24, %s6814_s12  ;;  %v3259_v26 = vpop.permute.xlu0 %3258  ;;  %v8550_v7 = vpop.eup %6662  ;;  %6680 = vrcp.f32 %v2123_v15 }
 0x326   : > { %3412 = vst.msk [vmem:[%s8221_s19 + $0x9c] sm:$0xf] %vm3372_vm1, %v3259_v26  ;;  %v6665_v55 = vpop.eup %6664  ;;  %v2120_v26 = vadd.f32 1.0, %v6661_v16 }
 0x327   : > { %v3253_v29 = vpop.permute.xlu1 %3252  ;;  %2396 = vrot.lane.b32.xlu0 %v6655_v8, %s6814_s12  ;;  %v6667_v56 = vpop.eup %6666  ;;  %v2155_v17 = vadd.f32 1.0, %v6665_v55 }
 0x328   : > { %3409 = vst.msk [vmem:[%s8221_s19 + $0x90] sm:$0xf] %vm3372_vm1, %v3253_v29  ;;  %v5606_v29 = vpack.c.bf16 %v6653_v24, %v6653_v24  ;;  %v6669_v44 = vpop.eup %6668  ;;  %6682 = vrcp.f32 %v2120_v26  ;;  %v2152_v8 = vadd.f32 1.0, %v6667_v56 }
 0x329   : > { %2466 = vrot.lane.b32.xlu1 %v8542_v22, %s6814_s12  ;;  %v8548_v58 = vpop.permute.xlu0 %2368  ;;  %v6671_v48 = vpop.eup %6670  ;;  %6684 = vrcp.f32 %v2155_v17 }
 0x32a   : > { %9859 = vst [vmem:[#allocation122_spill] sm:$0xff] %v8548_v58  ;;  %6686 = vrcp.f32 %v2152_v8  ;;  %v5609_v17 = vpack.c.bf16 %v6671_v48, %v6671_v48 }
 0x32b   : > { %v8552_v6 = vpop.permute.xlu1 %2358  ;;  %2460 = vrot.lane.b32.xlu0 %v8550_v7, %s6814_s12 }
 0x32d   : > { %3228 = vrot.lane.b32.xlu1 %v5603_v52, %s9666_s13  ;;  %v8557_v46 = vpop.permute.xlu0 %2432  ;;  %v6673_v52 = vpop.eup %6672 }
 0x32e   : > { %9860 = vst [vmem:[#allocation123_spill] sm:$0xff] %v8557_v46  ;;  %v8566_v15 = vpop.eup %6674  ;;  %v2121_v26 = vadd.f32 1.0, %v6673_v52 }
 0x32f   : > { %v8559_v63 = vpop.permute.xlu1 %2422  ;;  %3234 = vrot.lane.b32.xlu0 %v5606_v29, %s9666_s13  ;;  %v8572_v55 = vpop.eup %6676 }
 0x330   : > { %9861 = vst [vmem:[#allocation124_spill] sm:$0xff] %v8559_v63  ;;  %6688 = vrcp.f32 %v2121_v26 }
 0x331   : > { %2398 = vrot.lane.b32.xlu1 %v6669_v44, %s6814_s12  ;;  %v3191_v16 = vpop.permute.xlu0 %3190 }
 0x332   : > { %3378 = vst.msk [vmem:[%s8221_s19 + $0x14] sm:$0xf] %vm3372_vm1, %v3191_v16  ;;  %v6679_v16 = vpop.eup %6678 }
 0x333   : > { %v3201_v24 = vpop.permute.xlu1 %3200  ;;  %2408 = vrot.lane.b32.xlu0 %v6671_v48, %s6814_s12  ;;  %v2153_v46 = vadd.f32 1.0, %v6679_v16  ;;  %v6681_v52 = vpop.eup %6680 }
 0x334   : > { %3383 = vst.msk [vmem:[%s8221_s19 + $0x28] sm:$0xf] %vm3372_vm1, %v3201_v24  ;;  %v5604_v24 = vpack.c.bf16 %v6669_v44, %v6669_v44 }
 0x335   : > { %2462 = vrot.lane.b32.xlu1 %v8566_v15, %s6814_s12  ;;  %v3255_v56 = vpop.permute.xlu0 %3254  ;;  %v6683_v48 = vpop.eup %6682  ;;  %6690 = vrcp.f32 %v2153_v46 }
 0x336   : > { %3410 = vst.msk [vmem:[%s8221_s19 + $0x94] sm:$0xf] %vm3372_vm1, %v3255_v56  ;;  %v5607_v46 = vpack.c.bf16 %v6683_v48, %v6683_v48 }
 0x337   : > { %v8576_v29 = vpop.permute.xlu1 %2370  ;;  %2472 = vrot.lane.b32.xlu0 %v8572_v55, %s6814_s12 }
 0x338   : > { %9862 = vst [vmem:[#allocation125_spill] sm:$0xff] %v8576_v29  ;;  %v5610_v29 = vpack.c.bf16 %v6681_v52, %v6681_v52 }
 0x339   : > { %3240 = vrot.lane.b32.xlu1 %v5609_v17, %s9666_s13  ;;  %v8581_v8 = vpop.permute.xlu0 %2364  ;;  %v8590_v17 = vpop.eup %6684 }
 0x33a   : > { %9863 = vst [vmem:[#allocation126_spill] sm:$0xff] %v8581_v8  ;;  %v8596_v26 = vpop.eup %6686 }
 0x33b   : > { %v8583_v63 = vpop.permute.xlu1 %2434  ;;  %3230 = vrot.lane.b32.xlu0 %v5604_v24, %s9666_s13 }
 0x33c   : > { %9864 = vst [vmem:[#allocation127_spill] sm:$0xff] %v8583_v63 }
 0x33d   : > { %2410 = vrot.lane.b32.xlu1 %v6681_v52, %s6814_s12  ;;  %v8587_v56 = vpop.permute.xlu0 %2428  ;;  %v5619_v52 = vpack.c.bf16 %v8261_v33, %v8261_v33  ;;  %v5624_v33 = vpack.c.bf16 %v8352_v47, %v8352_v47  ;;  %v5625_v47 = vpack.c.bf16 %v8293_v11, %v8293_v11  ;;  %v5630_v11 = vpack.c.bf16 %v8384_v12, %v8384_v12 }
 0x33e   : > { %9865 = vst [vmem:[#allocation128_spill] sm:$0xff] %v8587_v56  ;;  %v5631_v12 = vpack.c.bf16 %v8476_v38, %v8476_v38  ;;  %v5636_v38 = vpack.c.bf16 %v8566_v15, %v8566_v15  ;;  %v5637_v15 = vpack.c.bf16 %v8518_v53, %v8518_v53  ;;  %v2546_v53 = vmul.f32 %v8451_v43, %v8042_v0 }
 0x33f   : > { %v3197_v58 = vpop.permute.xlu1 %3196  ;;  %2404 = vrot.lane.b32.xlu0 %v6683_v48, %s6814_s12  ;;  %v5641_v43 = vpack.c.bf16 %v8572_v55, %v8572_v55 }
 0x340   : > { %3381 = vst.msk [vmem:[%s8221_s19 + $0x20] sm:$0xf] %vm3372_vm1, %v3197_v58  ;;  %v5620_v58 = vpack.c.bf16 %v8288_v41, %v8288_v41 }
 0x341   : > { %2474 = vrot.lane.b32.xlu1 %v8590_v17, %s6814_s12  ;;  %v3203_v44 = vpop.permute.xlu0 %3202 }
 0x342   : > { %3384 = vst.msk [vmem:[%s8221_s19 + $0x2c] sm:$0xf] %vm3372_vm1, %v3203_v44  ;;  %v6689_v44 = vpop.eup %6688 }
 0x343   : > { %v8600_v16 = vpop.permute.xlu1 %2366  ;;  %2468 = vrot.lane.b32.xlu0 %v8596_v26, %s6814_s12  ;;  %v8616_v48 = vpop.eup %6690 }
 0x345   : > { %3236 = vrot.lane.b32.xlu1 %v5607_v46, %s9666_s13  ;;  %v8605_v24 = vpop.permute.xlu0 %2376  ;;  %v5608_v46 = vpack.c.bf16 %v6689_v44, %v6689_v44 }
 0x347   : > { %v8609_v63 = vpop.permute.xlu1 %2430  ;;  %3262 = vrot.lane.b32.xlu0 %v5620_v58, %s9666_s13 }
 0x349   : > { %2406 = vrot.lane.b32.xlu1 %v6689_v44, %s6814_s12  ;;  %v8613_v56 = vpop.permute.xlu0 %2440  ;;  %v5621_v44 = vpack.c.bf16 %v8219_v4, %v8219_v4  ;;  %v5626_v4 = vpack.c.bf16 %v8320_v49, %v8320_v49  ;;  %v5627_v49 = vpack.c.bf16 %v8393_v59, %v8393_v59  ;;  %v5632_v59 = vpack.c.bf16 %v8511_v30, %v8511_v30 }
 0x34a   : > { %9866 = vst [vmem:[#allocation129_spill] sm:$0xff] %v8613_v56  ;;  %v5633_v30 = vpack.c.bf16 %v8436_v54, %v8436_v54  ;;  %v5638_v54 = vpack.c.bf16 %v8542_v22, %v8542_v22  ;;  %v2542_v22 = vmul.f32 %v8206_v2, %v7974_v31  ;;  %v2541_v31 = vmul.f32 %v8457_v27, %v8047_v14 }
 0x34b   : > { %v3209_v8 = vpop.permute.xlu1 %3208  ;;  %3242 = vrot.lane.b32.xlu0 %v5610_v29, %s9666_s13  ;;  %v5642_v2 = vpack.c.bf16 %v8590_v17, %v8590_v17 }
 0x34c   : > { %3387 = vst.msk [vmem:[%s8221_s19 + $0x38] sm:$0xf] %vm3372_vm1, %v3209_v8  ;;  %v5622_v8 = vpack.c.bf16 %v8256_v51, %v8256_v51  ;;  %v5623_v51 = vpack.c.bf16 %v8325_v60, %v8325_v60 }
 0x34d   : > { %2470 = vrot.lane.b32.xlu1 %v8616_v48, %s6814_s12  ;;  %v3199_v41 = vpop.permute.xlu0 %3198  ;;  %s5708_s12 = sshll.u32 %s6887_s9, 11 }
 0x34e   : > { %3382 = vst.msk [vmem:[%s8221_s19 + $0x24] sm:$0xf] %vm3372_vm1, %v3199_v41  ;;  %s9445_s2 = scalar_lea.hbm %s9559_s6, %s5708_s12 }
 0x34f   : > { %v8624_v58 = vpop.permute.xlu1 %2378  ;;  %3238 = vrot.lane.b32.xlu0 %v5608_v46, %s9666_s13 }
 0x351   : > { %3260 = vrot.lane.b32.xlu1 %v5619_v52, %s9666_s13  ;;  %v8630_v29 = vpop.permute.xlu0 %2372 }
 0x353   : > { %v8634_v56 = vpop.permute.xlu1 %2442  ;;  %3266 = vrot.lane.b32.xlu0 %v5622_v8, %s9666_s13 }
 0x355   : > { %3264 = vrot.lane.b32.xlu1 %v5621_v44, %s9666_s13  ;;  %v8640_v41 = vpop.permute.xlu0 %2436  ;;  %v5628_v44 = vpack.c.bf16 %v8429_v57, %v8429_v57  ;;  %v5629_v57 = vpack.c.bf16 %v8357_v25, %v8357_v25 }
 0x357   : > { %v3205_v46 = vpop.permute.xlu1 %3204  ;;  %3270 = vrot.lane.b32.xlu0 %v5624_v33, %s9666_s13 }
 0x358   : > { %3385 = vst.msk [vmem:[%s8221_s19 + $0x30] sm:$0xf] %vm3372_vm1, %v3205_v46 }
 0x359   : > { %3268 = vrot.lane.b32.xlu1 %v5623_v51, %s9666_s13  ;;  %v3211_v52 = vpop.permute.xlu0 %3210 }
 0x35a   : > { %3388 = vst.msk [vmem:[%s8221_s19 + $0x3c] sm:$0xf] %vm3372_vm1, %v3211_v52 }
 0x35b   : > { %v2375_v8 = vpop.permute.xlu1 %2374  ;;  %3274 = vrot.lane.b32.xlu0 %v5626_v4, %s9666_s13 }
 0x35c   : > { %v2553_v0 = vmul.f32 %v2375_v8, %v8233_v42  ;;  %v2552_v42 = vmul.f32 %v8630_v29, %v8201_v1 }
 0x35d   : > { %3272 = vrot.lane.b32.xlu1 %v5625_v47, %s9666_s13  ;;  %v8658_v60 = vpop.permute.xlu0 %2384  ;;  %v5634_v47 = vpack.c.bf16 %v8471_v9, %v8471_v9  ;;  %v5635_v9 = vpack.c.bf16 %v8550_v7, %v8550_v7  ;;  %v2543_v7 = vmul.f32 %v8403_v45, %v8017_v39  ;;  %v5639_v39 = vpack.c.bf16 %v8596_v26, %v8596_v26 }
 0x35e   : > { %v8782_v17 = vmul.f32 %v8009_v50, %v2553_v0  ;;  %v9877_v0 = vld [vmem:[#allocation23_spill] sm:$0xff] }
 0x35f   : > { %v8662_v33 = vpop.permute.xlu1 %2438  ;;  %3278 = vrot.lane.b32.xlu0 %v5628_v44, %s9666_s13  ;;  %v8734_v45 = vmul.f32 %v7987_v21, %v2543_v7  ;;  %v2540_v21 = vmul.f32 %v8391_v3, %v8012_v40  ;;  %v8765_v40 = vmul.f32 %v7952_v37, %v2541_v31 }
 0x361   : > { %3276 = vrot.lane.b32.xlu1 %v5627_v49, %s9666_s13  ;;  %v8668_v46 = vpop.permute.xlu0 %2448  ;;  %v8775_v55 = vmul.f32 %v7983_v62, %v2540_v21  ;;  %v2549_v62 = vmul.f32 %v8600_v16, %v8164_v35  ;;  %v9868_v35 = vld [vmem:[#allocation54_spill] sm:$0xff]  ;;  %v9869_v16 = vld [vmem:[#allocation125_spill] sm:$0xff] }
 0x363   : > { %v3217_v51 = vpop.permute.xlu1 %3216  ;;  %3282 = vrot.lane.b32.xlu0 %v5630_v11, %s9666_s13  ;;  %v5881_v1 = vpack.i.bf16 %v8765_v40, %v8775_v55 }
 0x364   : > { %3391 = vst.msk [vmem:[%s8221_s19 + $0x48] sm:$0xf] %vm3372_vm1, %v3217_v51 }
 0x365   : > { %3280 = vrot.lane.b32.xlu1 %v5629_v57, %s9666_s13  ;;  %v3207_v52 = vpop.permute.xlu0 %3206 }
 0x366   : > { %3386 = vst.msk [vmem:[%s8221_s19 + $0x34] sm:$0xf] %vm3372_vm1, %v3207_v52 }
 0x367   : > { %v8682_v4 = vpop.permute.xlu1 %2386  ;;  %3286 = vrot.lane.b32.xlu0 %v5632_v59, %s9666_s13  ;;  %v5640_v59 = vpack.c.bf16 %v8616_v48, %v8616_v48  ;;  %v9867_v48 = vld [vmem:[#allocation126_spill] sm:$0xff] }
 0x368   : > { %v2548_v29 = vmul.f32 %v9867_v48, %v8138_v13  ;;  %v9882_v48 = vld [vmem:[#allocation27_spill] sm:$0xff] }
 0x369   : > { %3284 = vrot.lane.b32.xlu1 %v5631_v12, %s9666_s13  ;;  %v8688_v25 = vpop.permute.xlu0 %2380  ;;  %v2547_v12 = vmul.f32 %v8508_v18, %v8073_v36  ;;  %v8746_v18 = vmul.f32 %v7954_v23, %v2542_v22  ;;  %v8762_v23 = vmul.f32 %v7958_v34, %v2546_v53  ;;  %v2544_v34 = vmul.f32 %v8505_v61, %v8070_v19 }
 0x36a   : > { %v8793_v19 = vmul.f32 %v7964_v32, %v2552_v42  ;;  %v9879_v42 = vld [vmem:[#allocation96_spill] sm:$0xff] }
 0x36b   : > { %v8692_v44 = vpop.permute.xlu1 %2450  ;;  %3290 = vrot.lane.b32.xlu0 %v5634_v47, %s9666_s13  ;;  %v8751_v26 = vmul.f32 %v7997_v28, %v2547_v12  ;;  %v5876_v27 = vpack.i.bf16 %v8734_v45, %v8746_v18  ;;  %v2545_v28 = vmul.f32 %v8552_v6, %v8107_v20  ;;  %v8797_v61 = vmul.f32 %v7956_v5, %v2544_v34 }
 0x36d   : > { %3288 = vrot.lane.b32.xlu1 %v5633_v30, %s9666_s13  ;;  %v8698_v49 = vpop.permute.xlu0 %2444  ;;  %v5891_v37 = vpack.i.bf16 %v8751_v26, %v8762_v23  ;;  %v8788_v6 = vmul.f32 %v7991_v10, %v2545_v28  ;;  %v5906_v10 = vpack.i.bf16 %v8782_v17, %v8793_v19  ;;  %v2551_v30 = vmul.f32 %v9869_v16, %v9868_v35  ;;  %v9885_v16 = vld [vmem:[#allocation79_spill] sm:$0xff] }
 0x36f   : > { %v3213_v11 = vpop.permute.xlu1 %3212  ;;  %3294 = vrot.lane.b32.xlu0 %v5636_v38, %s9666_s13  ;;  %v5886_v32 = vpack.i.bf16 %v8788_v6, %v8797_v61  ;;  %v9870_v38 = vld [vmem:[#allocation11_spill] sm:$0xff] }
 0x370   : > { %3389 = vst.msk [vmem:[%s8221_s19 + $0x40] sm:$0xf] %vm3372_vm1, %v3213_v11  ;;  %v8811_v5 = vmul.f32 %v9870_v38, %v2549_v62  ;;  %v9871_v11 = vld [vmem:[#allocation46_spill] sm:$0xff] }
 0x371   : > { %3292 = vrot.lane.b32.xlu1 %v5635_v9, %s9666_s13  ;;  %v3219_v51 = vpop.permute.xlu0 %3218  ;;  %v9872_v9 = vld [vmem:[#allocation122_spill] sm:$0xff] }
 0x372   : > { %3392 = vst.msk [vmem:[%s8221_s19 + $0x4c] sm:$0xf] %vm3372_vm1, %v3219_v51  ;;  %v2550_v51 = vmul.f32 %v9872_v9, %v9871_v11  ;;  %v9886_v9 = vld [vmem:[#allocation78_spill] sm:$0xff] }
 0x373   : > { %v8712_v57 = vpop.permute.xlu1 %2382  ;;  %3298 = vrot.lane.b32.xlu0 %v5638_v54, %s9666_s13  ;;  %v9873_v54 = vld [vmem:[#allocation22_spill] sm:$0xff] }
 0x375   : > { %3296 = vrot.lane.b32.xlu1 %v5637_v15, %s9666_s13  ;;  %v8720_v52 = vpop.permute.xlu0 %2392  ;;  %v8819_v15 = vmul.f32 %v9873_v54, %v2548_v29  ;;  %v9887_v54 = vld [vmem:[#allocation21_spill] sm:$0xff] }
 0x377   : > { %v8728_v47 = vpop.permute.xlu1 %2446  ;;  %3302 = vrot.lane.b32.xlu0 %v5640_v59, %s9666_s13  ;;  %v9874_v59 = vld [vmem:[#allocation13_spill] sm:$0xff]  ;;  %v5896_v12 = vpack.i.bf16 %v8811_v5, %v8819_v15 }
 0x378   : > { %v8825_v22 = vmul.f32 %v9874_v59, %v2551_v30  ;;  %v2556_v30 = vmul.f32 %v8688_v25, %v9885_v16  ;;  %v9888_v25 = vld [vmem:[#allocation73_spill] sm:$0xff] }
 0x379   : > { %3300 = vrot.lane.b32.xlu1 %v5639_v39, %s9666_s13  ;;  %v8741_v36 = vpop.permute.xlu0 %2456  ;;  %v9875_v39 = vld [vmem:[#allocation68_spill] sm:$0xff] }
 0x37a   : > { %v2555_v53 = vmul.f32 %v8624_v58, %v9875_v39  ;;  %v9880_v58 = vld [vmem:[#allocation16_spill] sm:$0xff]  ;;  %v9889_v39 = vld [vmem:[#allocation25_spill] sm:$0xff] }
 0x37b   : > { %v3225_v14 = vpop.permute.xlu1 %3224  ;;  %3306 = vrot.lane.b32.xlu0 %v5642_v2, %s9666_s13  ;;  %v9876_v2 = vld [vmem:[#allocation91_spill] sm:$0xff] }
 0x37c   : > { %3395 = vst.msk [vmem:[%s8221_s19 + $0x58] sm:$0xf] %vm3372_vm1, %v3225_v14  ;;  %v8835_v14 = vmul.f32 %v9877_v0, %v2550_v51  ;;  %v2559_v51 = vmul.f32 %v8682_v4, %v9886_v9  ;;  %v9892_v0 = vld [vmem:[#allocation90_spill] sm:$0xff] }
 0x37d   : > { %3304 = vrot.lane.b32.xlu1 %v5641_v43, %s9666_s13  ;;  %v3215_v3 = vpop.permute.xlu0 %3214  ;;  %v9878_v43 = vld [vmem:[#allocation61_spill] sm:$0xff]  ;;  %s5126_s13 = sshll.u32 %s8221_s19, 4  ;;  %s9458_s13 = int_to_ptr.vmem [resolvable:$true] %s5126_s13 }
 0x37e   : > { %3390 = vst.msk [vmem:[%s8221_s19 + $0x44] sm:$0xf] %vm3372_vm1, %v3215_v3  ;;  %v5901_v34 = vpack.i.bf16 %v8825_v22, %v8835_v14 }
 0x37f   : > { %v2395_v20 = vpop.permute.xlu1 %2394  ;;  %5877 = vrot.lane.b32.xlu0 %v5876_v27, %s6816_s22  ;;  %v2554_v27 = vmul.f32 %v8605_v24, %v9878_v43 }
 0x380   : > { %v2563_v43 = vmul.f32 %v2395_v20, %v9892_v0  ;;  %v9903_v0 = vld [vmem:[#allocation29_spill] sm:$0xff] }
 0x381   : > { %5892 = vrot.lane.b32.xlu1 %v5891_v37, %s6816_s22  ;;  %v2389_v50 = vpop.permute.xlu0 %2388  ;;  %v8844_v37 = vmul.f32 %v9880_v58, %v2555_v53  ;;  %v8877_v53 = vmul.f32 %v9889_v39, %v2556_v30 }
 0x382   : > { %v2560_v21 = vmul.f32 %v2389_v50, %v9876_v2  ;;  %v9890_v2 = vld [vmem:[#allocation31_spill] sm:$0xff] }
 0x383   : > { %v8803_v8 = vpop.permute.xlu1 %2458  ;;  %5882 = vrot.lane.b32.xlu0 %v5881_v1, %s6816_s22  ;;  %v9881_v1 = vld [vmem:[#allocation84_spill] sm:$0xff]  ;;  %v8883_v4 = vmul.f32 %v9890_v2, %v2559_v51  ;;  %v9902_v2 = vld [vmem:[#allocation97_spill] sm:$0xff] }
 0x384   : > { %v2557_v62 = vmul.f32 %v8712_v57, %v9881_v1  ;;  %v8849_v29 = vmul.f32 %v9882_v48, %v2560_v21  ;;  %v9895_v1 = vld [vmem:[#allocation37_spill] sm:$0xff]  ;;  %v9897_v48 = vld [vmem:[#allocation28_spill] sm:$0xff] }
 0x385   : > { %5907 = vrot.lane.b32.xlu1 %v5906_v10, %s6816_s22  ;;  %v8814_v13 = vpop.permute.xlu0 %2452  ;;  %v9883_v10 = vld [vmem:[#allocation34_spill] sm:$0xff]  ;;  %9891 = vst [vmem:[#allocation126_spill] sm:$0xff] %v8883_v4 }
 0x387   : > { %v3221_v7 = vpop.permute.xlu1 %3220  ;;  %5887 = vrot.lane.b32.xlu0 %v5886_v32, %s6816_s22  ;;  %v9884_v32 = vld [vmem:[#allocation24_spill] sm:$0xff] }
 0x388   : > { %3393 = vst.msk [vmem:[%s8221_s19 + $0x50] sm:$0xf] %vm3372_vm1, %v3221_v7  ;;  %v8855_v35 = vmul.f32 %v9884_v32, %v2554_v27  ;;  %v8869_v7 = vmul.f32 %v9887_v54, %v2557_v62  ;;  %v8899_v62 = vmul.f32 %v9895_v1, %v2563_v43  ;;  %v9900_v54 = vld [vmem:[#allocation102_spill] sm:$0xff] }
 0x389   : > { %v3227_v31 = vpop.permute.xlu0 %3226 }
 0x38a   : > { %3396 = vst.msk [vmem:[%s8221_s19 + $0x5c] sm:$0xf] %vm3372_vm1, %v3227_v31  ;;  %v5911_v11 = vpack.i.bf16 %v8844_v37, %v8855_v35  ;;  %v5916_v21 = vpack.i.bf16 %v8869_v7, %v8877_v53  ;;  %9896 = vst [vmem:[#allocation54_spill] sm:$0xff] %v8899_v62 }
 0x38b   : > { %v2391_v28 = vpop.permute.xlu1 %2390  ;;  %5897 = vrot.lane.b32.xlu0 %v5896_v12, %s6816_s22  ;;  %v2558_v12 = vmul.f32 %v8658_v60, %v9888_v25  ;;  %v9893_v60 = vld [vmem:[#allocation26_spill] sm:$0xff] }
 0x38c   : > { %v2561_v3 = vmul.f32 %v2391_v28, %v9879_v42  ;;  %v9894_v42 = vld [vmem:[#allocation85_spill] sm:$0xff] }
 0x38d   : > { %v2401_v50 = vpop.permute.xlu0 %2400  ;;  %v8891_v28 = vmul.f32 %v9893_v60, %v2558_v12  ;;  %v9901_v12 = vld [vmem:[#allocation108_spill] sm:$0xff] }
 0x38e   : > { %v8852_v24 = vmul.f32 %v9883_v10, %v2561_v3  ;;  %v2562_v3 = vmul.f32 %v8720_v52, %v9894_v42 }
 0x38f   : > { %v8859_v38 = vpop.permute.xlu1 %2454  ;;  %5902 = vrot.lane.b32.xlu0 %v5901_v34, %s6816_s22  ;;  %v5921_v58 = vpack.i.bf16 %v8883_v4, %v8891_v28 }
 0x390   : > { %v5926_v57 = vpack.i.bf16 %v8852_v24, %v8849_v29  ;;  %v8902_v10 = vmul.f32 %v9897_v48, %v2562_v3  ;;  %v9907_v3 = vld [vmem:[#allocation43_spill] sm:$0xff] }
 0x391   : > { %v8871_v59 = vpop.permute.xlu0 %2464 }
 0x392   : > { %5927 = vrot.lane.b32.xlu1 %v5926_v57, %s6816_s22  ;;  %9898 = vst [vmem:[#allocation125_spill] sm:$0xff] %v8902_v10  ;;  %v5931_v52 = vpack.i.bf16 %v8899_v62, %v8902_v10  ;;  %v9948_v62 = vld [vmem:[#allocation128_spill] sm:$0xff]  ;;  %v9950_v10 = vld [vmem:[#allocation45_spill] sm:$0xff] }
 0x393   : > { %v3233_v31 = vpop.permute.xlu1 %3232  ;;  %5912 = vrot.lane.b32.xlu0 %v5911_v11, %s6816_s22  ;;  %v9899_v11 = vld [vmem:[#allocation103_spill] sm:$0xff] }
 0x394   : > { %3399 = vst.msk [vmem:[%s8221_s19 + $0x68] sm:$0xf] %vm3372_vm1, %v3233_v31 }
 0x395   : > { %v3223_v27 = vpop.permute.xlu0 %3222 }
 0x396   : > { %3394 = vst.msk [vmem:[%s8221_s19 + $0x54] sm:$0xf] %vm3372_vm1, %v3223_v27  ;;  %v9905_v27 = vld [vmem:[#allocation39_spill] sm:$0xff] }
 0x397   : > { %v2403_v34 = vpop.permute.xlu1 %2402  ;;  %5917 = vrot.lane.b32.xlu0 %v5916_v21, %s6816_s22  ;;  %v2566_v21 = vmul.f32 %v2401_v50, %v9902_v2 }
 0x398   : > { %v2567_v25 = vmul.f32 %v2403_v34, %v9900_v54  ;;  %v9913_v54 = vld [vmem:[#allocation113_spill] sm:$0xff] }
 0x399   : > { %v2397_v20 = vpop.permute.xlu0 %2396 }
 0x39a   : > { %v2564_v9 = vmul.f32 %v2397_v20, %v9899_v11  ;;  %v9909_v20 = vld [vmem:[#allocation9_spill] sm:$0xff] }
 0x39b   : > { %v8904_v32 = vpop.permute.xlu1 %2466  ;;  %5922 = vrot.lane.b32.xlu0 %v5921_v58, %s6816_s22  ;;  %v8929_v58 = vmul.f32 %v9907_v3, %v2567_v25  ;;  %v8936_v48 = vmul.f32 %v9909_v20, %v2566_v21  ;;  %v9915_v21 = vld [vmem:[#allocation19_spill] sm:$0xff]  ;;  %v9917_v3 = vld [vmem:[#allocation12_spill] sm:$0xff] }
 0x39c   : > { %v8921_v43 = vmul.f32 %v9903_v0, %v2564_v9  ;;  %v9916_v0 = vld [vmem:[#allocation104_spill] sm:$0xff] }
 0x39d   : > { %v8909_v16 = vpop.permute.xlu0 %2460  ;;  %9908 = vst [vmem:[#allocation122_spill] sm:$0xff] %v8929_v58  ;;  %9910 = vst [vmem:[#allocation22_spill] sm:$0xff] %v8936_v48  ;;  %v9919_v20 = vld [vmem:[#allocation48_spill] sm:$0xff] }
 0x39e   : > { %9904 = vst [vmem:[#allocation11_spill] sm:$0xff] %v8921_v43 }
 0x39f   : > { %v3229_v30 = vpop.permute.xlu1 %3228  ;;  %5932 = vrot.lane.b32.xlu0 %v5931_v52, %s6816_s22  ;;  %v5941_v52 = vpack.i.bf16 %v8929_v58, %v8936_v48  ;;  %v9923_v58 = vld [vmem:[#allocation52_spill] sm:$0xff]  ;;  %v9931_v48 = vld [vmem:[#allocation55_spill] sm:$0xff] }
 0x3a0   : > { %3397 = vst.msk [vmem:[%s8221_s19 + $0x60] sm:$0xf] %vm3372_vm1, %v3229_v30 }
 0x3a1   : > { %v3235_v57 = vpop.permute.xlu0 %3234 }
 0x3a2   : > { %3400 = vst.msk [vmem:[%s8221_s19 + $0x6c] sm:$0xf] %vm3372_vm1, %v3235_v57  ;;  %v9911_v57 = vld [vmem:[#allocation109_spill] sm:$0xff] }
 0x3a3   : > { %v2399_v51 = vpop.permute.xlu1 %2398 }
 0x3a4   : > { %v2565_v39 = vmul.f32 %v2399_v51, %v9901_v12  ;;  %v9912_v51 = vld [vmem:[#allocation35_spill] sm:$0xff]  ;;  %v9914_v12 = vld [vmem:[#allocation114_spill] sm:$0xff] }
 0x3a5   : > { %v2409_v31 = vpop.permute.xlu0 %2408  ;;  %v2573_v25 = vmul.f32 %v9913_v54, %v9912_v51 }
 0x3a6   : > { %v8924_v60 = vmul.f32 %v9905_v27, %v2565_v39  ;;  %v2570_v11 = vmul.f32 %v2409_v31, %v9911_v57  ;;  %v2572_v27 = vmul.f32 %v9916_v0, %v9915_v21  ;;  %v9927_v0 = vld [vmem:[#allocation14_spill] sm:$0xff] }
 0x3a7   : > { %v8926_v42 = vpop.permute.xlu1 %2462  ;;  %v8963_v51 = vmul.f32 %v9923_v58, %v2573_v25 }
 0x3a8   : > { %9906 = vst [vmem:[#allocation46_spill] sm:$0xff] %v8924_v60  ;;  %v5936_v34 = vpack.i.bf16 %v8924_v60, %v8921_v43 }
 0x3a9   : > { %v8933_v1 = vpop.permute.xlu0 %2472  ;;  %9924 = vst [vmem:[#allocation91_spill] sm:$0xff] %v8963_v51 }
 0x3aa   : > { %5937 = vrot.lane.b32.xlu0 %v5936_v34, %s6816_s22  ;;  %v8953_v34 = vmul.f32 %v9917_v3, %v2570_v11  ;;  %v9926_v11 = vld [vmem:[#allocation101_spill] sm:$0xff]  ;;  %v9929_v3 = vld [vmem:[#allocation42_spill] sm:$0xff] }
 0x3ab   : > { %v3241_v50 = vpop.permute.xlu1 %3240 }
 0x3ac   : > { %3403 = vst.msk [vmem:[%s8221_s19 + $0x78] sm:$0xf] %vm3372_vm1, %v3241_v50  ;;  %9918 = vst [vmem:[#allocation13_spill] sm:$0xff] %v8953_v34 }
 0x3ad   : > { %v3231_v30 = vpop.permute.xlu0 %3230 }
 0x3ae   : > { %3398 = vst.msk [vmem:[%s8221_s19 + $0x64] sm:$0xf] %vm3372_vm1, %v3231_v30  ;;  %5942 = vrot.lane.b32.xlu0 %v5941_v52, %s6816_s22  ;;  %v9921_v52 = vld [vmem:[#allocation20_spill] sm:$0xff]  ;;  %v9922_v30 = vld [vmem:[#allocation106_spill] sm:$0xff] }
 0x3af   : > { %v2411_v9 = vpop.permute.xlu1 %2410  ;;  %v2575_v57 = vmul.f32 %v9922_v30, %v9921_v52 }
 0x3b0   : > { %v2571_v39 = vmul.f32 %v2411_v9, %v9914_v12  ;;  %v9925_v12 = vld [vmem:[#allocation17_spill] sm:$0xff] }
 0x3b1   : > { %v2405_v2 = vpop.permute.xlu0 %2404  ;;  %v2574_v21 = vmul.f32 %v9926_v11, %v9925_v12  ;;  %v8978_v58 = vmul.f32 %v9931_v48, %v2575_v57  ;;  %v9937_v48 = vld [vmem:[#allocation62_spill] sm:$0xff] }
 0x3b2   : > { %v8956_v31 = vmul.f32 %v9919_v20, %v2571_v39  ;;  %v8972_v39 = vmul.f32 %v9927_v0, %v2572_v27  ;;  %v9930_v20 = vld [vmem:[#allocation120_spill] sm:$0xff]  ;;  %v9935_v27 = vld [vmem:[#allocation15_spill] sm:$0xff] }
 0x3b3   : > { %v8958_v50 = vpop.permute.xlu1 %2474  ;;  %v2579_v52 = vmul.f32 %v9930_v20, %v9929_v3  ;;  %9932 = vst [vmem:[#allocation61_spill] sm:$0xff] %v8978_v58  ;;  %v8987_v0 = vmul.f32 %v9935_v27, %v2574_v21  ;;  %v9939_v3 = vld [vmem:[#allocation51_spill] sm:$0xff]  ;;  %v9940_v20 = vld [vmem:[#allocation124_spill] sm:$0xff] }
 0x3b4   : > { %9920 = vst [vmem:[#allocation68_spill] sm:$0xff] %v8956_v31  ;;  %v5951_v9 = vpack.i.bf16 %v8956_v31, %v8953_v34  ;;  %9928 = vst [vmem:[#allocation23_spill] sm:$0xff] %v8972_v39  ;;  %v5956_v25 = vpack.i.bf16 %v8963_v51, %v8972_v39  ;;  %v9933_v31 = vld [vmem:[#allocation33_spill] sm:$0xff]  ;;  %v9934_v34 = vld [vmem:[#allocation112_spill] sm:$0xff] }
 0x3b5   : > { %v8967_v54 = vpop.permute.xlu0 %2468  ;;  %v2578_v12 = vmul.f32 %v9934_v34, %v9933_v31  ;;  %v8994_v57 = vmul.f32 %v9937_v48, %v2579_v52  ;;  %v5961_v34 = vpack.i.bf16 %v8978_v58, %v8987_v0  ;;  %v9941_v31 = vld [vmem:[#allocation64_spill] sm:$0xff]  ;;  %v9942_v27 = vld [vmem:[#allocation119_spill] sm:$0xff]  ;;  %v9947_v48 = vld [vmem:[#allocation58_spill] sm:$0xff] }
 0x3b6   : > { %5952 = vrot.lane.b32.xlu0 %v5951_v9, %s6816_s22  ;;  %v9936_v9 = vld [vmem:[#allocation115_spill] sm:$0xff]  ;;  %v2581_v21 = vmul.f32 %v8609_v63, %v9941_v31  ;;  %v2580_v4 = vmul.f32 %v9948_v62, %v9947_v48  ;;  %v9952_v62 = vld [vmem:[#allocation57_spill] sm:$0xff] }
 0x3b7   : > { %v3237_v30 = vpop.permute.xlu1 %3236  ;;  %v2568_v60 = vmul.f32 %v2405_v2, %v9936_v9  ;;  %9938 = vst [vmem:[#allocation96_spill] sm:$0xff] %v8994_v57  ;;  %v9943_v2 = vld [vmem:[#allocation30_spill] sm:$0xff]  ;;  %v9958_v48 = vld [vmem:[#allocation49_spill] sm:$0xff] }
 0x3b8   : > { %3401 = vst.msk [vmem:[%s8221_s19 + $0x70] sm:$0xf] %vm3372_vm1, %v3237_v30  ;;  %v2577_v30 = vmul.f32 %v9940_v20, %v9939_v3  ;;  %v9004_v9 = vmul.f32 %v9943_v2, %v2578_v12  ;;  %v9949_v3 = vld [vmem:[#allocation10_spill] sm:$0xff] }
 0x3b9   : > { %v3263_v11 = vpop.permute.xlu0 %3262  ;;  %v9011_v20 = vmul.f32 %v9949_v3, %v2568_v60  ;;  %v9954_v2 = vld [vmem:[#allocation66_spill] sm:$0xff]  ;;  %v9959_v3 = vld [vmem:[#allocation123_spill] sm:$0xff] }
 0x3ba   : > { %3414 = vst.msk [vmem:[%s8221_s19 + $0xa4] sm:$0xf] %vm3372_vm1, %v3263_v11  ;;  %5957 = vrot.lane.b32.xlu0 %v5956_v25, %s6816_s22  ;;  %9944 = vst [vmem:[#allocation16_spill] sm:$0xff] %v9004_v9  ;;  %v9945_v11 = vld [vmem:[#allocation41_spill] sm:$0xff]  ;;  %v9946_v25 = vld [vmem:[#allocation118_spill] sm:$0xff]  ;;  %v5971_v63 = vpack.i.bf16 %v8994_v57, %v9004_v9 }
 0x3bb   : > { %v2407_v51 = vpop.permute.xlu1 %2406  ;;  %v2576_v43 = vmul.f32 %v9946_v25, %v9945_v11  ;;  %v9029_v11 = vmul.f32 %v9954_v2, %v2581_v21  ;;  %v9957_v25 = vld [vmem:[#allocation18_spill] sm:$0xff]  ;;  %v9960_v57 = vld [vmem:[#allocation32_spill] sm:$0xff] }
 0x3bc   : > { %v2569_v39 = vmul.f32 %v2407_v51, %v9942_v27  ;;  %v9951_v51 = vld [vmem:[#allocation59_spill] sm:$0xff]  ;;  %v9041_v9 = vmul.f32 %v9960_v57, %v2580_v4  ;;  %v9964_v57 = vld [vmem:[#allocation72_spill] sm:$0xff] }
 0x3bd   : > { %v3243_v52 = vpop.permute.xlu0 %3242  ;;  %v9022_v12 = vmul.f32 %v9951_v51, %v2577_v30  ;;  %v9953_v27 = vld [vmem:[#allocation127_spill] sm:$0xff]  ;;  %9955 = vst [vmem:[#allocation84_spill] sm:$0xff] %v9029_v11  ;;  %v2582_v51 = vmul.f32 %v9959_v3, %v9958_v48  ;;  %v9967_v48 = vld [vmem:[#allocation129_spill] sm:$0xff] }
 0x3be   : > { %v9014_v58 = vmul.f32 %v9950_v10, %v2569_v39  ;;  %3404 = vst.msk [vmem:[%s8221_s19 + $0x7c] sm:$0xf] %vm3372_vm1, %v3243_v52  ;;  %5962 = vrot.lane.b32.xlu0 %v5961_v34, %s6816_s22  ;;  %v2583_v60 = vmul.f32 %v9953_v27, %v9952_v62  ;;  %v9956_v10 = vld [vmem:[#allocation75_spill] sm:$0xff]  ;;  %v9036_v52 = vmul.f32 %v9957_v25, %v2576_v43  ;;  %v9962_v43 = vld [vmem:[#allocation70_spill] sm:$0xff] }
 0x3bf   : > { %v9024_v31 = vpop.permute.xlu1 %2470  ;;  %v2585_v39 = vmul.f32 %v8662_v33, %v9956_v10  ;;  %v9961_v62 = vld [vmem:[#allocation71_spill] sm:$0xff]  ;;  %v2587_v27 = vmul.f32 %v8634_v56, %v9962_v43  ;;  %v9963_v10 = vld [vmem:[#allocation69_spill] sm:$0xff] }
 0x3c0   : > { %v5946_v34 = vpack.i.bf16 %v9014_v58, %v9011_v20  ;;  %v2584_v21 = vmul.f32 %v8640_v41, %v9961_v62  ;;  %v5966_v33 = vpack.i.bf16 %v9022_v12, %v9036_v52  ;;  %v9054_v4 = vmul.f32 %v9963_v10, %v2583_v60  ;;  %v9968_v62 = vld [vmem:[#allocation36_spill] sm:$0xff]  ;;  %v9969_v60 = vld [vmem:[#allocation38_spill] sm:$0xff] }
 0x3c1   : > { %v3239_v30 = vpop.permute.xlu0 %3238  ;;  %v5976_v41 = vpack.i.bf16 %v9029_v11, %v9041_v9  ;;  %v9059_v25 = vmul.f32 %v9964_v57, %v2585_v39  ;;  %v9068_v43 = vmul.f32 %v9968_v62, %v2582_v51  ;;  %v9970_v11 = vld [vmem:[#allocation82_spill] sm:$0xff]  ;;  %v9972_v57 = vld [vmem:[#allocation81_spill] sm:$0xff] }
 0x3c2   : > { %3402 = vst.msk [vmem:[%s8221_s19 + $0x74] sm:$0xf] %vm3372_vm1, %v3239_v30  ;;  %5972 = vrot.lane.b32.xlu0 %v5971_v63, %s6816_s22  ;;  %5947 = vrot.lane.b32.xlu1 %v5946_v34, %s6816_s22  ;;  %v9965_v30 = vld [vmem:[#allocation87_spill] sm:$0xff]  ;;  %v9966_v34 = vld [vmem:[#allocation65_spill] sm:$0xff]  ;;  %v9071_v10 = vmul.f32 %v9969_v60, %v2584_v21  ;;  %v2588_v39 = vmul.f32 %v8698_v49, %v9970_v11  ;;  %v9978_v60 = vld [vmem:[#allocation44_spill] sm:$0xff] }
 0x3c3   : > { %v3261_v2 = vpop.permute.xlu1 %3260  ;;  %v2589_v63 = vmul.f32 %v8728_v47, %v9965_v30  ;;  %v2586_v3 = vmul.f32 %v9967_v48, %v9966_v34  ;;  %v9971_v47 = vld [vmem:[#allocation74_spill] sm:$0xff]  ;;  %v2591_v51 = vmul.f32 %v8692_v44, %v9972_v57  ;;  %v5981_v21 = vpack.i.bf16 %v9054_v4, %v9068_v43  ;;  %v9973_v11 = vld [vmem:[#allocation77_spill] sm:$0xff]  ;;  %v9975_v48 = vld [vmem:[#allocation99_spill] sm:$0xff] }
 0x3c4   : > { %3413 = vst.msk [vmem:[%s8221_s19 + $0xa0] sm:$0xf] %vm3372_vm1, %v3261_v2  ;;  %v9080_v2 = vmul.f32 %v9971_v47, %v2587_v27  ;;  %v5986_v49 = vpack.i.bf16 %v9059_v25, %v9071_v10  ;;  %v9977_v44 = vld [vmem:[#allocation76_spill] sm:$0xff]  ;;  %v9101_v47 = vmul.f32 %v9978_v60, %v2588_v39  ;;  %v9979_v57 = vld [vmem:[#allocation94_spill] sm:$0xff] }
 0x3c5   : > { %v3267_v56 = vpop.permute.xlu0 %3266  ;;  %v9089_v34 = vmul.f32 %v9973_v11, %v2589_v63  ;;  %v2592_v63 = vmul.f32 %v8814_v13, %v9979_v57  ;;  %v9981_v11 = vld [vmem:[#allocation93_spill] sm:$0xff]  ;;  %v9985_v60 = vld [vmem:[#allocation88_spill] sm:$0xff] }
 0x3c6   : > { %3416 = vst.msk [vmem:[%s8221_s19 + $0xac] sm:$0xf] %vm3372_vm1, %v3267_v56  ;;  %5977 = vrot.lane.b32.xlu0 %v5976_v41, %s6816_s22  ;;  %5967 = vrot.lane.b32.xlu1 %v5966_v33, %s6816_s22  ;;  %v2593_v41 = vmul.f32 %v8859_v38, %v9975_v48  ;;  %v9976_v33 = vld [vmem:[#allocation40_spill] sm:$0xff]  ;;  %v2590_v56 = vmul.f32 %v8668_v46, %v9977_v44  ;;  %v9982_v48 = vld [vmem:[#allocation83_spill] sm:$0xff]  ;;  %v9983_v44 = vld [vmem:[#allocation117_spill] sm:$0xff] }
 0x3c7   : > { %v3265_v30 = vpop.permute.xlu1 %3264  ;;  %9974 = vst [vmem:[#allocation27_spill] sm:$0xff] %v9089_v34  ;;  %v9096_v27 = vmul.f32 %v9976_v33, %v2586_v3  ;;  %v9980_v3 = vld [vmem:[#allocation80_spill] sm:$0xff]  ;;  %v5996_v39 = vpack.i.bf16 %v9089_v34, %v9101_v47  ;;  %v2595_v13 = vmul.f32 %v8803_v8, %v9981_v11  ;;  %v2594_v57 = vmul.f32 %v8741_v36, %v9985_v60  ;;  %v9987_v8 = vld [vmem:[#allocation107_spill] sm:$0xff]  ;;  %v9993_v60 = vld [vmem:[#allocation110_spill] sm:$0xff] }
 0x3c8   : > { %3415 = vst.msk [vmem:[%s8221_s19 + $0xa8] sm:$0xf] %vm3372_vm1, %v3265_v30  ;;  %v9112_v30 = vmul.f32 %v9980_v3, %v2591_v51  ;;  %v9119_v33 = vmul.f32 %v9982_v48, %v2593_v41  ;;  %v9986_v3 = vld [vmem:[#allocation50_spill] sm:$0xff]  ;;  %v2596_v41 = vmul.f32 %v8909_v16, %v9987_v8  ;;  %v9990_v16 = vld [vmem:[#allocation121_spill] sm:$0xff]  ;;  %v9994_v8 = vld [vmem:[#allocation111_spill] sm:$0xff] }
 0x3c9   : > { %v3271_v62 = vpop.permute.xlu0 %3270  ;;  %v5991_v38 = vpack.i.bf16 %v9080_v2, %v9096_v27  ;;  %v9131_v34 = vmul.f32 %v9986_v3, %v2592_v63  ;;  %v9989_v63 = vld [vmem:[#allocation63_spill] sm:$0xff]  ;;  %v2597_v3 = vmul.f32 %v8926_v42, %v9993_v60 }
 0x3ca   : > { %3418 = vst.msk [vmem:[%s8221_s19 + $0xb4] sm:$0xf] %vm3372_vm1, %v3271_v62  ;;  %5982 = vrot.lane.b32.xlu0 %v5981_v21, %s6816_s22  ;;  %5987 = vrot.lane.b32.xlu1 %v5986_v49, %s6816_s22  ;;  %v2600_v21 = vmul.f32 %v8967_v54, %v9983_v44  ;;  %v9984_v49 = vld [vmem:[#allocation47_spill] sm:$0xff]  ;;  %v2601_v44 = vmul.f32 %v9024_v31, %v9990_v16 }
 0x3cb   : > { %v3269_v46 = vpop.permute.xlu1 %3268  ;;  %v9126_v62 = vmul.f32 %v9984_v49, %v2590_v56  ;;  %v6006_v36 = vpack.i.bf16 %v9119_v33, %v9131_v34 }
 0x3cc   : > { %3417 = vst.msk [vmem:[%s8221_s19 + $0xb0] sm:$0xf] %vm3372_vm1, %v3269_v46  ;;  %v9988_v46 = vld [vmem:[#allocation86_spill] sm:$0xff]  ;;  %v9147_v48 = vmul.f32 %v9989_v63, %v2600_v21  ;;  %v9997_v63 = vld [vmem:[#allocation89_spill] sm:$0xff] }
 0x3cd   : > { %v3275_v51 = vpop.permute.xlu0 %3274  ;;  %v6001_v54 = vpack.i.bf16 %v9112_v30, %v9126_v62  ;;  %v9142_v11 = vmul.f32 %v9988_v46, %v2595_v13  ;;  %v9179_v16 = vmul.f32 %v9997_v63, %v2597_v3  ;;  %v10000_v3 = vld [vmem:[#allocation60_spill] sm:$0xff] }
 0x3ce   : > { %3420 = vst.msk [vmem:[%s8221_s19 + $0xbc] sm:$0xf] %vm3372_vm1, %v3275_v51  ;;  %5997 = vrot.lane.b32.xlu0 %v5996_v39, %s6816_s22  ;;  %5992 = vrot.lane.b32.xlu1 %v5991_v38, %s6816_s22  ;;  %v9991_v39 = vld [vmem:[#allocation53_spill] sm:$0xff]  ;;  %v9992_v51 = vld [vmem:[#allocation56_spill] sm:$0xff] }
 0x3cf   : > { %v3273_v56 = vpop.permute.xlu1 %3272  ;;  %v9154_v49 = vmul.f32 %v9991_v39, %v2594_v57  ;;  %v9157_v13 = vmul.f32 %v9992_v51, %v2596_v41  ;;  %v2602_v57 = vmul.f32 %v8933_v1, %v9994_v8  ;;  %v9999_v39 = vld [vmem:[#allocation116_spill] sm:$0xff] }
 0x3d0   : > { %3419 = vst.msk [vmem:[%s8221_s19 + $0xb8] sm:$0xf] %vm3372_vm1, %v3273_v56  ;;  %v9995_v56 = vld [vmem:[#allocation95_spill] sm:$0xff]  ;;  %v2603_v51 = vmul.f32 %v8958_v50, %v9999_v39 }
 0x3d1   : > { %v3279_v38 = vpop.permute.xlu0 %3278  ;;  %v6011_v21 = vpack.i.bf16 %v9142_v11, %v9154_v49  ;;  %v6142_v41 = vpack.i.bf16 %v9147_v48, %v9157_v13  ;;  %v9172_v46 = vmul.f32 %v9995_v56, %v2601_v44  ;;  %v9998_v44 = vld [vmem:[#allocation67_spill] sm:$0xff] }
 0x3d2   : > { %3422 = vst.msk [vmem:[%s8221_s19 + $0xc4] sm:$0xf] %vm3372_vm1, %v3279_v38  ;;  %6002 = vrot.lane.b32.xlu0 %v6001_v54, %s6816_s22  ;;  %6007 = vrot.lane.b32.xlu1 %v6006_v36, %s6816_s22  ;;  %v9996_v54 = vld [vmem:[#allocation100_spill] sm:$0xff]  ;;  %v9186_v38 = vmul.f32 %v9998_v44, %v2602_v57 }
 0x3d3   : > { %v3277_v31 = vpop.permute.xlu1 %3276  ;;  %v2598_v36 = vmul.f32 %v8871_v59, %v9996_v54  ;;  %v6147_v59 = vpack.i.bf16 %v9172_v46, %v9179_v16  ;;  %v10003_v54 = vld [vmem:[#allocation92_spill] sm:$0xff] }
 0x3d4   : > { %3421 = vst.msk [vmem:[%s8221_s19 + $0xc0] sm:$0xf] %vm3372_vm1, %v3277_v31 }
 0x3d5   : > { %v3283_v42 = vpop.permute.xlu0 %3282  ;;  %v9195_v31 = vmul.f32 %v10000_v3, %v2598_v36 }
 0x3d6   : > { %3424 = vst.msk [vmem:[%s8221_s19 + $0xcc] sm:$0xf] %vm3372_vm1, %v3283_v42  ;;  %6012 = vrot.lane.b32.xlu1 %v6011_v21, %s6816_s22  ;;  %6143 = vrot.lane.b32.xlu0 %v6142_v41, %s6816_s22  ;;  %v10001_v21 = vld [vmem:[#allocation105_spill] sm:$0xff]  ;;  %v10002_v41 = vld [vmem:[#allocation98_spill] sm:$0xff] }
 0x3d7   : > { %v3281_v1 = vpop.permute.xlu1 %3280  ;;  %v2599_v8 = vmul.f32 %v8904_v32, %v10001_v21  ;;  %v6152_v57 = vpack.i.bf16 %v9186_v38, %v9195_v31  ;;  %v9205_v56 = vmul.f32 %v10002_v41, %v2603_v51 }
 0x3d8   : > { %3423 = vst.msk [vmem:[%s8221_s19 + $0xc8] sm:$0xf] %vm3372_vm1, %v3281_v1 }
 0x3d9   : > { %v3287_v60 = vpop.permute.xlu0 %3286  ;;  %v9210_v36 = vmul.f32 %v10003_v54, %v2599_v8 }
 0x3da   : > { %3426 = vst.msk [vmem:[%s8221_s19 + $0xd4] sm:$0xf] %vm3372_vm1, %v3287_v60  ;;  %6148 = vrot.lane.b32.xlu0 %v6147_v59, %s6816_s22 }
 0x3db   : > { %v3285_v50 = vpop.permute.xlu1 %3284  ;;  %v6157_v63 = vpack.i.bf16 %v9205_v56, %v9210_v36 }
 0x3dc   : > { %3425 = vst.msk [vmem:[%s8221_s19 + $0xd0] sm:$0xf] %vm3372_vm1, %v3285_v50 }
 0x3dd   : > { %v3291_v42 = vpop.permute.xlu0 %3290 }
 0x3de   : > { %3428 = vst.msk [vmem:[%s8221_s19 + $0xdc] sm:$0xf] %vm3372_vm1, %v3291_v42  ;;  %6153 = vrot.lane.b32.xlu0 %v6152_v57, %s6816_s22 }
 0x3df   : > { %v3289_v32 = vpop.permute.xlu1 %3288 }
 0x3e0   : > { %3427 = vst.msk [vmem:[%s8221_s19 + $0xd8] sm:$0xf] %vm3372_vm1, %v3289_v32 }
 0x3e1   : > { %v3295_v1 = vpop.permute.xlu0 %3294 }
 0x3e2   : > { %3430 = vst.msk [vmem:[%s8221_s19 + $0xe4] sm:$0xf] %vm3372_vm1, %v3295_v1  ;;  %6158 = vrot.lane.b32.xlu0 %v6157_v63, %s6816_s22  ;;  %s9435_s22 = scalar_lea.hbm %s9560_s7, %s5708_s12  ;;  %s6699_s12 = sshll.u32 %s6817_s1, 4  ;;  %s6700_s12 = int_to_ptr.vmem [resolvable:$false] %s6699_s12 }
 0x3e3   : > { %v3293_v44 = vpop.permute.xlu1 %3292  ;;  %p6702_p0 = scmp.lt.s32.totalorder %s9440_s18, %s6700_s12 }
 0x3e4   : > { %3429 = vst.msk [vmem:[%s8221_s19 + $0xe0] sm:$0xf] %vm3372_vm1, %v3293_v44 }
 0x3e5   : > { %v3299_v39 = vpop.permute.xlu0 %3298 }
 0x3e6   : > { %3432 = vst.msk [vmem:[%s8221_s19 + $0xec] sm:$0xf] %vm3372_vm1, %v3299_v39 }
 0x3e7   : > { %v3297_v51 = vpop.permute.xlu1 %3296 }
 0x3e8   : > { %3431 = vst.msk [vmem:[%s8221_s19 + $0xe8] sm:$0xf] %vm3372_vm1, %v3297_v51 }
 0x3e9   : > { %v3303_v59 = vpop.permute.xlu0 %3302 }
 0x3ea   : > { %3434 = vst.msk [vmem:[%s8221_s19 + $0xf4] sm:$0xf] %vm3372_vm1, %v3303_v59 }
 0x3eb   : > { %v3301_v60 = vpop.permute.xlu1 %3300 }
 0x3ec   : > { %3433 = vst.msk [vmem:[%s8221_s19 + $0xf0] sm:$0xf] %vm3372_vm1, %v3301_v60 }
 0x3ed   : > { %v3307_v3 = vpop.permute.xlu0 %3306 }
 0x3ee   : > { %3436 = vst.msk [vmem:[%s8221_s19 + $0xfc] sm:$0xf] %vm3372_vm1, %v3307_v3 }
 0x3ef   : > { %v3305_v21 = vpop.permute.xlu1 %3304 }
 0x3f0   : > { %3435 = vst.msk [vmem:[%s8221_s19 + $0xf8] sm:$0xf] %vm3372_vm1, %v3305_v21 }
 0x3f1   : > { %v5878_v8 = vpop.permute.xlu0 %5877 }
 0x3f2   : > { %v5879_v32 = vunpack.i.l.bf16 %v5878_v8  ;;  %v5880_v44 = vunpack.i.h.bf16 %v5878_v8 }
 0x3f3   : > { %v5893_v3 = vpop.permute.xlu1 %5892 }
 0x3f4   : > { %v6166_v39 = vpack.i.bf16 %v8762_v23, %v5879_v32 }
 0x3f5   : > { %v5883_v50 = vpop.permute.xlu0 %5882 }
 0x3f6   : > { %v5884_v57 = vunpack.i.l.bf16 %v5883_v50  ;;  %v5885_v42 = vunpack.i.h.bf16 %v5883_v50 }
 0x3f8   : > { %v6162_v54 = vpack.i.bf16 %v8797_v61, %v5884_v57  ;;  %v6164_v63 = vpack.i.bf16 %v8788_v6, %v5885_v42  ;;  %v6168_v61 = vpack.i.bf16 %v8751_v26, %v5880_v44 }
 0x3f9   : > { %v5888_v41 = vpop.permute.xlu0 %5887 }
 0x3fa   : > { %v5889_v51 = vunpack.i.l.bf16 %v5888_v41 }
 0x3fc   : > { %v6016_v6 = vpack.i.bf16 %v8819_v15, %v5889_v51  ;;  %v5908_v15 = vpop.permute.xlu1 %5907 }
 0x3fd   : > { %v5898_v1 = vpop.permute.xlu0 %5897  ;;  %v5909_v32 = vunpack.i.l.bf16 %v5908_v15 }
 0x3fe   : > { %v5899_v60 = vunpack.i.l.bf16 %v5898_v1 }
 0x3ff   : > { %3437 = vxpose.xlu1.b32.start [1/4] (short) (narrow) %v8775_v55, 16  ;;  %v5890_v55 = vunpack.i.h.bf16 %v5888_v41  ;;  %v6034_v44 = vpack.i.bf16 %v8877_v53, %v5909_v32 }
 0x400   : > { %6163 = vxpose.xlu0.b32.start [1/4] (short) (narrow) %v6162_v54, 16  ;;  %v6180_v21 = vpack.i.bf16 %v8793_v19, %v5899_v60 }
 0x401   : > { %v5903_v59 = vpop.permute.xlu0 %5902  ;;  %v6018_v23 = vpack.i.bf16 %v8811_v5, %v5890_v55 }
 0x402   : > { %v5904_v26 = vunpack.i.l.bf16 %v5903_v59  ;;  %v5905_v42 = vunpack.i.h.bf16 %v5903_v59 }
 0x403   : > { %3438 = vxpose.xlu1.b32.cont [2/4] (short) (narrow) %v8765_v40, 16  ;;  %v5900_v40 = vunpack.i.h.bf16 %v5898_v1  ;;  %v5910_v1 = vunpack.i.h.bf16 %v5908_v15  ;;  %v10008_v15 = vld [vmem:[#allocation46_spill] sm:$0xff] }
 0x404   : > { %6165 = vxpose.xlu0.b32.cont [2/4] (short) (narrow) %v6164_v63, 16  ;;  %v6184_v54 = vpack.i.bf16 %v8855_v35, %v5904_v26  ;;  %v6186_v5 = vpack.i.bf16 %v8844_v37, %v5905_v42 }
 0x405   : > { %v5913_v8 = vpop.permute.xlu0 %5912  ;;  %v6182_v50 = vpack.i.bf16 %v8782_v17, %v5900_v40  ;;  %v6036_v35 = vpack.i.bf16 %v8869_v7, %v5910_v1 }
 0x406   : > { %v5914_v51 = vunpack.i.l.bf16 %v5913_v8  ;;  %v5915_v37 = vunpack.i.h.bf16 %v5913_v8  ;;  %v10007_v8 = vld [vmem:[#allocation11_spill] sm:$0xff] }
 0x407   : > { %3439 = vxpose.xlu1.b32.cont [3/4] (short) (narrow) %v8746_v18, 16  ;;  %v5894_v18 = vunpack.i.l.bf16 %v5893_v3 }
 0x408   : > { %6167 = vxpose.xlu0.b32.cont [3/4] (short) (narrow) %v6166_v39, 16  ;;  %v6038_v60 = vpack.i.bf16 %v8891_v28, %v5914_v51 }
 0x409   : > { %v6020_v57 = vpack.i.bf16 %v8835_v14, %v5894_v18  ;;  %v5918_v41 = vpop.permute.xlu0 %5917  ;;  %v10006_v18 = vld [vmem:[#allocation54_spill] sm:$0xff] }
 0x40a   : > { %v5919_v63 = vunpack.i.l.bf16 %v5918_v41  ;;  %v5920_v14 = vunpack.i.h.bf16 %v5918_v41 }
 0x40b   : > { %3440 = vxpose.xlu1.b32.end [4/4] (short) (narrow) %v8734_v45, 16  ;;  %v5895_v45 = vunpack.i.h.bf16 %v5893_v3  ;;  %v10004_v3 = vld [vmem:[#allocation125_spill] sm:$0xff] }
 0x40c   : > { %6169 = vxpose.xlu0.b32.end [4/4] (short) (narrow) %v6168_v61, 16  ;;  %v6198_v39 = vpack.i.bf16 %v8849_v29, %v5919_v63  ;;  %v10009_v63 = vld [vmem:[#allocation22_spill] sm:$0xff] }
 0x40d   : > { %v6022_v19 = vpack.i.bf16 %v8825_v22, %v5895_v45  ;;  %v5923_v17 = vpop.permute.xlu0 %5922  ;;  %v6200_v22 = vpack.i.bf16 %v8852_v24, %v5920_v14  ;;  %v10010_v14 = vld [vmem:[#allocation13_spill] sm:$0xff] }
 0x40e   : > { %v5924_v61 = vunpack.i.l.bf16 %v5923_v17  ;;  %v5925_v53 = vunpack.i.h.bf16 %v5923_v17 }
 0x40f   : > { %6017 = vxpose.xlu1.b32.start [1/4] (short) (narrow) %v6016_v6, 16  ;;  %v5928_v6 = vpop.permute.xlu1 %5927 }
 0x410   : > { %6181 = vxpose.xlu0.b32.start [1/4] (short) (narrow) %v6180_v21, 16  ;;  %v6202_v40 = vpack.i.bf16 %v10004_v3, %v5924_v61  ;;  %v5929_v29 = vunpack.i.l.bf16 %v5928_v6  ;;  %v10005_v21 = vld [vmem:[#allocation126_spill] sm:$0xff]  ;;  %v5930_v26 = vunpack.i.h.bf16 %v5928_v6  ;;  %v10012_v61 = vld [vmem:[#allocation68_spill] sm:$0xff] }
 0x411   : > { %v5933_v59 = vpop.permute.xlu0 %5932  ;;  %v6040_v7 = vpack.i.bf16 %v10005_v21, %v5915_v37 }
 0x412   : > { %v6052_v45 = vpack.i.bf16 %v10007_v8, %v5929_v29  ;;  %v6054_v42 = vpack.i.bf16 %v10008_v15, %v5930_v26  ;;  %v10014_v29 = vld [vmem:[#allocation91_spill] sm:$0xff]  ;;  %v10015_v8 = vld [vmem:[#allocation16_spill] sm:$0xff] }
 0x413   : > { %6019 = vxpose.xlu1.b32.cont [2/4] (short) (narrow) %v6018_v23, 16  ;;  %v6204_v23 = vpack.i.bf16 %v10006_v18, %v5925_v53 }
 0x414   : > { %6183 = vxpose.xlu0.b32.cont [2/4] (short) (narrow) %v6182_v50, 16 }
 0x417   : > { %6021 = vxpose.xlu1.b32.cont [3/4] (short) (narrow) %v6020_v57, 16 }
 0x418   : > { %6185 = vxpose.xlu0.b32.cont [3/4] (short) (narrow) %v6184_v54, 16  ;;  %v5934_v54 = vunpack.i.l.bf16 %v5933_v59 }
 0x41a   : > { %v6056_v17 = vpack.i.bf16 %v10009_v63, %v5934_v54  ;;  %v10017_v54 = vld [vmem:[#allocation96_spill] sm:$0xff] }
 0x41b   : > { %6023 = vxpose.xlu1.b32.end [4/4] (short) (narrow) %v6022_v19, 16 }
 0x41c   : > { %6187 = vxpose.xlu0.b32.end [4/4] (short) (narrow) %v6186_v5, 16  ;;  %v5938_v55 = vpop.permute.xlu0 %5937  ;;  %v5935_v5 = vunpack.i.h.bf16 %v5933_v59  ;;  %v10013_v59 = vld [vmem:[#allocation23_spill] sm:$0xff] }
 0x41d   : > { %v5939_v50 = vunpack.i.l.bf16 %v5938_v55  ;;  %v5940_v28 = vunpack.i.h.bf16 %v5938_v55 }
 0x41f   : > { %6035 = vxpose.xlu1.b32.start [1/4] (short) (narrow) %v6034_v44, 16  ;;  %v6216_v57 = vpack.i.bf16 %v9011_v20, %v5939_v50  ;;  %v6218_v19 = vpack.i.bf16 %v9014_v58, %v5940_v28  ;;  %v10011_v20 = vld [vmem:[#allocation122_spill] sm:$0xff] }
 0x420   : > { %6199 = vxpose.xlu0.b32.start [1/4] (short) (narrow) %v6198_v39, 16  ;;  %v5943_v24 = vpop.permute.xlu0 %5942  ;;  %v6058_v51 = vpack.i.bf16 %v10011_v20, %v5935_v5 }
 0x421   : > { %v5944_v32 = vunpack.i.l.bf16 %v5943_v24  ;;  %v5945_v44 = vunpack.i.h.bf16 %v5943_v24 }
 0x423   : > { %6037 = vxpose.xlu1.b32.cont [2/4] (short) (narrow) %v6036_v35, 16  ;;  %v6220_v39 = vpack.i.bf16 %v10010_v14, %v5944_v32  ;;  %v6222_v37 = vpack.i.bf16 %v10012_v61, %v5945_v44 }
 0x424   : > { %6201 = vxpose.xlu0.b32.cont [2/4] (short) (narrow) %v6200_v22, 16 }
 0x427   : > { %6039 = vxpose.xlu1.b32.cont [3/4] (short) (narrow) %v6038_v60, 16 }
 0x428   : > { %6203 = vxpose.xlu0.b32.cont [3/4] (short) (narrow) %v6202_v40, 16  ;;  %v5953_v41 = vpop.permute.xlu0 %5952 }
 0x429   : > { %v5954_v40 = vunpack.i.l.bf16 %v5953_v41  ;;  %v5955_v50 = vunpack.i.h.bf16 %v5953_v41 }
 0x42b   : > { %6041 = vxpose.xlu1.b32.end [4/4] (short) (narrow) %v6040_v7, 16  ;;  %v6074_v24 = vpack.i.bf16 %v8987_v0, %v5954_v40 }
 0x42c   : > { %6205 = vxpose.xlu0.b32.end [4/4] (short) (narrow) %v6204_v23, 16  ;;  %v5958_v1 = vpop.permute.xlu0 %5957 }
 0x42d   : > { %v5959_v60 = vunpack.i.l.bf16 %v5958_v1  ;;  %v5960_v53 = vunpack.i.h.bf16 %v5958_v1  ;;  %v10018_v1 = vld [vmem:[#allocation84_spill] sm:$0xff] }
 0x42f   : > { %6053 = vxpose.xlu1.b32.start [1/4] (short) (narrow) %v6052_v45, 16  ;;  %v6234_v3 = vpack.i.bf16 %v9036_v52, %v5959_v60  ;;  %v6236_v18 = vpack.i.bf16 %v9022_v12, %v5960_v53  ;;  %v10016_v52 = vld [vmem:[#allocation61_spill] sm:$0xff] }
 0x430   : > { %6217 = vxpose.xlu0.b32.start [1/4] (short) (narrow) %v6216_v57, 16  ;;  %v5963_v58 = vpop.permute.xlu0 %5962  ;;  %v6076_v15 = vpack.i.bf16 %v10016_v52, %v5955_v50 }
 0x431   : > { %v5964_v23 = vunpack.i.l.bf16 %v5963_v58  ;;  %v5965_v26 = vunpack.i.h.bf16 %v5963_v58 }
 0x433   : > { %6055 = vxpose.xlu1.b32.cont [2/4] (short) (narrow) %v6054_v42, 16  ;;  %v6238_v45 = vpack.i.bf16 %v10015_v8, %v5964_v23 }
 0x434   : > { %6219 = vxpose.xlu0.b32.cont [2/4] (short) (narrow) %v6218_v19, 16  ;;  %v5948_v35 = vpop.permute.xlu1 %5947  ;;  %v5973_v7 = vpop.permute.xlu0 %5972  ;;  %v6240_v19 = vpack.i.bf16 %v10017_v54, %v5965_v26 }
 0x435   : > { %v5949_v22 = vunpack.i.l.bf16 %v5948_v35  ;;  %v5950_v55 = vunpack.i.h.bf16 %v5948_v35  ;;  %v5975_v35 = vunpack.i.h.bf16 %v5973_v7 }
 0x437   : > { %6057 = vxpose.xlu1.b32.cont [3/4] (short) (narrow) %v6056_v17, 16  ;;  %v6070_v6 = vpack.i.bf16 %v10013_v59, %v5949_v22  ;;  %v6072_v21 = vpack.i.bf16 %v10014_v29, %v5950_v55  ;;  %v5974_v17 = vunpack.i.l.bf16 %v5973_v7 }
 0x438   : > { %6221 = vxpose.xlu0.b32.cont [3/4] (short) (narrow) %v6220_v39, 16  ;;  %v5968_v28 = vpop.permute.xlu1 %5967  ;;  %v5978_v57 = vpop.permute.xlu0 %5977 }
 0x439   : > { %v5969_v42 = vunpack.i.l.bf16 %v5968_v28  ;;  %v5979_v32 = vunpack.i.l.bf16 %v5978_v57  ;;  %v5970_v12 = vunpack.i.h.bf16 %v5968_v28  ;;  %v5980_v5 = vunpack.i.h.bf16 %v5978_v57 }
 0x43a   : > { %v6092_v20 = vpack.i.bf16 %v9068_v43, %v5974_v17 }
 0x43b   : > { %6059 = vxpose.xlu1.b32.end [4/4] (short) (narrow) %v6058_v51, 16  ;;  %v6088_v41 = vpack.i.bf16 %v9041_v9, %v5969_v42  ;;  %v6252_v0 = vpack.i.bf16 %v9071_v10, %v5979_v32  ;;  %v6090_v44 = vpack.i.bf16 %v10018_v1, %v5970_v12  ;;  %v6254_v14 = vpack.i.bf16 %v9059_v25, %v5980_v5 }
 0x43c   : > { %6223 = vxpose.xlu0.b32.end [4/4] (short) (narrow) %v6222_v37, 16  ;;  %v5983_v63 = vpop.permute.xlu0 %5982  ;;  %v5988_v51 = vpop.permute.xlu1 %5987  ;;  %v6094_v10 = vpack.i.bf16 %v9054_v4, %v5975_v35 }
 0x43d   : > { %v5984_v39 = vunpack.i.l.bf16 %v5983_v63  ;;  %v5985_v22 = vunpack.i.h.bf16 %v5983_v63  ;;  %v5989_v37 = vunpack.i.l.bf16 %v5988_v51  ;;  %v5990_v25 = vunpack.i.h.bf16 %v5988_v51 }
 0x43f   : > { %6071 = vxpose.xlu1.b32.start [1/4] (short) (narrow) %v6070_v6, 16  ;;  %v6256_v9 = vpack.i.bf16 %v9096_v27, %v5984_v39  ;;  %v6258_v60 = vpack.i.bf16 %v9080_v2, %v5985_v22  ;;  %v6106_v55 = vpack.i.bf16 %v9101_v47, %v5989_v37  ;;  %v10019_v27 = vld [vmem:[#allocation27_spill] sm:$0xff] }
 0x440   : > { %6235 = vxpose.xlu0.b32.start [1/4] (short) (narrow) %v6234_v3, 16  ;;  %v5998_v61 = vpop.permute.xlu0 %5997  ;;  %v5993_v59 = vpop.permute.xlu1 %5992  ;;  %v6108_v3 = vpack.i.bf16 %v10019_v27, %v5990_v25 }
 0x441   : > { %v5999_v58 = vunpack.i.l.bf16 %v5998_v61  ;;  %v6000_v43 = vunpack.i.h.bf16 %v5998_v61  ;;  %v5994_v40 = vunpack.i.l.bf16 %v5993_v59  ;;  %v5995_v2 = vunpack.i.h.bf16 %v5993_v59 }
 0x443   : > { %6073 = vxpose.xlu1.b32.cont [2/4] (short) (narrow) %v6072_v21, 16  ;;  %v6270_v6 = vpack.i.bf16 %v9131_v34, %v5999_v58  ;;  %v6272_v4 = vpack.i.bf16 %v9119_v33, %v6000_v43  ;;  %v6110_v21 = vpack.i.bf16 %v9126_v62, %v5994_v40  ;;  %v6112_v34 = vpack.i.bf16 %v9112_v30, %v5995_v2 }
 0x444   : > { %6237 = vxpose.xlu0.b32.cont [2/4] (short) (narrow) %v6236_v18, 16  ;;  %v6003_v53 = vpop.permute.xlu0 %6002  ;;  %v6008_v47 = vpop.permute.xlu1 %6007 }
 0x445   : > { %v6004_v29 = vunpack.i.l.bf16 %v6003_v53  ;;  %v6005_v18 = vunpack.i.h.bf16 %v6003_v53  ;;  %v6009_v50 = vunpack.i.l.bf16 %v6008_v47  ;;  %v6010_v33 = vunpack.i.h.bf16 %v6008_v47 }
 0x447   : > { %6075 = vxpose.xlu1.b32.cont [3/4] (short) (narrow) %v6074_v24, 16  ;;  %v6274_v23 = vpack.i.bf16 %v9154_v49, %v6004_v29  ;;  %v6276_v24 = vpack.i.bf16 %v9142_v11, %v6005_v18  ;;  %v6124_v8 = vpack.i.bf16 %v9157_v13, %v6009_v50  ;;  %v6126_v49 = vpack.i.bf16 %v9179_v16, %v6010_v33 }
 0x448   : > { %6239 = vxpose.xlu0.b32.cont [3/4] (short) (narrow) %v6238_v45, 16  ;;  %v6144_v7 = vpop.permute.xlu0 %6143  ;;  %v6013_v45 = vpop.permute.xlu1 %6012 }
 0x449   : > { %v6146_v62 = vunpack.i.h.bf16 %v6144_v7  ;;  %v6014_v28 = vunpack.i.l.bf16 %v6013_v45  ;;  %v6015_v30 = vunpack.i.h.bf16 %v6013_v45  ;;  %v6145_v54 = vunpack.i.l.bf16 %v6144_v7 }
 0x44b   : > { %6077 = vxpose.xlu1.b32.end [4/4] (short) (narrow) %v6076_v15, 16  ;;  %v6128_v11 = vpack.i.bf16 %v9195_v31, %v6014_v28  ;;  %v6130_v13 = vpack.i.bf16 %v9210_v36, %v6015_v30  ;;  %v6288_v16 = vpack.i.bf16 %v9147_v48, %v6145_v54 }
 0x44c   : > { %6241 = vxpose.xlu0.b32.end [4/4] (short) (narrow) %v6240_v19, 16  ;;  %v6149_v26 = vpop.permute.xlu0 %6148 }
 0x44d   : > { %v6151_v52 = vunpack.i.h.bf16 %v6149_v26  ;;  %v6150_v12 = vunpack.i.l.bf16 %v6149_v26 }
 0x44f   : > { %6089 = vxpose.xlu1.b32.start [1/4] (short) (narrow) %v6088_v41, 16  ;;  %v6290_v1 = vpack.i.bf16 %v9172_v46, %v6150_v12 }
 0x450   : > { %6253 = vxpose.xlu0.b32.start [1/4] (short) (narrow) %v6252_v0, 16  ;;  %v6154_v57 = vpop.permute.xlu0 %6153 }
 0x451   : > { %v6156_v15 = vunpack.i.h.bf16 %v6154_v57  ;;  %v6155_v48 = vunpack.i.l.bf16 %v6154_v57 }
 0x453   : > { %6091 = vxpose.xlu1.b32.cont [2/4] (short) (narrow) %v6090_v44, 16  ;;  %v6292_v46 = vpack.i.bf16 %v9186_v38, %v6155_v48 }
 0x454   : > { %6255 = vxpose.xlu0.b32.cont [2/4] (short) (narrow) %v6254_v14, 16  ;;  %v6159_v42 = vpop.permute.xlu0 %6158 }
 0x455   : > { %v6161_v19 = vunpack.i.h.bf16 %v6159_v42  ;;  %v6160_v22 = vunpack.i.l.bf16 %v6159_v42 }
 0x457   : > { %6093 = vxpose.xlu1.b32.cont [3/4] (short) (narrow) %v6092_v20, 16 }
 0x458   : > { %6257 = vxpose.xlu0.b32.cont [3/4] (short) (narrow) %v6256_v9, 16  ;;  %v6294_v9 = vpack.i.bf16 %v9205_v56, %v6160_v22 }
 0x45b   : > { %6095 = vxpose.xlu1.b32.end [4/4] (short) (narrow) %v6094_v10, 16 }
 0x45c   : > { %6259 = vxpose.xlu0.b32.end [4/4] (short) (narrow) %v6258_v60, 16 }
 0x45f   : > { %6107 = vxpose.xlu1.b32.start [1/4] (short) (narrow) %v6106_v55, 16 }
 0x460   : > { %6271 = vxpose.xlu0.b32.start [1/4] (short) (narrow) %v6270_v6, 16 }
 0x463   : > { %6109 = vxpose.xlu1.b32.cont [2/4] (short) (narrow) %v6108_v3, 16 }
 0x464   : > { %6273 = vxpose.xlu0.b32.cont [2/4] (short) (narrow) %v6272_v4, 16 }
 0x467   : > { %6111 = vxpose.xlu1.b32.cont [3/4] (short) (narrow) %v6110_v21, 16 }
 0x468   : > { %6275 = vxpose.xlu0.b32.cont [3/4] (short) (narrow) %v6274_v23, 16 }
 0x46b   : > { %6113 = vxpose.xlu1.b32.end [4/4] (short) (narrow) %v6112_v34, 16 }
 0x46c   : > { %6277 = vxpose.xlu0.b32.end [4/4] (short) (narrow) %v6276_v24, 16 }
 0x46f   : > { %6125 = vxpose.xlu1.b32.start [1/4] (short) (narrow) %v6124_v8, 16 }
 0x470   : > { %5024 = vxpose.xlu0.b32.start [1/4] (short) (narrow) %v6146_v62, 16 }
 0x473   : > { %6127 = vxpose.xlu1.b32.cont [2/4] (short) (narrow) %v6126_v49, 16 }
 0x474   : > { %5025 = vxpose.xlu0.b32.cont [2/4] (short) (narrow) %v6151_v52, 16 }
 0x477   : > { %6129 = vxpose.xlu1.b32.cont [3/4] (short) (narrow) %v6128_v11, 16 }
 0x478   : > { %5026 = vxpose.xlu0.b32.cont [3/4] (short) (narrow) %v6156_v15, 16 }
 0x47b   : > { %6131 = vxpose.xlu1.b32.end [4/4] (short) (narrow) %v6130_v13, 16  ;;  %v3453_v32 = vpop.trf.xlu1 }
 0x47c   : > { %5027 = vxpose.xlu0.b32.end [4/4] (short) (narrow) %v6161_v19, 16  ;;  %v5643_v41 = vpack.c.bf16 %v3453_v32, %v3453_v32  ;;  %v6170_v5 = vpop.trf.xlu0 }
 0x47d   : > { %v6174_v0 = vunpack.i.h.bf16 %v6170_v5  ;;  %v6171_v63 = vunpack.i.l.bf16 %v6170_v5 }
 0x47e   : > { %3477 = vst.msk [vmem:[%s9298_s24] sm:$0xf] %vm3372_vm1, %v5643_v41 }
 0x47f   : > { %6289 = vxpose.xlu1.b32.start [1/4] (short) (narrow) %v6288_v16, 16  ;;  %v3454_v31 = vpop.trf.xlu1  ;;  %v5647_v36 = vpack.c.bf16 %v6174_v0, %v6174_v0  ;;  %v5645_v17 = vpack.c.bf16 %v6171_v63, %v6171_v63 }
 0x480   : > { %v5644_v44 = vpack.c.bf16 %v3454_v31, %v3454_v31  ;;  %v6175_v14 = vpop.trf.xlu0 }
 0x481   : > { %3535 = vst.msk [vmem:[%s9303_s25] sm:$0xf] %vm3372_vm1, %v5645_v17  ;;  %5445 = vst.msk [vmem:[%s9298_s24 + $0x8] sm:$0xf] %vm3372_vm1, %v5647_v36  ;;  %v6179_v39 = vunpack.i.h.bf16 %v6175_v14  ;;  %v6176_v35 = vunpack.i.l.bf16 %v6175_v14 }
 0x482   : > { %3478 = vst.msk [vmem:[%s9298_s24 + $0x4] sm:$0xf] %vm3372_vm1, %v5644_v44 }
 0x483   : > { %6291 = vxpose.xlu1.b32.cont [2/4] (short) (narrow) %v6290_v1, 16  ;;  %v5648_v20 = vpack.c.bf16 %v6179_v39, %v6179_v39  ;;  %v5646_v51 = vpack.c.bf16 %v6176_v35, %v6176_v35 }
 0x485   : > { %3536 = vst.msk [vmem:[%s9303_s25 + $0x4] sm:$0xf] %vm3372_vm1, %v5646_v51  ;;  %5446 = vst.msk [vmem:[%s9298_s24 + $0xc] sm:$0xf] %vm3372_vm1, %v5648_v20 }
 0x487   : > { %6293 = vxpose.xlu1.b32.cont [3/4] (short) (narrow) %v6292_v46, 16 }
 0x48b   : > { %6295 = vxpose.xlu1.b32.end [4/4] (short) (narrow) %v6294_v9, 16  ;;  %v6024_v61 = vpop.trf.xlu1 }
 0x48c   : > { %v6028_v10 = vunpack.i.h.bf16 %v6024_v61  ;;  %v6025_v37 = vunpack.i.l.bf16 %v6024_v61  ;;  %v6188_v60 = vpop.trf.xlu0 }
 0x48d   : > { %v6192_v58 = vunpack.i.h.bf16 %v6188_v60  ;;  %v6189_v25 = vunpack.i.l.bf16 %v6188_v60 }
 0x48e   : > { %v5651_v38 = vpack.c.bf16 %v6028_v10, %v6028_v10  ;;  %v5649_v55 = vpack.c.bf16 %v6025_v37, %v6025_v37 }
 0x48f   : > { %v6029_v59 = vpop.trf.xlu1  ;;  %v5655_v43 = vpack.c.bf16 %v6192_v58, %v6192_v58  ;;  %v5653_v6 = vpack.c.bf16 %v6189_v25, %v6189_v25 }
 0x490   : > { %5449 = vst.msk [vmem:[%s9303_s25 + $0x8] sm:$0xf] %vm3372_vm1, %v5649_v55  ;;  %5453 = vst.msk [vmem:[%s9298_s24 + $0x10] sm:$0xf] %vm3372_vm1, %v5651_v38  ;;  %v6033_v56 = vunpack.i.h.bf16 %v6029_v59  ;;  %v6030_v53 = vunpack.i.l.bf16 %v6029_v59  ;;  %v6193_v27 = vpop.trf.xlu0 }
 0x491   : > { %5457 = vst.msk [vmem:[%s9303_s25 + $0x10] sm:$0xf] %vm3372_vm1, %v5653_v6  ;;  %5461 = vst.msk [vmem:[%s9298_s24 + $0x18] sm:$0xf] %vm3372_vm1, %v5655_v43  ;;  %v6197_v3 = vunpack.i.h.bf16 %v6193_v27  ;;  %v6194_v40 = vunpack.i.l.bf16 %v6193_v27 }
 0x492   : > { %v5652_v4 = vpack.c.bf16 %v6033_v56, %v6033_v56  ;;  %v5650_v29 = vpack.c.bf16 %v6030_v53, %v6030_v53 }
 0x493   : > { %v5656_v2 = vpack.c.bf16 %v6197_v3, %v6197_v3  ;;  %v5654_v21 = vpack.c.bf16 %v6194_v40, %v6194_v40 }
 0x494   : > { %5450 = vst.msk [vmem:[%s9303_s25 + $0xc] sm:$0xf] %vm3372_vm1, %v5650_v29  ;;  %5454 = vst.msk [vmem:[%s9298_s24 + $0x14] sm:$0xf] %vm3372_vm1, %v5652_v4 }
 0x495   : > { %5458 = vst.msk [vmem:[%s9303_s25 + $0x14] sm:$0xf] %vm3372_vm1, %v5654_v21  ;;  %5462 = vst.msk [vmem:[%s9298_s24 + $0x1c] sm:$0xf] %vm3372_vm1, %v5656_v2 }
 0x49b   : > { %v6042_v7 = vpop.trf.xlu1 }
 0x49c   : > { %v6046_v47 = vunpack.i.h.bf16 %v6042_v7  ;;  %v6043_v18 = vunpack.i.l.bf16 %v6042_v7  ;;  %v6206_v23 = vpop.trf.xlu0 }
 0x49d   : > { %v6210_v34 = vunpack.i.h.bf16 %v6206_v23  ;;  %v6207_v50 = vunpack.i.l.bf16 %v6206_v23 }
 0x49e   : > { %v5659_v24 = vpack.c.bf16 %v6046_v47, %v6046_v47  ;;  %v5657_v26 = vpack.c.bf16 %v6043_v18, %v6043_v18 }
 0x49f   : > { %v6047_v33 = vpop.trf.xlu1  ;;  %v5663_v8 = vpack.c.bf16 %v6210_v34, %v6210_v34  ;;  %v5661_v45 = vpack.c.bf16 %v6207_v50, %v6207_v50 }
 0x4a0   : > { %5465 = vst.msk [vmem:[%s9303_s25 + $0x18] sm:$0xf] %vm3372_vm1, %v5657_v26  ;;  %5469 = vst.msk [vmem:[%s9298_s24 + $0x20] sm:$0xf] %vm3372_vm1, %v5659_v24  ;;  %v6051_v62 = vunpack.i.h.bf16 %v6047_v33  ;;  %v6048_v49 = vunpack.i.l.bf16 %v6047_v33  ;;  %v6211_v28 = vpop.trf.xlu0 }
 0x4a1   : > { %5473 = vst.msk [vmem:[%s9303_s25 + $0x20] sm:$0xf] %vm3372_vm1, %v5661_v45  ;;  %5477 = vst.msk [vmem:[%s9298_s24 + $0x28] sm:$0xf] %vm3372_vm1, %v5663_v8  ;;  %v6215_v57 = vunpack.i.h.bf16 %v6211_v28  ;;  %v6212_v52 = vunpack.i.l.bf16 %v6211_v28 }
 0x4a2   : > { %v5660_v30 = vpack.c.bf16 %v6051_v62, %v6051_v62  ;;  %v5658_v11 = vpack.c.bf16 %v6048_v49, %v6048_v49 }
 0x4a3   : > { %v5664_v15 = vpack.c.bf16 %v6215_v57, %v6215_v57  ;;  %v5662_v42 = vpack.c.bf16 %v6212_v52, %v6212_v52 }
 0x4a4   : > { %5466 = vst.msk [vmem:[%s9303_s25 + $0x1c] sm:$0xf] %vm3372_vm1, %v5658_v11  ;;  %5470 = vst.msk [vmem:[%s9298_s24 + $0x24] sm:$0xf] %vm3372_vm1, %v5660_v30 }
 0x4a5   : > { %5474 = vst.msk [vmem:[%s9303_s25 + $0x24] sm:$0xf] %vm3372_vm1, %v5662_v42  ;;  %5478 = vst.msk [vmem:[%s9298_s24 + $0x2c] sm:$0xf] %vm3372_vm1, %v5664_v15 }
 0x4ab   : > { %v6060_v54 = vpop.trf.xlu1 }
 0x4ac   : > { %v6064_v13 = vunpack.i.h.bf16 %v6060_v54  ;;  %v6061_v19 = vunpack.i.l.bf16 %v6060_v54  ;;  %v6224_v32 = vpop.trf.xlu0 }
 0x4ad   : > { %v6228_v16 = vunpack.i.h.bf16 %v6224_v32  ;;  %v6225_v12 = vunpack.i.l.bf16 %v6224_v32 }
 0x4ae   : > { %v5667_v41 = vpack.c.bf16 %v6064_v13, %v6064_v13  ;;  %v5665_v5 = vpack.c.bf16 %v6061_v19, %v6061_v19 }
 0x4af   : > { %v6065_v0 = vpop.trf.xlu1  ;;  %v5671_v63 = vpack.c.bf16 %v6228_v16, %v6228_v16  ;;  %v5669_v31 = vpack.c.bf16 %v6225_v12, %v6225_v12 }
 0x4b0   : > { %5481 = vst.msk [vmem:[%s9303_s25 + $0x28] sm:$0xf] %vm3372_vm1, %v5665_v5  ;;  %5485 = vst.msk [vmem:[%s9298_s24 + $0x30] sm:$0xf] %vm3372_vm1, %v5667_v41  ;;  %v6069_v36 = vunpack.i.h.bf16 %v6065_v0  ;;  %v6066_v17 = vunpack.i.l.bf16 %v6065_v0  ;;  %v6229_v1 = vpop.trf.xlu0 }
 0x4b1   : > { %5489 = vst.msk [vmem:[%s9303_s25 + $0x30] sm:$0xf] %vm3372_vm1, %v5669_v31  ;;  %5493 = vst.msk [vmem:[%s9298_s24 + $0x38] sm:$0xf] %vm3372_vm1, %v5671_v63  ;;  %v6233_v48 = vunpack.i.h.bf16 %v6229_v1  ;;  %v6230_v44 = vunpack.i.l.bf16 %v6229_v1 }
 0x4b2   : > { %v5668_v14 = vpack.c.bf16 %v6069_v36, %v6069_v36  ;;  %v5666_v39 = vpack.c.bf16 %v6066_v17, %v6066_v17 }
 0x4b3   : > { %v5672_v35 = vpack.c.bf16 %v6233_v48, %v6233_v48  ;;  %v5670_v20 = vpack.c.bf16 %v6230_v44, %v6230_v44 }
 0x4b4   : > { %5482 = vst.msk [vmem:[%s9303_s25 + $0x2c] sm:$0xf] %vm3372_vm1, %v5666_v39  ;;  %5486 = vst.msk [vmem:[%s9298_s24 + $0x34] sm:$0xf] %vm3372_vm1, %v5668_v14 }
 0x4b5   : > { %5490 = vst.msk [vmem:[%s9303_s25 + $0x34] sm:$0xf] %vm3372_vm1, %v5670_v20  ;;  %5494 = vst.msk [vmem:[%s9298_s24 + $0x3c] sm:$0xf] %vm3372_vm1, %v5672_v35 }
 0x4bb   : > { %v6078_v51 = vpop.trf.xlu1 }
 0x4bc   : > { %v6082_v46 = vunpack.i.h.bf16 %v6078_v51  ;;  %v6079_v22 = vunpack.i.l.bf16 %v6078_v51  ;;  %v6242_v9 = vpop.trf.xlu0 }
 0x4bd   : > { %v6246_v61 = vunpack.i.h.bf16 %v6242_v9  ;;  %v6243_v10 = vunpack.i.l.bf16 %v6242_v9 }
 0x4be   : > { %v5675_v37 = vpack.c.bf16 %v6082_v46, %v6082_v46  ;;  %v5673_v60 = vpack.c.bf16 %v6079_v22, %v6079_v22 }
 0x4bf   : > { %v6083_v58 = vpop.trf.xlu1  ;;  %v5679_v25 = vpack.c.bf16 %v6246_v61, %v6246_v61  ;;  %v5677_v38 = vpack.c.bf16 %v6243_v10, %v6243_v10 }
 0x4c0   : > { %5497 = vst.msk [vmem:[%s9303_s25 + $0x38] sm:$0xf] %vm3372_vm1, %v5673_v60  ;;  %5501 = vst.msk [vmem:[%s9298_s24 + $0x40] sm:$0xf] %vm3372_vm1, %v5675_v37  ;;  %v6087_v55 = vunpack.i.h.bf16 %v6083_v58  ;;  %v6084_v59 = vunpack.i.l.bf16 %v6083_v58  ;;  %v6247_v43 = vpop.trf.xlu0 }
 0x4c1   : > { %5505 = vst.msk [vmem:[%s9303_s25 + $0x40] sm:$0xf] %vm3372_vm1, %v5677_v38  ;;  %5509 = vst.msk [vmem:[%s9298_s24 + $0x48] sm:$0xf] %vm3372_vm1, %v5679_v25  ;;  %v6251_v6 = vunpack.i.h.bf16 %v6247_v43  ;;  %v6248_v56 = vunpack.i.l.bf16 %v6247_v43 }
 0x4c2   : > { %v5676_v53 = vpack.c.bf16 %v6087_v55, %v6087_v55  ;;  %v5674_v27 = vpack.c.bf16 %v6084_v59, %v6084_v59 }
 0x4c3   : > { %v5680_v3 = vpack.c.bf16 %v6251_v6, %v6251_v6  ;;  %v5678_v40 = vpack.c.bf16 %v6248_v56, %v6248_v56 }
 0x4c4   : > { %5498 = vst.msk [vmem:[%s9303_s25 + $0x3c] sm:$0xf] %vm3372_vm1, %v5674_v27  ;;  %5502 = vst.msk [vmem:[%s9298_s24 + $0x44] sm:$0xf] %vm3372_vm1, %v5676_v53 }
 0x4c5   : > { %5506 = vst.msk [vmem:[%s9303_s25 + $0x44] sm:$0xf] %vm3372_vm1, %v5678_v40  ;;  %5510 = vst.msk [vmem:[%s9298_s24 + $0x4c] sm:$0xf] %vm3372_vm1, %v5680_v3 }
 0x4cb   : > { %v6096_v4 = vpop.trf.xlu1 }
 0x4cc   : > { %v6100_v29 = vunpack.i.h.bf16 %v6096_v4  ;;  %v6097_v2 = vunpack.i.l.bf16 %v6096_v4  ;;  %v6260_v21 = vpop.trf.xlu0 }
 0x4cd   : > { %v6264_v7 = vunpack.i.h.bf16 %v6260_v21  ;;  %v6261_v47 = vunpack.i.l.bf16 %v6260_v21 }
 0x4ce   : > { %v5683_v18 = vpack.c.bf16 %v6100_v29, %v6100_v29  ;;  %v5681_v23 = vpack.c.bf16 %v6097_v2, %v6097_v2 }
 0x4cf   : > { %v6101_v34 = vpop.trf.xlu1  ;;  %v5687_v50 = vpack.c.bf16 %v6264_v7, %v6264_v7  ;;  %v5685_v24 = vpack.c.bf16 %v6261_v47, %v6261_v47 }
 0x4d0   : > { %5513 = vst.msk [vmem:[%s9303_s25 + $0x48] sm:$0xf] %vm3372_vm1, %v5681_v23  ;;  %5517 = vst.msk [vmem:[%s9298_s24 + $0x50] sm:$0xf] %vm3372_vm1, %v5683_v18  ;;  %v6105_v26 = vunpack.i.h.bf16 %v6101_v34  ;;  %v6102_v33 = vunpack.i.l.bf16 %v6101_v34  ;;  %v6265_v8 = vpop.trf.xlu0 }
 0x4d1   : > { %5521 = vst.msk [vmem:[%s9303_s25 + $0x50] sm:$0xf] %vm3372_vm1, %v5685_v24  ;;  %5525 = vst.msk [vmem:[%s9298_s24 + $0x58] sm:$0xf] %vm3372_vm1, %v5687_v50  ;;  %v6269_v45 = vunpack.i.h.bf16 %v6265_v8  ;;  %v6266_v62 = vunpack.i.l.bf16 %v6265_v8 }
 0x4d2   : > { %v5684_v49 = vpack.c.bf16 %v6105_v26, %v6105_v26  ;;  %v5682_v28 = vpack.c.bf16 %v6102_v33, %v6102_v33 }
 0x4d3   : > { %v5688_v57 = vpack.c.bf16 %v6269_v45, %v6269_v45  ;;  %v5686_v52 = vpack.c.bf16 %v6266_v62, %v6266_v62 }
 0x4d4   : > { %5514 = vst.msk [vmem:[%s9303_s25 + $0x4c] sm:$0xf] %vm3372_vm1, %v5682_v28  ;;  %5518 = vst.msk [vmem:[%s9298_s24 + $0x54] sm:$0xf] %vm3372_vm1, %v5684_v49 }
 0x4d5   : > { %5522 = vst.msk [vmem:[%s9303_s25 + $0x54] sm:$0xf] %vm3372_vm1, %v5686_v52  ;;  %5526 = vst.msk [vmem:[%s9298_s24 + $0x5c] sm:$0xf] %vm3372_vm1, %v5688_v57 }
 0x4db   : > { %v6114_v30 = vpop.trf.xlu1 }
 0x4dc   : > { %v6118_v11 = vunpack.i.h.bf16 %v6114_v30  ;;  %v6115_v15 = vunpack.i.l.bf16 %v6114_v30  ;;  %v6278_v42 = vpop.trf.xlu0 }
 0x4dd   : > { %v6282_v54 = vunpack.i.h.bf16 %v6278_v42  ;;  %v6279_v13 = vunpack.i.l.bf16 %v6278_v42 }
 0x4de   : > { %v5691_v19 = vpack.c.bf16 %v6118_v11, %v6118_v11  ;;  %v5689_v32 = vpack.c.bf16 %v6115_v15, %v6115_v15 }
 0x4df   : > { %v6119_v16 = vpop.trf.xlu1  ;;  %v5695_v12 = vpack.c.bf16 %v6282_v54, %v6282_v54  ;;  %v5693_v41 = vpack.c.bf16 %v6279_v13, %v6279_v13 }
 0x4e0   : > { %5529 = vst.msk [vmem:[%s9303_s25 + $0x58] sm:$0xf] %vm3372_vm1, %v5689_v32  ;;  %5533 = vst.msk [vmem:[%s9298_s24 + $0x60] sm:$0xf] %vm3372_vm1, %v5691_v19  ;;  %v6123_v5 = vunpack.i.h.bf16 %v6119_v16  ;;  %v6120_v0 = vunpack.i.l.bf16 %v6119_v16  ;;  %v6283_v63 = vpop.trf.xlu0 }
 0x4e1   : > { %5537 = vst.msk [vmem:[%s9303_s25 + $0x60] sm:$0xf] %vm3372_vm1, %v5693_v41  ;;  %5541 = vst.msk [vmem:[%s9298_s24 + $0x68] sm:$0xf] %vm3372_vm1, %v5695_v12  ;;  %v6287_v31 = vunpack.i.h.bf16 %v6283_v63  ;;  %v6284_v36 = vunpack.i.l.bf16 %v6283_v63 }
 0x4e2   : > { %v5692_v17 = vpack.c.bf16 %v6123_v5, %v6123_v5  ;;  %v5690_v1 = vpack.c.bf16 %v6120_v0, %v6120_v0 }
 0x4e3   : > { %v5696_v48 = vpack.c.bf16 %v6287_v31, %v6287_v31  ;;  %v5694_v44 = vpack.c.bf16 %v6284_v36, %v6284_v36 }
 0x4e4   : > { %5530 = vst.msk [vmem:[%s9303_s25 + $0x5c] sm:$0xf] %vm3372_vm1, %v5690_v1  ;;  %5534 = vst.msk [vmem:[%s9298_s24 + $0x64] sm:$0xf] %vm3372_vm1, %v5692_v17 }
 0x4e5   : > { %5538 = vst.msk [vmem:[%s9303_s25 + $0x64] sm:$0xf] %vm3372_vm1, %v5694_v44  ;;  %5542 = vst.msk [vmem:[%s9298_s24 + $0x6c] sm:$0xf] %vm3372_vm1, %v5696_v48 }
 0x4eb   : > { %v6132_v14 = vpop.trf.xlu1 }
 0x4ec   : > { %v6136_v39 = vunpack.i.h.bf16 %v6132_v14  ;;  %v6133_v35 = vunpack.i.l.bf16 %v6132_v14  ;;  %v5040_v20 = vpop.trf.xlu0 }
 0x4ed   : > { %v5705_v51 = vpack.c.bf16 %v5040_v20, %v5040_v20 }
 0x4ee   : > { %v5699_v46 = vpack.c.bf16 %v6136_v39, %v6136_v39  ;;  %v5697_v22 = vpack.c.bf16 %v6133_v35, %v6133_v35 }
 0x4ef   : > { %v6137_v9 = vpop.trf.xlu1  ;;  %5561 = vst.msk [vmem:[%s9303_s25 + $0x78] sm:$0xf] %vm3372_vm1, %v5705_v51 }
 0x4f0   : > { %5545 = vst.msk [vmem:[%s9303_s25 + $0x68] sm:$0xf] %vm3372_vm1, %v5697_v22  ;;  %5549 = vst.msk [vmem:[%s9298_s24 + $0x70] sm:$0xf] %vm3372_vm1, %v5699_v46  ;;  %v6141_v61 = vunpack.i.h.bf16 %v6137_v9  ;;  %v6138_v10 = vunpack.i.l.bf16 %v6137_v9  ;;  %v5041_v37 = vpop.trf.xlu0 }
 0x4f1   : > { %v5706_v60 = vpack.c.bf16 %v5041_v37, %v5041_v37 }
 0x4f2   : > { %v5700_v58 = vpack.c.bf16 %v6141_v61, %v6141_v61  ;;  %v5698_v25 = vpack.c.bf16 %v6138_v10, %v6138_v10 }
 0x4f3   : > { %5562 = vst.msk [vmem:[%s9303_s25 + $0x7c] sm:$0xf] %vm3372_vm1, %v5706_v60 }
 0x4f4   : > { %5546 = vst.msk [vmem:[%s9303_s25 + $0x6c] sm:$0xf] %vm3372_vm1, %v5698_v25  ;;  %5550 = vst.msk [vmem:[%s9298_s24 + $0x74] sm:$0xf] %vm3372_vm1, %v5700_v58 }
 0x4fb   : > { %v6296_v38 = vpop.trf.xlu1 }
 0x4fc   : > { %v6300_v55 = vunpack.i.h.bf16 %v6296_v38  ;;  %v6297_v59 = vunpack.i.l.bf16 %v6296_v38 }
 0x4fe   : > { %v5703_v43 = vpack.c.bf16 %v6300_v55, %v6300_v55  ;;  %v5701_v6 = vpack.c.bf16 %v6297_v59, %v6297_v59 }
 0x4ff   : > { %v6301_v56 = vpop.trf.xlu1 }
 0x500   : > { %5553 = vst.msk [vmem:[%s9303_s25 + $0x70] sm:$0xf] %vm3372_vm1, %v5701_v6  ;;  %5557 = vst.msk [vmem:[%s9298_s24 + $0x78] sm:$0xf] %vm3372_vm1, %v5703_v43  ;;  %v6305_v53 = vunpack.i.h.bf16 %v6301_v56  ;;  %v6302_v27 = vunpack.i.l.bf16 %v6301_v56 }
 0x502   : > { %v5704_v3 = vpack.c.bf16 %v6305_v53, %v6305_v53  ;;  %v5702_v40 = vpack.c.bf16 %v6302_v27, %v6302_v27 }
 0x504   : > { %5554 = vst.msk [vmem:[%s9303_s25 + $0x74] sm:$0xf] %vm3372_vm1, %v5702_v40  ;;  %5558 = vst.msk [vmem:[%s9298_s24 + $0x7c] sm:$0xf] %vm3372_vm1, %v5704_v3  ;;  %s6701_s25 = scalar_lea.vmem %s6700_s12, 4096 }
 0x505   : > { %p6703_p1 = scmp.lt.s32.totalorder %s6701_s25, %s6695_s0 }
 0x507   : > { %p6704_p2 = por %p6703_p1, %p6702_p0 }
 0x509   : > { %p6705_p3 = pnand %p6704_p2, %p6698_p13 }
 0x50b   : > { %6708 = shalt.err (!%p6705_p3)
}
 0x50c   : > { %s6709_s10 = scalar_lea.hbm %s9435_s22, 2048  ;;  %s6713_s9 = scalar_lea.hbm %s9560_s7, 4096 }
 0x50d   : > { %p6710_p4 = scmp.ne.s32.totalorder %s9435_s22, %s6709_s10  ;;  %p6714_p9 = scmp.lt.s32.totalorder %s9435_s22, %s9560_s7 }
 0x50e   : > { %p6715_p10 = scmp.lt.s32.totalorder %s6713_s9, %s6709_s10 }
 0x50f   : > { %p6711_p7 = pnand %p6710_p4, %p6906_p5 }
 0x510   : > { %p6716_p11 = por %p6715_p10, %p6714_p9 }
 0x511   : > { %p6712_p8 = pneg %p6711_p7 }
 0x513   : > { %p6717_p12 = pnand %p6716_p11, %p6712_p8 }
 0x515   : > { %6720 = shalt.err (!%p6717_p12)
}
 0x516   : > { %s6818_s0 = smov 4   ;;  %s10020_s12 = smov 64  }
 0x517   : > { %5820 = dma.vmem_to_hbm [thread:$0]  (%p6906_p5), %s9440_s18, 2048, %s9435_s22, %s9460_s21, %s10020_s12, %s10020_s12, %s6818_s0  }
 0x518   : > { %s5068_s25 = scalar_lea.sflag [#allocation3], %s8194_s17  ;;  %s6721_s10 = scalar_lea.vmem %s9447_s23, 2048 }
 0x519   : > { %p6722_p13 = scmp.ne.s32.totalorder %s9447_s23, %s6721_s10  ;;  %s6819_s24 = smov [#allocation2]  }
 0x51a   : > { %s6725_s26 = sshll.u32 %s6819_s24, 4  ;;  %s6726_s26 = int_to_ptr.vmem [resolvable:$false] %s6725_s26 }
 0x51b   : > { %p6723_p0 = pnand %p6722_p13, %p6906_p5  ;;  %s6727_s9 = scalar_lea.vmem %s6726_s26, 4096 }
 0x51c   : > { %p6728_p2 = scmp.lt.s32.totalorder %s9447_s23, %s6726_s26  ;;  %p6729_p3 = scmp.lt.s32.totalorder %s6727_s9, %s6721_s10 }
 0x51d   : > { %p6724_p1 = pneg %p6723_p0 }
 0x51e   : > { %p6730_p4 = por %p6729_p3, %p6728_p2 }
 0x520   : > { %p6731_p7 = pnand %p6730_p4, %p6724_p1 }
 0x522   : > { %6734 = shalt.err (!%p6731_p7)
}
 0x523   : > { %s6735_s18 = scalar_lea.hbm %s9445_s2, 2048  ;;  %s6739_s19 = scalar_lea.hbm %s9559_s6, 4096 }
 0x524   : > { %p6736_p8 = scmp.ne.s32.totalorder %s9445_s2, %s6735_s18  ;;  %p6740_p11 = scmp.lt.s32.totalorder %s9445_s2, %s9559_s6 }
 0x525   : > { %p6741_p12 = scmp.lt.s32.totalorder %s6739_s19, %s6735_s18 }
 0x526   : > { %p6737_p9 = pnand %p6736_p8, %p6906_p5 }
 0x527   : > { %p6742_p13 = por %p6741_p12, %p6740_p11 }
 0x528   : > { %p6738_p10 = pneg %p6737_p9 }
 0x52a   : > { %p6743_p0 = pnand %p6742_p13, %p6738_p10 }
 0x52c   : > { %6746 = shalt.err (!%p6743_p0)
}
 0x52d   : > { %5819 = dma.vmem_to_hbm [thread:$0]  (%p6906_p5), %s9447_s23, 2048, %s9445_s2, %s5068_s25, %s10020_s12, %s10020_s12, %s6818_s0  }
 0x52e   : > { %s6747_s10 = scalar_lea.vmem %s9458_s13, 4096  ;;  %s6820_s26 = smov [#allocation6]  }
 0x52f   : > { %p6748_p1 = scmp.ne.s32.totalorder %s9458_s13, %s6747_s10  ;;  %s6751_s9 = sshll.u32 %s6820_s26, 4  ;;  %s6752_s9 = int_to_ptr.vmem [resolvable:$false] %s6751_s9 }
 0x530   : > { %s6753_s18 = scalar_lea.vmem %s6752_s9, 8192  ;;  %p6754_p4 = scmp.lt.s32.totalorder %s9458_s13, %s6752_s9 }
 0x531   : > { %p6749_p2 = pnand %p6748_p1, %p6906_p5  ;;  %p6755_p7 = scmp.lt.s32.totalorder %s6753_s18, %s6747_s10 }
 0x533   : > { %p6750_p3 = pneg %p6749_p2  ;;  %p6756_p8 = por %p6755_p7, %p6754_p4 }
 0x535   : > { %p6757_p9 = pnand %p6756_p8, %p6750_p3 }
 0x537   : > { %6760 = shalt.err (!%p6757_p9)
}
 0x538   : > { %s6761_s17 = scalar_lea.hbm %s9456_s20, 4096  ;;  %s6765_s25 = scalar_lea.hbm %s9561_s8, 8192 }
 0x539   : > { %p6762_p10 = scmp.ne.s32.totalorder %s9456_s20, %s6761_s17  ;;  %p6766_p13 = scmp.lt.s32.totalorder %s9456_s20, %s9561_s8 }
 0x53a   : > { %p6767_p0 = scmp.lt.s32.totalorder %s6765_s25, %s6761_s17 }
 0x53b   : > { %p6763_p11 = pnand %p6762_p10, %p6906_p5 }
 0x53c   : > { %p6768_p1 = por %p6767_p0, %p6766_p13 }
 0x53d   : > { %p6764_p12 = pneg %p6763_p11 }
 0x53f   : > { %p6769_p2 = pnand %p6768_p1, %p6764_p12 }
 0x541   : > { %6772 = shalt.err (!%p6769_p2)
}
 0x542   : > { %5821 = dma.vmem_to_hbm [thread:$0]  (%p6906_p5), %s9458_s13, 4096, %s9456_s20, %s9460_s21, %s10020_s12, %s10020_s12, %s6818_s0  }
 0x543 PF: > { %p5835_p3 = scmp.ge.s32.totalorder %s6811_s30, 2  ;;  %s5141_s1 = sand.u32 1, %s6799_s27  }
 0x544   : > { %s5142_s24 = scalar_lea.sflag [#allocation3], %s5141_s1 }
 0x545   : > { %p5826_p4 = pnand %p5835_p3, %p6910_p6 }
 0x547   : > { %p5827_p7 = pneg %p5826_p4 }
 0x549   : > { %6790 = dma.done.wait (%p5827_p7), %s5142_s24, 2048  }
 0x54a   : > { %6792 = vsyncadd (%p5827_p7), %s5142_s24, 4294965248  ;;  %s10021_s15 = sadd.s32 4294967294, %s6811_s30  }
 0x54b   : > { %s5150_s10 = sand.u32 1, %s10021_s15  }
 0x54c   : > { %s5151_s26 = scalar_lea.sflag [#allocation5], %s5150_s10 }
 0x54d   : > { %6794 = dma.done.wait (%p5827_p7), %s5151_s26, 6144  }
 0x54e   : > { %6796 = vsyncadd (%p5827_p7), %s5151_s26, 4294961152  ;;  %p22_p5 = scmp.ge.s32.totalorder %s6891_s11, 4   ;;  %s10022_s27 = smov %s6803_s28 }
 0x54f   : > { %s10023_s28 = smov %s6807_s29  ;;  %s10024_s29 = smov %s6904_s14 }
 0x550   : > { %s10025_s30 = smov %s6891_s11  ;;  %24 = sbr.rel (!%p22_p5) target bundleno = 9 (0x9), region = 144 }
 0x555   :  { %5165 = vsyncpa [#allocation3], 1 }
 0x556   :  { %5167 = vsyncpa [#allocation3 + $0x1], 1 }
 0x557   :  { %5168 = vsyncpa [#allocation5], 1 }
 0x558   :  { %5170 = vsyncpa [#allocation5 + $0x1], 1 }

</bundles_post_ra>
